<compile_context>
chip_gen: v5e
topology: v5e:2x2
jax: 0.10.0
libtpu: 0.0.40
codegen_flags: <defaults>
</compile_context>

<pallas_src>
import functools

import numpy as np
import jax
import jax.numpy as jnp
from jax.experimental import pallas as pl
from jax.experimental.pallas import tpu as pltpu


# ------------- phase 1: features + global max-pool + regressor + head -------
def _features_head_kernel(x_ref,
                          w1_ref, b1_ref, w2_ref, b2_ref, w3_ref, b3_ref,
                          w4_ref, b4_ref, w5_ref, b5_ref, w6_ref, b6_ref,
                          tp_ref, gmax_ref, *, dim):
    nt = pl.program_id(1)

    @pl.when(nt == 0)
    def _init():
        gmax_ref[...] = jnp.full(gmax_ref.shape, -jnp.inf, gmax_ref.dtype)

    x = x_ref[0]                                       # (TILE_N, dim) f32

    # conv1 (+folded BN) + ReLU.  K = dim is tiny -> VPU broadcast MACs in f32.
    h = x[:, 0:1] * w1_ref[0:1, :]
    for j in range(1, dim):
        h = h + x[:, j:j + 1] * w1_ref[j:j + 1, :]
    h = jnp.maximum(h + b1_ref[...], 0.0)              # (TILE_N, 64) f32

    # conv2 / conv3 (+folded BN) + ReLU: bf16 MXU matmuls, f32 accumulation.
    h = jnp.maximum(
        jnp.dot(h.astype(jnp.bfloat16), w2_ref[...],
                preferred_element_type=jnp.float32) + b2_ref[...], 0.0)
    h = jnp.maximum(
        jnp.dot(h.astype(jnp.bfloat16), w3_ref[...],
                preferred_element_type=jnp.float32) + b3_ref[...], 0.0)

    # running global max over points (torch.max(x, dim=2)).
    gmax_ref[...] = jnp.maximum(gmax_ref[...],
                                jnp.max(h, axis=0, keepdims=True))

    # regressor + transform head, once per batch on the last N tile.
    @pl.when(nt == pl.num_programs(1) - 1)
    def _head():
        g = gmax_ref[...]                              # (1, 1024) f32
        r = jnp.maximum(
            jnp.dot(g.astype(jnp.bfloat16), w4_ref[...],
                    preferred_element_type=jnp.float32) + b4_ref[...], 0.0)
        r = jnp.dot(r.astype(jnp.bfloat16), w5_ref[...],
                    preferred_element_type=jnp.float32) + b5_ref[...]
        tp = jnp.dot(r.astype(jnp.bfloat16), w6_ref[...],
                     preferred_element_type=jnp.float32) + b6_ref[...]
        tp_ref[0] = tp                                 # (1, dim*dim) = flat(T^T)


# ------------- phase 2: lane-dense apply, out_t = T @ x_t -------------------
def _apply_transform_kernel(tp_ref, xt_ref, ot_ref, *, dim):
    b = pl.program_id(0)
    xt = xt_ref[0]                                     # (dim, TILE_N) f32
    rows = []
    for c in range(dim):
        # out_t[c, :] = sum_j T^T[j, c] * x_t[j, :]   (tp[j*dim + c] = T^T[j, c])
        acc = tp_ref[b, c] * xt[0:1, :]
        for j in range(1, dim):
            acc = acc + tp_ref[b, j * dim + c] * xt[j:j + 1, :]
        rows.append(acc)
    ot_ref[0] = jnp.concatenate(rows, axis=0).astype(ot_ref.dtype)


def point_spatial_transformer(x, params, *, tile_n=256):
    """Forward pass of PointSpatialTransformer; returns (B, N, dim)."""
    B, N, dim = x.shape
    n_pad = ((N + tile_n - 1) // tile_n) * tile_n
    if n_pad != N:
        # Edge-replicate points: the global max-pool is invariant to repeated
        # points; padded outputs are sliced away at the end.
        x = jnp.pad(x, ((0, 0), (0, n_pad - N), (0, 0)), mode="edge")
    num_tiles = n_pad // tile_n

    # Whole-array VMEM residency for the (small) weights: constant across the
    # grid, so no per-step DMA / double-buffering.
    param_specs = [pl.BlockSpec(memory_space=pltpu.MemorySpace.VMEM)
                   for _ in params]
    param_bytes = sum(int(np.prod(p.shape)) * p.dtype.itemsize for p in params)

    flops1 = (2 * B * n_pad * (dim * 64 + 64 * 128 + 128 * 1024)
              + 2 * B * (1024 * 512 + 512 * 256 + 256 * dim * dim))
    bytes1 = x.size * x.dtype.itemsize + param_bytes + B * dim * dim * 4

    tp = pl.pallas_call(
        functools.partial(_features_head_kernel, dim=dim),
        out_shape=jax.ShapeDtypeStruct((B, 1, dim * dim), jnp.float32),
        grid_spec=pltpu.PrefetchScalarGridSpec(
            num_scalar_prefetch=0,
            grid=(B, num_tiles),
            in_specs=[pl.BlockSpec((1, tile_n, dim), lambda b, n: (b, n, 0))]
                     + param_specs,
            out_specs=pl.BlockSpec((1, 1, dim * dim), lambda b, n: (b, 0, 0)),
            scratch_shapes=[pltpu.VMEM((1, 1024), jnp.float32)],
        ),
        compiler_params=pltpu.CompilerParams(
            dimension_semantics=("parallel", "arbitrary")),
        cost_estimate=pl.CostEstimate(flops=flops1, transcendentals=0,
                                      bytes_accessed=bytes1),
    )(x, *params)

    # Phase 2 in NCW layout so the kernel's output is lane-dense.
    xt = jnp.transpose(x, (0, 2, 1))                   # (B, dim, n_pad)
    tp2 = tp.reshape(B, dim * dim)                     # scalars -> SMEM

    flops2 = 2 * B * n_pad * dim * dim
    bytes2 = 2 * xt.size * xt.dtype.itemsize + tp2.size * 4

    out_t = pl.pallas_call(
        functools.partial(_apply_transform_kernel, dim=dim),
        out_shape=jax.ShapeDtypeStruct((B, dim, n_pad), x.dtype),
        grid_spec=pltpu.PrefetchScalarGridSpec(
            num_scalar_prefetch=0,
            grid=(B, num_tiles),
            in_specs=[pl.BlockSpec(memory_space=pltpu.MemorySpace.SMEM),
                      pl.BlockSpec((1, dim, tile_n), lambda b, n: (b, 0, n))],
            out_specs=pl.BlockSpec((1, dim, tile_n), lambda b, n: (b, 0, n)),
        ),
        compiler_params=pltpu.CompilerParams(
            dimension_semantics=("parallel", "parallel")),
        cost_estimate=pl.CostEstimate(flops=flops2, transcendentals=0,
                                      bytes_accessed=bytes2),
    )(tp2, xt)

    return jnp.transpose(out_t, (0, 2, 1))[:, :N, :]


def init_params(dim, key, *, identity_head=True, eps=1e-5):
    """Synthetic parameters matching the module's shapes.  BatchNorm is folded
    (inference mode) into the preceding conv/linear.  Weights are pre-
    transposed to (in, out); MXU-facing weights are bf16, biases f32.  The
    transform head is output-permuted so tp == flatten(T^T)."""
    ks = iter(jax.random.split(key, 32))

    def folded_linear_bn(cin, cout, wdtype):
        W = 0.1 * jax.random.normal(next(ks), (cout, cin), jnp.float32)
        b = 0.05 * jax.random.normal(next(ks), (cout,), jnp.float32)
        gamma = 1.0 + 0.1 * jax.random.normal(next(ks), (cout,), jnp.float32)
        beta = 0.05 * jax.random.normal(next(ks), (cout,), jnp.float32)
        mean = 0.05 * jax.random.normal(next(ks), (cout,), jnp.float32)
        var = jnp.abs(1.0 + 0.1 * jax.random.normal(next(ks), (cout,), jnp.float32))
        scale = gamma * jax.lax.rsqrt(var + eps)
        w_eff = (W * scale[:, None]).T.astype(wdtype)        # (cin, cout)
        b_eff = ((b - mean) * scale + beta)[None, :]         # (1, cout) f32
        return w_eff, b_eff

    w1, b1 = folded_linear_bn(dim, 64, jnp.float32)     # Conv1d(dim,64,1)+BN (VPU)
    w2, b2 = folded_linear_bn(64, 128, jnp.bfloat16)    # Conv1d(64,128,1)+BN
    w3, b3 = folded_linear_bn(128, 1024, jnp.bfloat16)  # Conv1d(128,1024,1)+BN
    w4, b4 = folded_linear_bn(1024, 512, jnp.bfloat16)  # Linear(1024,512)+BN

    W5 = 0.1 * jax.random.normal(next(ks), (256, 512), jnp.float32)  # Linear(512,256)
    b5v = 0.05 * jax.random.normal(next(ks), (256,), jnp.float32)
    w5, b5 = W5.T.astype(jnp.bfloat16), b5v[None, :]

    # transform = Linear(256, dim*dim); _init_identity: weight=0, bias=eye(dim)
    if identity_head:
        W6 = jnp.zeros((dim * dim, 256), jnp.float32)
        b6v = jnp.eye(dim, dtype=jnp.float32).reshape(-1)
    else:
        W6 = 0.05 * jax.random.normal(next(ks), (dim * dim, 256), jnp.float32)
        b6v = 0.05 * jax.random.normal(next(ks), (dim * dim,), jnp.float32)

    # Permute head outputs so tp[j*dim + c] == T[c, j]  (tp = flatten(T^T)).
    perm = np.array([c * dim + j for j in range(dim) for c in range(dim)],
                    dtype=np.int32)
    w6 = W6.T[:, perm].astype(jnp.bfloat16)              # (256, dim*dim)
    b6 = b6v[None, perm]                                 # (1, dim*dim) f32

    return [w1, b1, w2, b2, w3, b3, w4, b4, w5, b5, w6, b6]


def reference_forward(x, params):
    """Pure-JAX reference of the PyTorch forward (folded inference-mode BN),
    mirroring the kernel's bf16 matmul inputs / f32 accumulation."""
    w1, b1, w2, b2, w3, b3, w4, b4, w5, b5, w6, b6 = params
    B, N, dim = x.shape
    f32, bf16 = jnp.float32, jnp.bfloat16
    hi = jax.lax.Precision.HIGHEST
    h = jnp.maximum(jnp.einsum("bnj,jk->bnk", x, w1, precision=hi) + b1, 0.0)
    h = jnp.maximum(jnp.einsum("bnk,kl->bnl", h.astype(bf16), w2,
                               preferred_element_type=f32) + b2, 0.0)
    h = jnp.maximum(jnp.einsum("bnk,kl->bnl", h.astype(bf16), w3,
                               preferred_element_type=f32) + b3, 0.0)
    g = jnp.max(h, axis=1)                               # (B, 1024)
    r = jnp.maximum(jnp.einsum("bk,kl->bl", g.astype(bf16), w4,
                               preferred_element_type=f32) + b4, 0.0)
    r = jnp.einsum("bk,kl->bl", r.astype(bf16), w5,
                   preferred_element_type=f32) + b5
    tp = jnp.einsum("bk,kl->bl", r.astype(bf16), w6,
                    preferred_element_type=f32) + b6
    Tt = tp.reshape(B, dim, dim)                         # == T^T
    return jnp.einsum("bnj,bjc->bnc", x, Tt, precision=hi)   # == bmm(T, x^T)^T


if __name__ == "__main__":
    dim = 3
    key = jax.random.PRNGKey(0)
    k1, k2, k3, k4 = jax.random.split(key, 4)
    fwd = jax.jit(point_spatial_transformer)

    # Test 1: module as specified (identity-initialized transform head).
    B, N = 2, 512
    x = jax.random.normal(k1, (B, N, dim), jnp.float32)
    params = init_params(dim, k2, identity_head=True)
    out = jax.block_until_ready(fwd(x, params))
    assert out.shape == (B, N, dim)
    ref = reference_forward(x, params)
    np.testing.assert_allclose(np.asarray(out), np.asarray(ref),
                               rtol=1e-2, atol=1e-2)
    # Identity-initialized head => the whole forward is the identity map.
    np.testing.assert_allclose(np.asarray(out), np.asarray(x),
                               rtol=1e-5, atol=1e-5)

    # Test 2: non-identity transform head, ragged N (exercises edge padding
    # and the multi-tile running max feeding a live head).
    B2, N2 = 1, 300
    x2 = jax.random.normal(k3, (B2, N2, dim), jnp.float32)
    params2 = init_params(dim, k4, identity_head=False)
    out2 = jax.block_until_ready(fwd(x2, params2))
    assert out2.shape == (B2, N2, dim)
    ref2 = reference_forward(x2, params2)
    np.testing.assert_allclose(np.asarray(out2), np.asarray(ref2),
                               rtol=1e-2, atol=1e-2)

    print("KERNEL_OK")
</pallas_src>

<mosaic_0001>
module attributes {stable_mosaic.version = 11 : i64} {
  func.func @_features_head_kernel(%arg0: i32, %arg1: i32, %arg2: memref<1x256x3xf32, #tpu.memory_space<vmem>>, %arg3: memref<3x64xf32, #tpu.memory_space<vmem>>, %arg4: memref<1x64xf32, #tpu.memory_space<vmem>>, %arg5: memref<64x128xbf16, #tpu.memory_space<vmem>>, %arg6: memref<1x128xf32, #tpu.memory_space<vmem>>, %arg7: memref<128x1024xbf16, #tpu.memory_space<vmem>>, %arg8: memref<1x1024xf32, #tpu.memory_space<vmem>>, %arg9: memref<1024x512xbf16, #tpu.memory_space<vmem>>, %arg10: memref<1x512xf32, #tpu.memory_space<vmem>>, %arg11: memref<512x256xbf16, #tpu.memory_space<vmem>>, %arg12: memref<1x256xf32, #tpu.memory_space<vmem>>, %arg13: memref<256x9xbf16, #tpu.memory_space<vmem>>, %arg14: memref<1x9xf32, #tpu.memory_space<vmem>>, %arg15: memref<1x1x9xf32, #tpu.memory_space<vmem>>, %arg16: memref<1x1024xf32, #tpu.memory_space<vmem>>) attributes {dimension_semantics = [#tpu.dimension_semantics<parallel>, #tpu.dimension_semantics<arbitrary>], iteration_bounds = array<i64: 2, 2>, scalar_prefetch = 0 : i64, scratch_operands = 1 : i64, tpu.core_type = #tpu.core_type<tc>, window_params = [{transform_indices = @transform_0, window_bounds = array<i64: 1, 256, 3>}, {pipeline_mode = #tpu.pipeline_mode<synchronous>, transform_indices = @transform_1, window_bounds = array<i64: 3, 64>}, {pipeline_mode = #tpu.pipeline_mode<synchronous>, transform_indices = @transform_2, window_bounds = array<i64: 1, 64>}, {pipeline_mode = #tpu.pipeline_mode<synchronous>, transform_indices = @transform_3, window_bounds = array<i64: 64, 128>}, {pipeline_mode = #tpu.pipeline_mode<synchronous>, transform_indices = @transform_4, window_bounds = array<i64: 1, 128>}, {pipeline_mode = #tpu.pipeline_mode<synchronous>, transform_indices = @transform_5, window_bounds = array<i64: 128, 1024>}, {pipeline_mode = #tpu.pipeline_mode<synchronous>, transform_indices = @transform_6, window_bounds = array<i64: 1, 1024>}, {pipeline_mode = #tpu.pipeline_mode<synchronous>, transform_indices = @transform_7, window_bounds = array<i64: 1024, 512>}, {pipeline_mode = #tpu.pipeline_mode<synchronous>, transform_indices = @transform_8, window_bounds = array<i64: 1, 512>}, {pipeline_mode = #tpu.pipeline_mode<synchronous>, transform_indices = @transform_9, window_bounds = array<i64: 512, 256>}, {pipeline_mode = #tpu.pipeline_mode<synchronous>, transform_indices = @transform_10, window_bounds = array<i64: 1, 256>}, {pipeline_mode = #tpu.pipeline_mode<synchronous>, transform_indices = @transform_11, window_bounds = array<i64: 256, 9>}, {pipeline_mode = #tpu.pipeline_mode<synchronous>, transform_indices = @transform_12, window_bounds = array<i64: 1, 9>}, {transform_indices = @transform_13, window_bounds = array<i64: 1, 1, 9>}]} {
    %c0_i32 = arith.constant 0 : i32
    %0 = arith.cmpi eq, %arg1, %c0_i32 : i32
    %1 = arith.extui %0 : i1 to i32
    %c0_i32_0 = arith.constant 0 : i32
    %2 = arith.cmpi ne, %1, %c0_i32_0 : i32
    scf.if %2 {
      %cst_27 = arith.constant 0xFF800000 : f32
      %51 = vector.broadcast %cst_27 : f32 to vector<1x1024xf32>
      %c0_28 = arith.constant 0 : index
      %c0_29 = arith.constant 0 : index
      %52 = vector.load %arg16[%c0_28, %c0_29] : memref<1x1024xf32, #tpu.memory_space<vmem>>, vector<1x1024xf32>
      tpu.vector_store %arg16[%c0_28, %c0_29], %51 {strides = array<i32>} : memref<1x1024xf32, #tpu.memory_space<vmem>>, vector<1x1024xf32>,
    } else {
    }
    %c0 = arith.constant 0 : index
    %c0_1 = arith.constant 0 : index
    %c0_2 = arith.constant 0 : index
    %3 = vector.load %arg2[%c0, %c0_1, %c0_2] : memref<1x256x3xf32, #tpu.memory_space<vmem>>, vector<1x256x3xf32>
    %4 = vector.shape_cast %3 : vector<1x256x3xf32> to vector<256x3xf32>
    %5 = vector.extract_strided_slice %4 {offsets = [0, 0], sizes = [256, 1], strides = [1, 1]} : vector<256x3xf32> to vector<256x1xf32>
    %c0_3 = arith.constant 0 : index
    %c0_4 = arith.constant 0 : index
    %6 = vector.load %arg3[%c0_3, %c0_4] : memref<3x64xf32, #tpu.memory_space<vmem>>, vector<1x64xf32>
    %7 = vector.broadcast %5 : vector<256x1xf32> to vector<256x64xf32>
    %8 = vector.broadcast %6 : vector<1x64xf32> to vector<256x64xf32>
    %9 = arith.mulf %7, %8 : vector<256x64xf32>
    %10 = vector.extract_strided_slice %4 {offsets = [0, 1], sizes = [256, 1], strides = [1, 1]} : vector<256x3xf32> to vector<256x1xf32>
    %c1 = arith.constant 1 : index
    %c0_5 = arith.constant 0 : index
    %11 = vector.load %arg3[%c1, %c0_5] : memref<3x64xf32, #tpu.memory_space<vmem>>, vector<1x64xf32>
    %12 = vector.broadcast %10 : vector<256x1xf32> to vector<256x64xf32>
    %13 = vector.broadcast %11 : vector<1x64xf32> to vector<256x64xf32>
    %14 = arith.mulf %12, %13 : vector<256x64xf32>
    %15 = arith.addf %9, %14 : vector<256x64xf32>
    %16 = vector.extract_strided_slice %4 {offsets = [0, 2], sizes = [256, 1], strides = [1, 1]} : vector<256x3xf32> to vector<256x1xf32>
    %c2 = arith.constant 2 : index
    %c0_6 = arith.constant 0 : index
    %17 = vector.load %arg3[%c2, %c0_6] : memref<3x64xf32, #tpu.memory_space<vmem>>, vector<1x64xf32>
    %18 = vector.broadcast %16 : vector<256x1xf32> to vector<256x64xf32>
    %19 = vector.broadcast %17 : vector<1x64xf32> to vector<256x64xf32>
    %20 = arith.mulf %18, %19 : vector<256x64xf32>
    %21 = arith.addf %15, %20 : vector<256x64xf32>
    %c0_7 = arith.constant 0 : index
    %c0_8 = arith.constant 0 : index
    %22 = vector.load %arg4[%c0_7, %c0_8] : memref<1x64xf32, #tpu.memory_space<vmem>>, vector<1x64xf32>
    %23 = vector.broadcast %22 : vector<1x64xf32> to vector<256x64xf32>
    %24 = arith.addf %21, %23 : vector<256x64xf32>
    %cst = arith.constant 0.000000e+00 : f32
    %25 = vector.broadcast %cst : f32 to vector<256x64xf32>
    %26 = arith.maximumf %24, %25 : vector<256x64xf32>
    %27 = arith.truncf %26 : vector<256x64xf32> to vector<256x64xbf16>
    %c0_9 = arith.constant 0 : index
    %c0_10 = arith.constant 0 : index
    %28 = vector.load %arg5[%c0_9, %c0_10] : memref<64x128xbf16, #tpu.memory_space<vmem>>, vector<64x128xbf16>
    %cst_11 = arith.constant dense<0.000000e+00> : vector<256x128xf32>
    %29 = tpu.matmul %27, %28, %cst_11 {dimension_numbers = #tpu.dot_dimension_numbers<[1], [0], [0], [1], [0, 0, 1, 1], [], []>} : vector<256x64xbf16>, vector<64x128xbf16>, vector<256x128xf32> -> vector<256x128xf32>
    %c0_12 = arith.constant 0 : index
    %c0_13 = arith.constant 0 : index
    %30 = vector.load %arg6[%c0_12, %c0_13] : memref<1x128xf32, #tpu.memory_space<vmem>>, vector<1x128xf32>
    %31 = vector.broadcast %30 : vector<1x128xf32> to vector<256x128xf32>
    %32 = arith.addf %29, %31 : vector<256x128xf32>
    %cst_14 = arith.constant 0.000000e+00 : f32
    %33 = vector.broadcast %cst_14 : f32 to vector<256x128xf32>
    %34 = arith.maximumf %32, %33 : vector<256x128xf32>
    %35 = arith.truncf %34 : vector<256x128xf32> to vector<256x128xbf16>
    %c0_15 = arith.constant 0 : index
    %c0_16 = arith.constant 0 : index
    %36 = vector.load %arg7[%c0_15, %c0_16] : memref<128x1024xbf16, #tpu.memory_space<vmem>>, vector<128x1024xbf16>
    %cst_17 = arith.constant dense<0.000000e+00> : vector<256x1024xf32>
    %37 = tpu.matmul %35, %36, %cst_17 {dimension_numbers = #tpu.dot_dimension_numbers<[1], [0], [0], [1], [0, 0, 1, 1], [], []>} : vector<256x128xbf16>, vector<128x1024xbf16>, vector<256x1024xf32> -> vector<256x1024xf32>
    %c0_18 = arith.constant 0 : index
    %c0_19 = arith.constant 0 : index
    %38 = vector.load %arg8[%c0_18, %c0_19] : memref<1x1024xf32, #tpu.memory_space<vmem>>, vector<1x1024xf32>
    %39 = vector.broadcast %38 : vector<1x1024xf32> to vector<256x1024xf32>
    %40 = arith.addf %37, %39 : vector<256x1024xf32>
    %cst_20 = arith.constant 0.000000e+00 : f32
    %41 = vector.broadcast %cst_20 : f32 to vector<256x1024xf32>
    %42 = arith.maximumf %40, %41 : vector<256x1024xf32>
    %c0_21 = arith.constant 0 : index
    %c0_22 = arith.constant 0 : index
    %43 = vector.load %arg16[%c0_21, %c0_22] : memref<1x1024xf32, #tpu.memory_space<vmem>>, vector<1x1024xf32>
    %cst_23 = arith.constant dense<0xFF800000> : vector<1024xf32>
    %44 = vector.multi_reduction <maximumf>, %42, %cst_23 [0] : vector<256x1024xf32> to vector<1024xf32>
    %45 = vector.shape_cast %44 : vector<1024xf32> to vector<1x1024xf32>
    %46 = arith.maximumf %43, %45 : vector<1x1024xf32>
    %c0_24 = arith.constant 0 : index
    %c0_25 = arith.constant 0 : index
    %47 = vector.load %arg16[%c0_24, %c0_25] : memref<1x1024xf32, #tpu.memory_space<vmem>>, vector<1x1024xf32>
    tpu.vector_store %arg16[%c0_24, %c0_25], %46 {strides = array<i32>} : memref<1x1024xf32, #tpu.memory_space<vmem>>, vector<1x1024xf32>,
    %c1_i32 = arith.constant 1 : i32
    %48 = arith.cmpi eq, %arg1, %c1_i32 : i32
    %49 = arith.extui %48 : i1 to i32
    %c0_i32_26 = arith.constant 0 : i32
    %50 = arith.cmpi ne, %49, %c0_i32_26 : i32
    scf.if %50 {
      %c0_27 = arith.constant 0 : index
      %c0_28 = arith.constant 0 : index
      %51 = vector.load %arg16[%c0_27, %c0_28] : memref<1x1024xf32, #tpu.memory_space<vmem>>, vector<1x1024xf32>
      %52 = arith.truncf %51 : vector<1x1024xf32> to vector<1x1024xbf16>
      %c0_29 = arith.constant 0 : index
      %c0_30 = arith.constant 0 : index
      %53 = vector.load %arg9[%c0_29, %c0_30] : memref<1024x512xbf16, #tpu.memory_space<vmem>>, vector<1024x512xbf16>
      %cst_31 = arith.constant dense<0.000000e+00> : vector<1x512xf32>
      %54 = tpu.matmul %52, %53, %cst_31 {dimension_numbers = #tpu.dot_dimension_numbers<[1], [0], [0], [1], [0, 0, 1, 1], [], []>} : vector<1x1024xbf16>, vector<1024x512xbf16>, vector<1x512xf32> -> vector<1x512xf32>
      %c0_32 = arith.constant 0 : index
      %c0_33 = arith.constant 0 : index
      %55 = vector.load %arg10[%c0_32, %c0_33] : memref<1x512xf32, #tpu.memory_space<vmem>>, vector<1x512xf32>
      %56 = arith.addf %54, %55 : vector<1x512xf32>
      %cst_34 = arith.constant 0.000000e+00 : f32
      %57 = vector.broadcast %cst_34 : f32 to vector<1x512xf32>
      %58 = arith.maximumf %56, %57 : vector<1x512xf32>
      %59 = arith.truncf %58 : vector<1x512xf32> to vector<1x512xbf16>
      %c0_35 = arith.constant 0 : index
      %c0_36 = arith.constant 0 : index
      %60 = vector.load %arg11[%c0_35, %c0_36] : memref<512x256xbf16, #tpu.memory_space<vmem>>, vector<512x256xbf16>
      %cst_37 = arith.constant dense<0.000000e+00> : vector<1x256xf32>
      %61 = tpu.matmul %59, %60, %cst_37 {dimension_numbers = #tpu.dot_dimension_numbers<[1], [0], [0], [1], [0, 0, 1, 1], [], []>} : vector<1x512xbf16>, vector<512x256xbf16>, vector<1x256xf32> -> vector<1x256xf32>
      %c0_38 = arith.constant 0 : index
      %c0_39 = arith.constant 0 : index
      %62 = vector.load %arg12[%c0_38, %c0_39] : memref<1x256xf32, #tpu.memory_space<vmem>>, vector<1x256xf32>
      %63 = arith.addf %61, %62 : vector<1x256xf32>
      %64 = arith.truncf %63 : vector<1x256xf32> to vector<1x256xbf16>
      %c0_40 = arith.constant 0 : index
      %c0_41 = arith.constant 0 : index
      %65 = vector.load %arg13[%c0_40, %c0_41] : memref<256x9xbf16, #tpu.memory_space<vmem>>, vector<256x9xbf16>
      %cst_42 = arith.constant dense<0.000000e+00> : vector<1x9xf32>
      %66 = tpu.matmul %64, %65, %cst_42 {dimension_numbers = #tpu.dot_dimension_numbers<[1], [0], [0], [1], [0, 0, 1, 1], [], []>} : vector<1x256xbf16>, vector<256x9xbf16>, vector<1x9xf32> -> vector<1x9xf32>
      %c0_43 = arith.constant 0 : index
      %c0_44 = arith.constant 0 : index
      %67 = vector.load %arg14[%c0_43, %c0_44] : memref<1x9xf32, #tpu.memory_space<vmem>>, vector<1x9xf32>
      %68 = arith.addf %66, %67 : vector<1x9xf32>
      %c0_45 = arith.constant 0 : index
      %c0_46 = arith.constant 0 : index
      %c0_47 = arith.constant 0 : index
      %69 = vector.load %arg15[%c0_45, %c0_46, %c0_47] : memref<1x1x9xf32, #tpu.memory_space<vmem>>, vector<1x1x9xf32>
      %70 = vector.shape_cast %69 : vector<1x1x9xf32> to vector<1x9xf32>
      %71 = vector.shape_cast %68 : vector<1x9xf32> to vector<1x1x9xf32>
      tpu.vector_store %arg15[%c0_45, %c0_46, %c0_47], %71 {strides = array<i32>} : memref<1x1x9xf32, #tpu.memory_space<vmem>>, vector<1x1x9xf32>,
    } else {
    }
    return
  }
  func.func @transform_0(%arg0: i32, %arg1: i32) -> (i32, i32, i32) {
    %c0_i32 = arith.constant 0 : i32
    %c0_i32_0 = arith.constant 0 : i32
    return %arg0, %arg1, %c0_i32 : i32, i32, i32
  }
  func.func @transform_1(%arg0: i32, %arg1: i32) -> (i32, i32) {
    %c0_i32 = arith.constant 0 : i32
    %c0_i32_0 = arith.constant 0 : i32
    %c0_i32_1 = arith.constant 0 : i32
    return %c0_i32, %c0_i32_0 : i32, i32
  }
  func.func @transform_2(%arg0: i32, %arg1: i32) -> (i32, i32) {
    %c0_i32 = arith.constant 0 : i32
    %c0_i32_0 = arith.constant 0 : i32
    %c0_i32_1 = arith.constant 0 : i32
    return %c0_i32, %c0_i32_0 : i32, i32
  }
  func.func @transform_3(%arg0: i32, %arg1: i32) -> (i32, i32) {
    %c0_i32 = arith.constant 0 : i32
    %c0_i32_0 = arith.constant 0 : i32
    %c0_i32_1 = arith.constant 0 : i32
    return %c0_i32, %c0_i32_0 : i32, i32
  }
  func.func @transform_4(%arg0: i32, %arg1: i32) -> (i32, i32) {
    %c0_i32 = arith.constant 0 : i32
    %c0_i32_0 = arith.constant 0 : i32
    %c0_i32_1 = arith.constant 0 : i32
    return %c0_i32, %c0_i32_0 : i32, i32
  }
  func.func @transform_5(%arg0: i32, %arg1: i32) -> (i32, i32) {
    %c0_i32 = arith.constant 0 : i32
    %c0_i32_0 = arith.constant 0 : i32
    %c0_i32_1 = arith.constant 0 : i32
    return %c0_i32, %c0_i32_0 : i32, i32
  }
  func.func @transform_6(%arg0: i32, %arg1: i32) -> (i32, i32) {
    %c0_i32 = arith.constant 0 : i32
    %c0_i32_0 = arith.constant 0 : i32
    %c0_i32_1 = arith.constant 0 : i32
    return %c0_i32, %c0_i32_0 : i32, i32
  }
  func.func @transform_7(%arg0: i32, %arg1: i32) -> (i32, i32) {
    %c0_i32 = arith.constant 0 : i32
    %c0_i32_0 = arith.constant 0 : i32
    %c0_i32_1 = arith.constant 0 : i32
    return %c0_i32, %c0_i32_0 : i32, i32
  }
  func.func @transform_8(%arg0: i32, %arg1: i32) -> (i32, i32) {
    %c0_i32 = arith.constant 0 : i32
    %c0_i32_0 = arith.constant 0 : i32
    %c0_i32_1 = arith.constant 0 : i32
    return %c0_i32, %c0_i32_0 : i32, i32
  }
  func.func @transform_9(%arg0: i32, %arg1: i32) -> (i32, i32) {
    %c0_i32 = arith.constant 0 : i32
    %c0_i32_0 = arith.constant 0 : i32
    %c0_i32_1 = arith.constant 0 : i32
    return %c0_i32, %c0_i32_0 : i32, i32
  }
  func.func @transform_10(%arg0: i32, %arg1: i32) -> (i32, i32) {
    %c0_i32 = arith.constant 0 : i32
    %c0_i32_0 = arith.constant 0 : i32
    %c0_i32_1 = arith.constant 0 : i32
    return %c0_i32, %c0_i32_0 : i32, i32
  }
  func.func @transform_11(%arg0: i32, %arg1: i32) -> (i32, i32) {
    %c0_i32 = arith.constant 0 : i32
    %c0_i32_0 = arith.constant 0 : i32
    %c0_i32_1 = arith.constant 0 : i32
    return %c0_i32, %c0_i32_0 : i32, i32
  }
  func.func @transform_12(%arg0: i32, %arg1: i32) -> (i32, i32) {
    %c0_i32 = arith.constant 0 : i32
    %c0_i32_0 = arith.constant 0 : i32
    %c0_i32_1 = arith.constant 0 : i32
    return %c0_i32, %c0_i32_0 : i32, i32
  }
  func.func @transform_13(%arg0: i32, %arg1: i32) -> (i32, i32, i32) {
    %c0_i32 = arith.constant 0 : i32
    %c0_i32_0 = arith.constant 0 : i32
    %c0_i32_1 = arith.constant 0 : i32
    return %arg0, %c0_i32, %c0_i32_0 : i32, i32, i32
  }
}

module attributes {stable_mosaic.version = 11 : i64} {
  func.func @_apply_transform_kernel(%arg0: i32, %arg1: i32, %arg2: memref<2x9xf32, #tpu.memory_space<smem>>, %arg3: memref<1x3x256xf32, #tpu.memory_space<vmem>>, %arg4: memref<1x3x256xf32, #tpu.memory_space<vmem>>) attributes {dimension_semantics = [#tpu.dimension_semantics<parallel>, #tpu.dimension_semantics<parallel>], iteration_bounds = array<i64: 2, 2>, scalar_prefetch = 0 : i64, scratch_operands = 0 : i64, tpu.core_type = #tpu.core_type<tc>, window_params = [{transform_indices = @transform_0, window_bounds = array<i64: 2, 9>}, {transform_indices = @transform_1, window_bounds = array<i64: 1, 3, 256>}, {transform_indices = @transform_2, window_bounds = array<i64: 1, 3, 256>}]} {
    %c0 = arith.constant 0 : index
    %c0_0 = arith.constant 0 : index
    %c0_1 = arith.constant 0 : index
    %0 = vector.load %arg3[%c0, %c0_0, %c0_1] : memref<1x3x256xf32, #tpu.memory_space<vmem>>, vector<1x3x256xf32>
    %1 = vector.shape_cast %0 : vector<1x3x256xf32> to vector<3x256xf32>
    %2 = arith.index_cast %arg0 : i32 to index
    %c0_2 = arith.constant 0 : index
    %3 = memref.load %arg2[%2, %c0_2] : memref<2x9xf32, #tpu.memory_space<smem>>
    %4 = vector.extract_strided_slice %1 {offsets = [0, 0], sizes = [1, 256], strides = [1, 1]} : vector<3x256xf32> to vector<1x256xf32>
    %5 = vector.broadcast %3 : f32 to vector<1x256xf32>
    %6 = arith.mulf %5, %4 : vector<1x256xf32>
    %7 = arith.index_cast %arg0 : i32 to index
    %c3 = arith.constant 3 : index
    %8 = memref.load %arg2[%7, %c3] : memref<2x9xf32, #tpu.memory_space<smem>>
    %9 = vector.extract_strided_slice %1 {offsets = [1, 0], sizes = [1, 256], strides = [1, 1]} : vector<3x256xf32> to vector<1x256xf32>
    %10 = vector.broadcast %8 : f32 to vector<1x256xf32>
    %11 = arith.mulf %10, %9 : vector<1x256xf32>
    %12 = arith.addf %6, %11 : vector<1x256xf32>
    %13 = arith.index_cast %arg0 : i32 to index
    %c6 = arith.constant 6 : index
    %14 = memref.load %arg2[%13, %c6] : memref<2x9xf32, #tpu.memory_space<smem>>
    %15 = vector.extract_strided_slice %1 {offsets = [2, 0], sizes = [1, 256], strides = [1, 1]} : vector<3x256xf32> to vector<1x256xf32>
    %16 = vector.broadcast %14 : f32 to vector<1x256xf32>
    %17 = arith.mulf %16, %15 : vector<1x256xf32>
    %18 = arith.addf %12, %17 : vector<1x256xf32>
    %19 = arith.index_cast %arg0 : i32 to index
    %c1 = arith.constant 1 : index
    %20 = memref.load %arg2[%19, %c1] : memref<2x9xf32, #tpu.memory_space<smem>>
    %21 = vector.extract_strided_slice %1 {offsets = [0, 0], sizes = [1, 256], strides = [1, 1]} : vector<3x256xf32> to vector<1x256xf32>
    %22 = vector.broadcast %20 : f32 to vector<1x256xf32>
    %23 = arith.mulf %22, %21 : vector<1x256xf32>
    %24 = arith.index_cast %arg0 : i32 to index
    %c4 = arith.constant 4 : index
    %25 = memref.load %arg2[%24, %c4] : memref<2x9xf32, #tpu.memory_space<smem>>
    %26 = vector.extract_strided_slice %1 {offsets = [1, 0], sizes = [1, 256], strides = [1, 1]} : vector<3x256xf32> to vector<1x256xf32>
    %27 = vector.broadcast %25 : f32 to vector<1x256xf32>
    %28 = arith.mulf %27, %26 : vector<1x256xf32>
    %29 = arith.addf %23, %28 : vector<1x256xf32>
    %30 = arith.index_cast %arg0 : i32 to index
    %c7 = arith.constant 7 : index
    %31 = memref.load %arg2[%30, %c7] : memref<2x9xf32, #tpu.memory_space<smem>>
    %32 = vector.extract_strided_slice %1 {offsets = [2, 0], sizes = [1, 256], strides = [1, 1]} : vector<3x256xf32> to vector<1x256xf32>
    %33 = vector.broadcast %31 : f32 to vector<1x256xf32>
    %34 = arith.mulf %33, %32 : vector<1x256xf32>
    %35 = arith.addf %29, %34 : vector<1x256xf32>
    %36 = arith.index_cast %arg0 : i32 to index
    %c2 = arith.constant 2 : index
    %37 = memref.load %arg2[%36, %c2] : memref<2x9xf32, #tpu.memory_space<smem>>
    %38 = vector.extract_strided_slice %1 {offsets = [0, 0], sizes = [1, 256], strides = [1, 1]} : vector<3x256xf32> to vector<1x256xf32>
    %39 = vector.broadcast %37 : f32 to vector<1x256xf32>
    %40 = arith.mulf %39, %38 : vector<1x256xf32>
    %41 = arith.index_cast %arg0 : i32 to index
    %c5 = arith.constant 5 : index
    %42 = memref.load %arg2[%41, %c5] : memref<2x9xf32, #tpu.memory_space<smem>>
    %43 = vector.extract_strided_slice %1 {offsets = [1, 0], sizes = [1, 256], strides = [1, 1]} : vector<3x256xf32> to vector<1x256xf32>
    %44 = vector.broadcast %42 : f32 to vector<1x256xf32>
    %45 = arith.mulf %44, %43 : vector<1x256xf32>
    %46 = arith.addf %40, %45 : vector<1x256xf32>
    %47 = arith.index_cast %arg0 : i32 to index
    %c8 = arith.constant 8 : index
    %48 = memref.load %arg2[%47, %c8] : memref<2x9xf32, #tpu.memory_space<smem>>
    %49 = vector.extract_strided_slice %1 {offsets = [2, 0], sizes = [1, 256], strides = [1, 1]} : vector<3x256xf32> to vector<1x256xf32>
    %50 = vector.broadcast %48 : f32 to vector<1x256xf32>
    %51 = arith.mulf %50, %49 : vector<1x256xf32>
    %52 = arith.addf %46, %51 : vector<1x256xf32>
    %53 = tpu.concatenate %18, %35, %52 in 0 : vector<1x256xf32>, vector<1x256xf32>, vector<1x256xf32> -> vector<3x256xf32>
    %c0_3 = arith.constant 0 : index
    %c0_4 = arith.constant 0 : index
    %c0_5 = arith.constant 0 : index
    %54 = vector.load %arg4[%c0_3, %c0_4, %c0_5] : memref<1x3x256xf32, #tpu.memory_space<vmem>>, vector<1x3x256xf32>
    %55 = vector.shape_cast %54 : vector<1x3x256xf32> to vector<3x256xf32>
    %56 = vector.shape_cast %53 : vector<3x256xf32> to vector<1x3x256xf32>
    tpu.vector_store %arg4[%c0_3, %c0_4, %c0_5], %56 {strides = array<i32>} : memref<1x3x256xf32, #tpu.memory_space<vmem>>, vector<1x3x256xf32>,
    return
  }
  func.func @transform_0(%arg0: i32, %arg1: i32) -> (i32, i32) {
    %c0_i32 = arith.constant 0 : i32
    %c0_i32_0 = arith.constant 0 : i32
    %c0_i32_1 = arith.constant 0 : i32
    return %c0_i32, %c0_i32_0 : i32, i32
  }
  func.func @transform_1(%arg0: i32, %arg1: i32) -> (i32, i32, i32) {
    %c0_i32 = arith.constant 0 : i32
    %c0_i32_0 = arith.constant 0 : i32
    return %arg0, %c0_i32, %arg1 : i32, i32, i32
  }
  func.func @transform_2(%arg0: i32, %arg1: i32) -> (i32, i32, i32) {
    %c0_i32 = arith.constant 0 : i32
    %c0_i32_0 = arith.constant 0 : i32
    return %arg0, %c0_i32, %arg1 : i32, i32, i32
  }
}

</mosaic_0001>

<bundles_post_ra>
// kernel: point_spatial_transformer.3
= control target key start
LH: loop header
LB: loop body
LE: loop exit
PB: predicated region body
PF: predicated region fallthrough
CT: control target
= control target key end

     0   :  { %7 = vsyncpa [#allocation3], 0  ;;  %s542_s9 = smov 0   ;;  %s544_s10 = smov 0   ;;  %s623_s0 = inlined_call_operand.vmem [shape: f32[2,9], index: 0, kind: input, shape index: {}]   ;;  %s624_s1 = inlined_call_operand.vmem [shape: f32[2,3,512], index: 1, kind: input, shape index: {}]   ;;  %s625_s2 = inlined_call_operand.vmem [shape: f32[2,3,512], index: 2, kind: output, shape index: {}]  }
   0x1   :  { %s546_s11 = smov 0   ;;  %s548_s12 = smov 0  }
   0x2   :  { %s550_s13 = smov 0  }
   0x3 LB: > { %s394_s14 = sadd.s32 4294967295, %s524_s13   ;;  %s22_s15 = sadd.s32 1, %s516_s11  ;;  %s524_s13 = sphi %s550_s13, %s13_s13   ;;  %s520_s12 = sphi %s548_s12, %s629_s12   ;;  %s516_s11 = sphi %s546_s11, %s628_s11   ;;  %s512_s10 = sphi %s544_s10, %s627_s10   ;;  %s508_s9 = sphi %s542_s9, %s626_s9  }
   0x4   : > { %p23_p0 = scmp.ge.s32.totalorder %s22_s15, 2  ;;  %s25_s16 = sadd.s32 1, %s520_s12 }
   0x5   : > { %p396_p1 = scmp.ge.s32.totalorder %s524_s13, 1  ;;  %p107_p2 = scmp.lt.s32.totalorder %s524_s13, 5 }
   0x6   : > { %s631_s15 = smov (%p23_p0, %s22_s15), 0  ;;  %s633_s16 = smov (!%p23_p0, %s25_s16), %s520_s12 }
   0x7   : > { %p108_p3 = pnand %p396_p1, %p107_p2  ;;  %p27_p4 = scmp.ge.s32.totalorder %s633_s16, 2 }
   0x8   : > { %p424_p5 = scmp.eq.s32.totalorder %s394_s14, 0  ;;  %s119_s19 = sshll.u32 %s623_s0, 4  ;;  %s120_s19 = int_to_ptr.vmem [resolvable:$true] %s119_s19 }
   0x9   : > { %p420_p6 = pneg %p108_p3  ;;  %s635_s16 = smov (%p27_p4, %s633_s16), 0 }
   0xa   : > { %s526_s20 = smov [#allocation2]   ;;  %145 = sbr.rel (%p108_p3) target bundleno = 52 (0x34), region = 28 }
   0xb   : > { %p421_p7 = pnand %p424_p5, %p420_p6 }
   0xd   : > { %423 = dma.vmem_to_smem (!%p421_p7), %s120_s19, 32, %s526_s20, [#allocation3]  }
   0xf   : > { %503 = dma.done.wait (%p424_p5), [#allocation3], 32  }
  0x10   : > { %505 = vsyncadd (%p424_p5), [#allocation3], 4294967264 }
  0x11   : > { %152 = sfence }
  0x12   : > { %s401_s21 = sshll.u32 %s508_s9, 1  ;;  %p178_p8 = scmp.lt.s32.totalorder %s512_s10, 1  ;;  %vm279_vm0 = vcmask 1040384   ;;  %vm282_vm1 = vcmask 1041408   ;;  %vm288_vm2 = vcmask 1043456  }
  0x13   : > { %p180_p9 = scmp.lt.s32.totalorder %s401_s21, 3  ;;  %s583_s22 = sshll.u32 %s512_s10, 7 }
  0x14   : > { %s637_s10 = smov (!%p178_p8, %s512_s10), 1  ;;  %s199_s24 = sld [smem:[#allocation2 + %s583_s22]] }
  0x15   : > { %s639_s21 = smov (!%p180_p9, %s401_s21), 3  ;;  %s402_s23 = sshll.u32 %s637_s10, 2 }
  0x16   : > { %s587_s25 = sadd.s32 %s402_s23, %s639_s21  ;;  %s202_s26 = sadd.s32 3, %s583_s22 }
  0x17   : > { %s403_s27 = sshll.u32 %s587_s25, 2  ;;  %s203_s28 = sld [smem:[#allocation2 + %s202_s26]] }
  0x18   : > { %s185_s3 = scalar_lea.vmem %s624_s1, %s403_s27  ;;  %s211_s4 = sadd.s32 6, %s583_s22 }
  0x19   : > { %s220_s5 = sadd.s32 1, %s583_s22  ;;  %s212_s6 = sld [smem:[#allocation2 + %s211_s4]]  ;;  %v197_v0 = vld [vmem:[%s185_s3] sm:$0x77] }
  0x1a   : > { %s224_s7 = sadd.s32 4, %s583_s22  ;;  %v200_v1 = vstv %s199_s24  ;;  %s221_s8 = sld [smem:[#allocation2 + %s220_s5]] }
  0x1b   : > { %s233_s9 = sadd.s32 7, %s583_s22  ;;  %s225_s10 = sld [smem:[#allocation2 + %s224_s7]]  ;;  %v201_v3 = vmul.f32 %v200_v1, %v197_v0 }
  0x1c   : > { %s242_s14 = sadd.s32 2, %s583_s22  ;;  %s234_s17 = sld [smem:[#allocation2 + %s233_s9]] }
  0x1d   : > { %v204_v2 = vstv %s203_s28  ;;  %s246_s18 = sadd.s32 5, %s583_s22  ;;  %s243_s19 = sld [smem:[#allocation2 + %s242_s14]] }
  0x1e   : > { %v205_v4 = vmul.f32 %v204_v2, %v197_v0  ;;  %s255_s20 = sadd.s32 8, %s583_s22  ;;  %s247_s21 = sld [smem:[#allocation2 + %s246_s18]] }
  0x1f   : > { %v213_v6 = vstv %s212_s6  ;;  %s256_s23 = sld [smem:[#allocation2 + %s255_s20]]  ;;  %s195_s26 = scalar_lea.vmem %s625_s2, %s403_s27 }
  0x20   : > { %v408_v5 = vrot.slane %v205_v4, 9  ;;  %v214_v7 = vmul.f32 %v213_v6, %v197_v0  ;;  %v222_v8 = vstv %s221_s8 }
  0x21   : > { %v226_v10 = vstv %s225_s10  ;;  %v223_v12 = vmul.f32 %v222_v8, %v197_v0 }
  0x22   : > { %v210_v9 = vadd.f32 %v408_v5, %v201_v3  ;;  %v409_v11 = vrot.slane %v214_v7, 10  ;;  %v227_v13 = vmul.f32 %v226_v10, %v197_v0  ;;  %v235_v14 = vstv %s234_s17 }
  0x23   : > { %v236_v15 = vmul.f32 %v235_v14, %v197_v0  ;;  %v244_v16 = vstv %s243_s19 }
  0x24   : > { %v219_v17 = vadd.f32 %v409_v11, %v210_v9  ;;  %v410_v18 = vrot.slane %v227_v13, 9  ;;  %v248_v19 = vstv %s247_s21  ;;  %v245_v21 = vmul.f32 %v244_v16, %v197_v0 }
  0x25   : > { %v411_v20 = vrot.slane %v236_v15, 10  ;;  %v249_v22 = vmul.f32 %v248_v19, %v197_v0  ;;  %v257_v23 = vstv %s256_s23 }
  0x26   : > { %v232_v24 = vadd.f32 %v410_v18, %v223_v12  ;;  %v258_v25 = vmul.f32 %v257_v23, %v197_v0  ;;  %v265_v29 = vperm.slane %v219_v17, 0  ;;  %v266_v30 = vperm.slane %v219_v17, 4 }
  0x27   : > { %v412_v26 = vrot.slane %v249_v22, 9 }
  0x28   : > { %v241_v27 = vadd.f32 %v411_v20, %v232_v24  ;;  %v413_v28 = vrot.slane %v258_v25, 10 }
  0x29   : > { %v254_v31 = vadd.f32 %v412_v26, %v245_v21 }
  0x2a   : > { %v270_v32 = vperm.slane %v241_v27, 0  ;;  %v271_v33 = vperm.slane %v241_v27, 4 }
  0x2b   : > { %v263_v34 = vadd.f32 %v413_v28, %v254_v31 }
  0x2c   : > { %v280_v35 = vsel %vm279_vm0, %v265_v29, %v270_v32  ;;  %v281_v36 = vsel %vm279_vm0, %v266_v30, %v271_v33 }
  0x2d   : > { %v275_v37 = vperm.slane %v263_v34, 0  ;;  %v276_v38 = vperm.slane %v263_v34, 4 }
  0x2f   : > { %v283_v39 = vsel %vm282_vm1, %v280_v35, %v275_v37  ;;  %v284_v40 = vsel %vm282_vm1, %v281_v36, %v276_v38 }
  0x30   : > { %v287_v41 = vrot.slane %v284_v40, 4 }
  0x32   : > { %v289_v42 = vsel %vm288_vm2, %v283_v39, %v287_v41 }
  0x33   : > { %291 = vst [vmem:[%s195_s26] sm:$0x77] %v289_v42 }
  0x34 PF: > { %s13_s13 = sadd.s32 1, %s524_s13   ;;  %s626_s9 = smov %s516_s11 }
  0x35   : > { %p10_p10 = scmp.ge.s32.totalorder %s13_s13, 6   ;;  %s627_s10 = smov %s520_s12 }
  0x36   : > { %s628_s11 = smov %s631_s15  ;;  %s629_s12 = smov %s635_s16 }
  0x37   :  { %12 = sbr.rel (!%p10_p10) target bundleno = 3 (0x3), region = 63 }
  0x3c   :  { %322 = vsyncpa [#allocation3], 1 }
  0x3d   :  { %324 = vsyncpa [#allocation3 + $0x1], 1 }

// kernel: point_spatial_transformer.2
= control target key start
LH: loop header
LB: loop body
LE: loop exit
PB: predicated region body
PF: predicated region fallthrough
CT: control target
= control target key end

     0   :  { %s10284_s0 = inlined_call_operand.vmem [shape: f32[2,512,3], index: 0, kind: input, shape index: {}]   ;;  %s10285_s1 = inlined_call_operand.vmem [shape: f32[3,64], index: 1, kind: input, shape index: {}]   ;;  %s10286_s2 = inlined_call_operand.vmem [shape: f32[1,64], index: 2, kind: input, shape index: {}]   ;;  %s10287_s3 = inlined_call_operand.vmem [shape: bf16[64,128], index: 3, kind: input, shape index: {}]   ;;  %s10288_s4 = inlined_call_operand.vmem [shape: f32[1,128], index: 4, kind: input, shape index: {}]   ;;  %s10289_s5 = inlined_call_operand.vmem [shape: bf16[128,1024], index: 5, kind: input, shape index: {}]   ;;  %s10290_s6 = inlined_call_operand.vmem [shape: f32[1,1024], index: 6, kind: input, shape index: {}]   ;;  %s10291_s7 = inlined_call_operand.hbm [shape: bf16[1024,512], index: 7, kind: input, shape index: {}]   ;;  %s10292_s8 = inlined_call_operand.vmem [shape: f32[1,512], index: 8, kind: input, shape index: {}]   ;;  %s10293_s9 = inlined_call_operand.vmem [shape: bf16[512,256], index: 9, kind: input, shape index: {}]   ;;  %s10294_s10 = inlined_call_operand.vmem [shape: f32[1,256], index: 10, kind: input, shape index: {}]   ;;  %s10295_s11 = inlined_call_operand.vmem [shape: bf16[256,9], index: 11, kind: input, shape index: {}]   ;;  %s10296_s12 = inlined_call_operand.vmem [shape: f32[1,9], index: 12, kind: input, shape index: {}]   ;;  %s10297_s13 = inlined_call_operand.vmem [shape: f32[2,1,9], index: 13, kind: output, shape index: {}]  }
   0x1   :  { %10298 = sst [smem:[#allocation6_spill]] %s10284_s0 }
   0x2   :  { %18 = vsyncpa [#allocation4], 0  ;;  %s8197_s25 = smov 0   ;;  %s8199_s26 = smov 0  }
   0x3   :  { %s8201_s27 = smov 0   ;;  %s8203_s28 = smov 0  }
   0x4   :  { %s8205_s29 = smov 0  }
   0x5 LB: > { %s5837_s30 = sadd.s32 4294967295, %s8118_s29   ;;  %s33_s14 = sadd.s32 1, %s8110_s27  ;;  %s8118_s29 = sphi %s8205_s29, %s24_s29   ;;  %s8114_s28 = sphi %s8203_s28, %s10306_s28   ;;  %s8110_s27 = sphi %s8201_s27, %s10305_s27   ;;  %s8106_s26 = sphi %s8199_s26, %s10304_s26   ;;  %s8102_s25 = sphi %s8197_s25, %s10303_s25  }
   0x6   : > { %p34_p0 = scmp.ge.s32.totalorder %s33_s14, 2  ;;  %s36_s15 = sadd.s32 1, %s8114_s28 }
   0x7   : > { %p5839_p1 = scmp.ge.s32.totalorder %s8118_s29, 1  ;;  %p347_p2 = scmp.lt.s32.totalorder %s8118_s29, 5 }
   0x8   : > { %s10308_s14 = smov (%p34_p0, %s33_s14), 0  ;;  %s10310_s15 = smov (!%p34_p0, %s36_s15), %s8114_s28 }
   0x9   : > { %p8230_p3 = pnand %p5839_p1, %p347_p2  ;;  %p38_p4 = scmp.ge.s32.totalorder %s10310_s15, 2 }
   0xa   : > { %p8234_p5 = scmp.eq.s32.totalorder %s5837_s30, 0  ;;  %s376_s20 = sshll.u32 %s10291_s7, 4  ;;  %s377_s20 = int_to_ptr.hbm [resolvable:$true] %s376_s20 }
   0xb   : > { %p7911_p6 = pneg %p8230_p3  ;;  %s10312_s15 = smov (%p38_p4, %s10310_s15), 0 }
   0xc   : > { %s8120_s21 = smov [#allocation3]   ;;  %s8121_s23 = smov 256  }
   0xd   : > { %s378_s22 = sshll.u32 %s8120_s21, 4  ;;  %p7912_p7 = pnand %p8234_p5, %p7911_p6  ;;  %s379_s22 = int_to_ptr.vmem [resolvable:$true] %s378_s22 }
   0xe   : > { %s8122_s24 = smov 16   ;;  %422 = sbr.rel (%p8230_p3) target bundleno = 1831 (0x727), region = 72 }
   0xf   : > { %7914 = dma.hbm_to_vmem [thread:$0]  (!%p7912_p7), %s377_s20, 32768, %s379_s22, [#allocation4], %s8121_s23, %s8121_s23, %s8122_s24  }
  0x13   : > { %8097 = dma.done.wait (%p8234_p5), [#allocation4], 32768  }
  0x14   : > { %8099 = vsyncadd (%p8234_p5), [#allocation4], 4294934528  ;;  %s5844_s30 = sshll.u32 %s8102_s25, 5  ;;  %p470_p8 = scmp.lt.s32.totalorder %s8106_s26, 1 }
  0x15   : > { %p472_p9 = scmp.lt.s32.totalorder %s5844_s30, 63  ;;  %s10301_s0 = sld [smem:[#allocation6_spill]] }
  0x16   : > { %s10314_s26 = smov (!%p470_p8, %s8106_s26), 1  ;;  %p5847_p10 = scmp.ne.s32.totalorder %s8102_s25, 0 }
  0x17   : > { %s10316_s30 = smov (!%p472_p9, %s5844_s30), 63  ;;  %s5845_s18 = sshll.u32 %s10314_s26, 6 }
  0x18   : > { %s475_s21 = sadd.s32 %s5845_s18, %s10316_s30  ;;  %486 = sbr.rel (%p5847_p10) target bundleno = 31 (0x1f), region = 80 }
  0x19   : > { %s5846_s22 = sshll.u32 %s475_s21, 3 }
  0x1b   : > { %s8266_s24 = scalar_lea.vmem %s10301_s0, %s5846_s22 }
  0x1d   : > { %v8123_v0 = vmov -inf  }
  0x1e   : > { %487 = vst [vmem:[#allocation2] sm:$0xff] %v8123_v0 }
  0x1f PF: > { %v488_v1 = vld [vmem:[%s8266_s24] sm:$0xff]  ;;  %v8124_v2 = vmov 2   ;;  %v8125_v3 = vmov 1   ;;  %v8126_v4 = vmov 0   ;;  %v489_v5 = vld [vmem:[%s8266_s24 + $0x8] sm:$0xff]  ;;  %v490_v6 = vld [vmem:[%s8266_s24 + $0x10] sm:$0xff] }
  0x20   : > { %7966 = vset.pattern.permute.xlu2 %v8124_v2  ;;  %7965 = vset.pattern.permute.xlu1 %v8125_v3  ;;  %v491_v7 = vld [vmem:[%s8266_s24 + $0x18] sm:$0xff]  ;;  %v497_v8 = vld [vmem:[%s8266_s24 + $0x48] sm:$0xff]  ;;  %v8282_v9 = vld [vmem:[%s8266_s24 + $0x50] sm:$0xff]  ;;  %vm1222_vm0 = vcmask 523264   ;;  %vm3092_vm1 = vcmask 1042434   ;;  %vm3090_vm2 = vcmask 1040384  }
  0x21   : > { %7964 = vset.pattern.permute.xlu0 %v8126_v4  ;;  %910 = vperm.xlu2 %7966, %v488_v1   ;;  %v493_v10 = vld [vmem:[%s8266_s24 + $0x28] sm:$0xff]  ;;  %v492_v11 = vld [vmem:[%s8266_s24 + $0x20] sm:$0xff]  ;;  %v495_v12 = vld [vmem:[%s8266_s24 + $0x38] sm:$0xff]  ;;  %vm3094_vm3 = vcmask 1041408   ;;  %vm3096_vm4 = vcmask 1044484   ;;  %vm3098_vm5 = vcmask 1046534  }
  0x22   : > { %716 = vperm.xlu1 %7965, %v488_v1   ;;  %523 = vperm.xlu0 %7964, %v488_v1   ;;  %v494_v13 = vld [vmem:[%s8266_s24 + $0x30] sm:$0xff]  ;;  %v499_v14 = vld [vmem:[%s8266_s24 + $0x58] sm:$0xff]  ;;  %v8300_v15 = vld [vmem:[%s8266_s24 + $0xc0] sm:$0xff]  ;;  %vm3100_vm6 = vcmask 1045508   ;;  %vm3102_vm7 = vcmask 1043456   ;;  %p6136_p11 = scmp.ne.s32.totalorder %s8102_s25, 1 }
  0x23   : > { %v496_v16 = vld [vmem:[%s8266_s24 + $0x40] sm:$0xff]  ;;  %v8307_v17 = vld [vmem:[%s8266_s24 + $0xd0] sm:$0xff]  ;;  %v7486_v19 = vld [vmem:[%s10287_s3 + $0x18] sm:$0xff]  ;;  %s10302_s25 = scalar_lea.vmem (!%p6136_p11), %s10297_s13, %s10314_s26 }
  0x24   : > { %v8311_v18 = vld [vmem:[%s8266_s24 + $0xe0] sm:$0xff]  ;;  %1275 = vmatpush.bf16.msra.mxu0 %v7486_v19  ;;  %v7485_v21 = vld [vmem:[%s10287_s3 + $0x10] sm:$0xff]  ;;  %7887 = vmatpush.bf16.msra.mxu1 %v7486_v19  ;;  %v7484_v22 = vld [vmem:[%s10287_s3 + $0x8] sm:$0xff] }
  0x25   : > { %7889 = vmatpush.bf16.msra.mxu3 %v7486_v19  ;;  %7888 = vmatpush.bf16.msra.mxu2 %v7486_v19  ;;  %v7483_v24 = vld [vmem:[%s10287_s3] sm:$0xff]  ;;  %v513_v25 = vld [vmem:[%s8266_s24 + $0xc8] sm:$0xff]  ;;  %v8372_v44 = vld [vmem:[%s8266_s24 + $0xd8] sm:$0xff] }
  0x26   : > { %v8343_v27 = vld [vmem:[%s10285_s1 + $0x1] ss:$0 sm:$0xff]  ;;  %v8348_v28 = vld [vmem:[%s10285_s1] ss:$0 sm:$0xff]  ;;  %v8354_v32 = vld [vmem:[%s10285_s1 + $0x2] ss:$0 sm:$0xff] }
  0x27   : > { %v500_v31 = vld [vmem:[%s8266_s24 + $0x60] sm:$0xff]  ;;  %v501_v53 = vld [vmem:[%s8266_s24 + $0x68] sm:$0xff]  ;;  %v8385_v56 = vld [vmem:[%s8266_s24 + $0x70] sm:$0xff] }
  0x28   : > { %1276 = vmatpush.bf16.msra.mxu0 %v7485_v21  ;;  %7890 = vmatpush.bf16.msra.mxu1 %v7485_v21  ;;  %v8369_v43 = vld [vmem:[%s10286_s2] ss:$0 sm:$0xff]  ;;  %v8396_v61 = vld [vmem:[%s8266_s24 + $0xe8] sm:$0xff] }
  0x29   : > { %914 = vperm.xlu2 %7966, %v489_v5   ;;  %7892 = vmatpush.bf16.msra.mxu3 %v7485_v21  ;;  %v508_v1 = vld [vmem:[%s8266_s24 + $0xa0] sm:$0xff] }
  0x2a   : > { %720 = vperm.xlu1 %7965, %v489_v5   ;;  %528 = vperm.xlu0 %7964, %v489_v5  }
  0x2b   : > { %7891 = vmatpush.bf16.msra.mxu2 %v7485_v21 }
  0x2c   : > { %1277 = vmatpush.bf16.msra.mxu0 %v7484_v22  ;;  %7893 = vmatpush.bf16.msra.mxu1 %v7484_v22 }
  0x2d   : > { %7895 = vmatpush.bf16.msra.mxu3 %v7484_v22 }
  0x2f   : > { %7894 = vmatpush.bf16.msra.mxu2 %v7484_v22  ;;  %v509_v22 = vld [vmem:[%s8266_s24 + $0xa8] sm:$0xff] }
  0x30   : > { %1278 = vmatpush.bf16.msra.mxu0 %v7483_v24  ;;  %7896 = vmatpush.bf16.msra.mxu1 %v7483_v24 }
  0x31   : > { %7968 = vset.pattern.permute.xlu2 %v8125_v3  ;;  %7898 = vmatpush.bf16.msra.mxu3 %v7483_v24 }
  0x32   : > { %7967 = vset.pattern.permute.xlu1 %v8126_v4  ;;  %533 = vperm.xlu0 %7964, %v490_v6  }
  0x33   : > { %724 = vperm.xlu2 %7968, %v490_v6   ;;  %538 = vperm.xlu1 %7967, %v491_v7  }
  0x34   : > { %7897 = vmatpush.bf16.msra.mxu2 %v7483_v24 }
  0x3a   : > { %568 = vperm.xlu0 %7964, %v497_v8  }
  0x3b   : > { %7970 = vset.pattern.permute.xlu2 %v8124_v2  ;;  %7969 = vset.pattern.permute.xlu1 %v8124_v2 }
  0x3c   : > { %922 = vperm.xlu2 %7970, %v491_v7   ;;  %918 = vperm.xlu1 %7969, %v490_v6  }
  0x42   : > { %573 = vperm.xlu0 %7964, %v8282_v9  }
  0x44   : > { %7972 = vset.pattern.permute.xlu2 %v8126_v4  ;;  %7971 = vset.pattern.permute.xlu1 %v8126_v4 }
  0x45   : > { %548 = vperm.xlu2 %7972, %v493_v10   ;;  %543 = vperm.xlu1 %7971, %v492_v11  }
  0x4a   : > { %7985 = vset.pattern.permute.xlu0 %v8125_v3 }
  0x4b   : > { %728 = vperm.xlu0 %7985, %v491_v7   ;;  %v8412_v7 = vld [vmem:[%s8266_s24 + $0x80] sm:$0xff] }
  0x4d   : > { %7974 = vset.pattern.permute.xlu2 %v8124_v2  ;;  %7973 = vset.pattern.permute.xlu1 %v8125_v3 }
  0x4e   : > { %926 = vperm.xlu2 %7974, %v492_v11   ;;  %736 = vperm.xlu1 %7973, %v493_v10  }
  0x53   : > { %732 = vperm.xlu0 %7985, %v492_v11  }
  0x56   : > { %7976 = vset.pattern.permute.xlu2 %v8126_v4  ;;  %7975 = vset.pattern.permute.xlu1 %v8126_v4 }
  0x57   : > { %558 = vperm.xlu2 %7976, %v495_v12   ;;  %553 = vperm.xlu1 %7975, %v494_v13  }
  0x5b   : > { %760 = vperm.xlu0 %7985, %v499_v14  }
  0x5f   : > { %7978 = vset.pattern.permute.xlu2 %v8125_v3  ;;  %7977 = vset.pattern.permute.xlu1 %v8125_v3 }
  0x60   : > { %744 = vperm.xlu2 %7978, %v495_v12   ;;  %740 = vperm.xlu1 %7977, %v494_v13  }
  0x63   : > { %812 = vperm.xlu0 %7985, %v8300_v15  }
  0x68   : > { %7980 = vset.pattern.permute.xlu2 %v8126_v4  ;;  %7979 = vset.pattern.permute.xlu1 %v8124_v2 }
  0x69   : > { %563 = vperm.xlu2 %7980, %v496_v16   ;;  %938 = vperm.xlu1 %7979, %v495_v12  }
  0x6b   : > { %820 = vperm.xlu0 %7985, %v8307_v17  }
  0x71   : > { %7982 = vset.pattern.permute.xlu2 %v8125_v3  ;;  %7981 = vset.pattern.permute.xlu1 %v8125_v3 }
  0x72   : > { %752 = vperm.xlu2 %7982, %v497_v8   ;;  %748 = vperm.xlu1 %7981, %v496_v16  }
  0x73   : > { %828 = vperm.xlu0 %7985, %v8311_v18  }
  0x7a   : > { %7984 = vset.pattern.permute.xlu2 %v8124_v2  ;;  %7983 = vset.pattern.permute.xlu1 %v8124_v2 }
  0x7b   : > { %946 = vperm.xlu2 %7984, %v497_v8   ;;  %942 = vperm.xlu1 %7983, %v496_v16   ;;  %v911_v20 = vpop.permute.xlu2 %910 }
  0x7c   : > { %8014 = vset.pattern.permute.xlu0 %v8124_v2  ;;  %v1038_v36 = vmul.f32 %v8354_v32, %v911_v20 }
  0x7d   : > { %930 = vperm.xlu0 %8014, %v493_v10  }
  0x83   : > { %7987 = vset.pattern.permute.xlu2 %v8125_v3  ;;  %7986 = vset.pattern.permute.xlu1 %v8126_v4  ;;  %v915_v23 = vpop.permute.xlu2 %914 }
  0x84   : > { %756 = vperm.xlu2 %7987, %v8282_v9   ;;  %578 = vperm.xlu1 %7986, %v499_v14   ;;  %v1039_v45 = vmul.f32 %v8354_v32, %v915_v23 }
  0x85   : > { %934 = vperm.xlu0 %8014, %v494_v13  }
  0x8c   : > { %7989 = vset.pattern.permute.xlu2 %v8124_v2  ;;  %7988 = vset.pattern.permute.xlu1 %v8124_v2 }
  0x8d   : > { %954 = vperm.xlu2 %7989, %v499_v14   ;;  %950 = vperm.xlu1 %7988, %v8282_v9   ;;  %v8338_v26 = vpop.permute.xlu2 %724 }
  0x8e   : > { %1010 = vperm.xlu0 %8014, %v513_v25   ;;  %v846_v5 = vmul.f32 %v8343_v27, %v8338_v26 }
  0x94   : > { %v717_v29 = vpop.permute.xlu1 %716  ;;  %v524_v30 = vpop.permute.xlu0 %523 }
  0x95   : > { %v844_v33 = vmul.f32 %v8343_v27, %v717_v29  ;;  %v682_v34 = vmul.f32 %v8348_v28, %v524_v30  ;;  %7991 = vset.pattern.permute.xlu2 %v8126_v4  ;;  %7990 = vset.pattern.permute.xlu1 %v8126_v4 }
  0x96   : > { %648 = vperm.xlu2 %7991, %v513_v25   ;;  %643 = vperm.xlu1 %7990, %v8300_v15   ;;  %v8361_v35 = vpop.permute.xlu2 %922 }
  0x97   : > { %958 = vperm.xlu0 %8014, %v500_v31   ;;  %v876_v37 = vadd.f32 %v844_v33, %v682_v34 }
  0x99   : > { %v1070_v40 = vadd.f32 %v1038_v36, %v876_v37 }
  0x9b   : > { %v1106_v49 = vadd.f32 %v8369_v43, %v1070_v40 }
  0x9c   : > { %v721_v38 = vpop.permute.xlu1 %720  ;;  %v529_v39 = vpop.permute.xlu0 %528 }
  0x9d   : > { %v845_v41 = vmul.f32 %v8343_v27, %v721_v38  ;;  %v683_v42 = vmul.f32 %v8348_v28, %v529_v39  ;;  %v1138_v54 = vmax.f32 %v1106_v49, 0.0 }
  0x9e   : > { %7993 = vset.pattern.permute.xlu2 %v8124_v2  ;;  %7992 = vset.pattern.permute.xlu1 %v8125_v3 }
  0x9f   : > { %v877_v46 = vadd.f32 %v845_v41, %v683_v42  ;;  %1006 = vperm.xlu2 %7993, %v8300_v15   ;;  %816 = vperm.xlu1 %7992, %v513_v25   ;;  %v8378_v47 = vpop.permute.xlu2 %548  ;;  %v1041_v15 = vmul.f32 %v8354_v32, %v8361_v35  ;;  %v503_v41 = vld [vmem:[%s8266_s24 + $0x78] sm:$0xff] }
  0xa0   : > { %1018 = vperm.xlu0 %8014, %v8372_v44  }
  0xa1   : > { %v1071_v48 = vadd.f32 %v1039_v45, %v877_v46  ;;  %v8460_v46 = vld [vmem:[%s8266_s24 + $0xb8] sm:$0xff] }
  0xa3   : > { %v1107_v50 = vadd.f32 %v8369_v43, %v1071_v48 }
  0xa4   : > { %v534_v51 = vpop.permute.xlu0 %533 }
  0xa5   : > { %v539_v52 = vpop.permute.xlu1 %538  ;;  %v1139_v55 = vmax.f32 %v1107_v50, 0.0  ;;  %v684_v6 = vmul.f32 %v8348_v28, %v534_v51 }
  0xa6   : > { %v685_v12 = vmul.f32 %v8348_v28, %v539_v52 }
  0xa7   : > { %7995 = vset.pattern.permute.xlu2 %v8126_v4  ;;  %7994 = vset.pattern.permute.xlu1 %v8126_v4  ;;  %v1170_v57 = vpack.c.bf16 %v1139_v55, %v1138_v54  ;;  %v878_v10 = vadd.f32 %v846_v5, %v684_v6  ;;  %v8481_v6 = vld [vmem:[%s8266_s24 + $0xb0] sm:$0xff] }
  0xa8   : > { %588 = vperm.xlu2 %7995, %v501_v53   ;;  %583 = vperm.xlu1 %7994, %v500_v31   ;;  %v8389_v58 = vpop.permute.xlu2 %926 }
  0xa9   : > { %5864 = vmatmul.msk.bf16.vlgmr.msra.gmra.mxu0 %vm1222_vm0, %v1170_v57  ;;  %966 = vperm.xlu0 %8014, %v8385_v56   ;;  %v1042_v50 = vmul.f32 %v8354_v32, %v8389_v58 }
  0xac   : > { %v8393_v59 = vpop.permute.xlu0 %568 }
  0xae   : > { %v919_v60 = vpop.permute.xlu1 %918 }
  0xaf   : > { %v1040_v8 = vmul.f32 %v8354_v32, %v919_v60 }
  0xb0   : > { %7997 = vset.pattern.permute.xlu2 %v8125_v3  ;;  %7996 = vset.pattern.permute.xlu1 %v8125_v3 }
  0xb1   : > { %768 = vperm.xlu2 %7997, %v501_v53   ;;  %764 = vperm.xlu1 %7996, %v500_v31   ;;  %v8400_v62 = vpop.permute.xlu2 %558  ;;  %v1072_v13 = vadd.f32 %v1040_v8, %v878_v10 }
  0xb2   : > { %1026 = vperm.xlu0 %8014, %v8396_v61  }
  0xb3   : > { %v1108_v20 = vadd.f32 %v8369_v43, %v1072_v13 }
  0xb4   : > { %v8403_v63 = vpop.permute.xlu0 %573 }
  0xb5   : > { %v1140_v26 = vmax.f32 %v1108_v20, 0.0 }
  0xb7   : > { %v8405_v0 = vpop.permute.xlu1 %543 }
  0xb8   : > { %v686_v48 = vmul.f32 %v8348_v28, %v8405_v0 }
  0xb9   : > { %7999 = vset.pattern.permute.xlu2 %v8126_v4  ;;  %7998 = vset.pattern.permute.xlu1 %v8124_v2 }
  0xba   : > { %623 = vperm.xlu2 %7999, %v508_v1   ;;  %962 = vperm.xlu1 %7998, %v501_v53   ;;  %v8417_v9 = vpop.permute.xlu2 %744  ;;  %v687_v53 = vmul.f32 %v8348_v28, %v8378_v47  ;;  %v7544_v47 = vld [vmem:[%s10289_s5 + $0x1cc] sm:$0xf] }
  0xbb   : > { %974 = vperm.xlu0 %8014, %v8412_v7  }
  0xbd   : > { %v729_v11 = vpop.permute.xlu0 %728 }
  0xbe   : > { %v847_v14 = vmul.f32 %v8343_v27, %v729_v11 }
  0xc0   : > { %v879_v16 = vadd.f32 %v847_v14, %v685_v12  ;;  %v737_v19 = vpop.permute.xlu1 %736 }
  0xc1   : > { %v849_v51 = vmul.f32 %v8343_v27, %v737_v19 }
  0xc2   : > { %v1073_v21 = vadd.f32 %v1041_v15, %v879_v16  ;;  %658 = vperm.xlu2 %7999, %v8372_v44   ;;  %8000 = vset.pattern.permute.xlu1 %v8126_v4  ;;  %v689_v15 = vmul.f32 %v8348_v28, %v8400_v62  ;;  %v851_v16 = vmul.f32 %v8343_v27, %v8417_v9  ;;  %v7536_v62 = vld [vmem:[%s10289_s5 + $0x18c] sm:$0xf] }
  0xc3   : > { %653 = vperm.xlu1 %8000, %v8307_v17   ;;  %8021 = vset.pattern.permute.xlu0 %v8126_v4  ;;  %v8430_v23 = vpop.permute.xlu2 %563  ;;  %v881_v57 = vadd.f32 %v849_v51, %v687_v53  ;;  %v6084_v9 = vld [vmem:[%s10289_s5 + $0x1a8] sm:$0xf0] }
  0xc4   : > { %v1109_v24 = vadd.f32 %v8369_v43, %v1073_v21  ;;  %628 = vperm.xlu0 %8021, %v509_v22  }
  0xc5   : > { %v733_v25 = vpop.permute.xlu0 %732 }
  0xc6   : > { %v1141_v29 = vmax.f32 %v1109_v24, 0.0  ;;  %v848_v45 = vmul.f32 %v8343_v27, %v733_v25 }
  0xc8   : > { %v1171_v30 = vpack.c.bf16 %v1141_v29, %v1140_v26  ;;  %v880_v49 = vadd.f32 %v848_v45, %v686_v48  ;;  %v6087_v26 = vor.u32 %v7536_v62, %v6084_v9 }
  0xc9   : > { %v8433_v31 = vpop.permute.xlu1 %553 }
  0xca   : > { %8002 = vset.pattern.permute.xlu2 %v8125_v3  ;;  %5865 = vmatmul.msk.bf16.gmra.mxu0 %vm1222_vm0, %v1171_v30  ;;  %v1074_v54 = vadd.f32 %v1042_v50, %v880_v49  ;;  %v688_v21 = vmul.f32 %v8348_v28, %v8433_v31  ;;  %v7528_v49 = vld [vmem:[%s10289_s5 + $0x14c] sm:$0xf] }
  0xcb   : > { %800 = vperm.xlu2 %8002, %v509_v22   ;;  %8001 = vset.pattern.permute.xlu1 %v8125_v3 }
  0xcc   : > { %796 = vperm.xlu1 %8001, %v508_v1   ;;  %v8438_v33 = vpop.permute.xlu2 %752  ;;  %638 = vperm.xlu0 %8021, %v8460_v46  }
  0xcd   : > { %v761_v34 = vpop.permute.xlu0 %760 }
  0xce   : > { %v855_v10 = vmul.f32 %v8343_v27, %v761_v34 }
  0xd2   : > { %v741_v35 = vpop.permute.xlu1 %740 }
  0xd3   : > { %8003 = vset.pattern.permute.xlu2 %v8124_v2  ;;  %v850_v11 = vmul.f32 %v8343_v27, %v741_v35  ;;  %v692_v35 = vmul.f32 %v8348_v28, %v8403_v63 }
  0xd4   : > { %990 = vperm.xlu2 %8003, %v508_v1   ;;  %824 = vperm.xlu1 %8001, %v8372_v44   ;;  %v1110_v1 = vadd.f32 %v8369_v43, %v1074_v54 }
  0xd5   : > { %v8442_v36 = vpop.permute.xlu0 %812  ;;  %v8444_v37 = vpop.permute.xlu2 %946  ;;  %v882_v29 = vadd.f32 %v850_v11, %v688_v21  ;;  %v5988_v11 = vld [vmem:[%s10289_s5 + $0xe8] sm:$0xf0]  ;;  %v690_v21 = vmul.f32 %v8348_v28, %v8430_v23 }
  0xd6   : > { %v1142_v14 = vmax.f32 %v1110_v1, 0.0  ;;  %v5956_v23 = vld [vmem:[%s10289_s5 + $0xa8] sm:$0xf0]  ;;  %v1047_v9 = vmul.f32 %v8354_v32, %v8444_v37  ;;  %v8574_v37 = vld [vmem:[%s8266_s24 + $0xf8] sm:$0xff] }
  0xd7   : > { %678 = vperm.xlu0 %8021, %v8574_v37  }
  0xdb   : > { %v939_v38 = vpop.permute.xlu1 %938 }
  0xdc   : > { %1014 = vperm.xlu2 %8003, %v8307_v17   ;;  %8004 = vset.pattern.permute.xlu1 %v8124_v2  ;;  %v1045_v30 = vmul.f32 %v8354_v32, %v939_v38  ;;  %v6052_v38 = vld [vmem:[%s10289_s5 + $0x168] sm:$0xf0] }
  0xdd   : > { %994 = vperm.xlu1 %8004, %v509_v22   ;;  %v8448_v39 = vpop.permute.xlu0 %820 }
  0xde   : > { %v757_v40 = vpop.permute.xlu2 %756 }
  0xdf   : > { %v854_v45 = vmul.f32 %v8343_v27, %v757_v40 }
  0xe1   : > { %v886_v63 = vadd.f32 %v854_v45, %v692_v35  ;;  %v7496_v35 = vld [vmem:[%s10289_s5 + $0x4c] sm:$0xf] }
  0xe4   : > { %8006 = vset.pattern.permute.xlu2 %v8126_v4  ;;  %v8452_v42 = vpop.permute.xlu1 %748 }
  0xe5   : > { %598 = vperm.xlu2 %8006, %v503_v41   ;;  %8005 = vset.pattern.permute.xlu1 %v8126_v4  ;;  %v8455_v44 = vpop.permute.xlu0 %828 }
  0xe6   : > { %593 = vperm.xlu1 %8005, %v8385_v56  }
  0xe7   : > { %v955_v17 = vpop.permute.xlu2 %954 }
  0xe8   : > { %v1049_v31 = vmul.f32 %v8354_v32, %v955_v17  ;;  %v6055_v17 = vor.u32 %v7528_v49, %v6052_v38 }
  0xed   : > { %8008 = vset.pattern.permute.xlu2 %v8125_v3  ;;  %v8469_v52 = vpop.permute.xlu1 %942 }
  0xee   : > { %776 = vperm.xlu2 %8008, %v503_v41   ;;  %8007 = vset.pattern.permute.xlu1 %v8125_v3 }
  0xef   : > { %v931_v55 = vpop.permute.xlu0 %930  ;;  %772 = vperm.xlu1 %8007, %v8385_v56   ;;  %v6116_v56 = vld [vmem:[%s10289_s5 + $0x1e8] sm:$0xf0] }
  0xf0   : > { %v1043_v58 = vmul.f32 %v8354_v32, %v931_v55  ;;  %v8476_v60 = vpop.permute.xlu2 %648  ;;  %v6119_v8 = vor.u32 %v7544_v47, %v6116_v56  ;;  %v7520_v55 = vld [vmem:[%s10289_s5 + $0x10c] sm:$0xf] }
  0xf2   : > { %v1075_v0 = vadd.f32 %v1043_v58, %v881_v57  ;;  %2077 = vmatpush.bf16.msrb.mxu0 %v6119_v8  ;;  %v6020_v57 = vld [vmem:[%s10289_s5 + $0x128] sm:$0xf0] }
  0xf3   : > { %v6023_v58 = vor.u32 %v7520_v55, %v6020_v57 }
  0xf4   : > { %v1111_v5 = vadd.f32 %v8369_v43, %v1075_v0 }
  0xf6   : > { %v1143_v12 = vmax.f32 %v1111_v5, 0.0  ;;  %8010 = vset.pattern.permute.xlu2 %v8126_v4  ;;  %v579_v13 = vpop.permute.xlu1 %578  ;;  %2078 = vmatpush.bf16.msrb.mxu0 %v6087_v26  ;;  %v868_v26 = vmul.f32 %v8343_v27, %v8442_v36  ;;  %v5924_v36 = vld [vmem:[%s10289_s5 + $0x68] sm:$0xf0] }
  0xf7   : > { %v693_v19 = vmul.f32 %v8348_v28, %v579_v13  ;;  %v935_v20 = vpop.permute.xlu0 %934  ;;  %633 = vperm.xlu2 %8010, %v8481_v6   ;;  %8009 = vset.pattern.permute.xlu1 %v8124_v2  ;;  %v853_v13 = vmul.f32 %v8343_v27, %v8438_v33 }
  0xf8   : > { %v1044_v22 = vmul.f32 %v8354_v32, %v935_v20  ;;  %970 = vperm.xlu1 %8009, %v503_v41   ;;  %v1172_v24 = vpack.c.bf16 %v1143_v12, %v1142_v14  ;;  %v883_v41 = vadd.f32 %v851_v16, %v689_v15  ;;  %v691_v12 = vmul.f32 %v8348_v28, %v8393_v59 }
  0xf9   : > { %v8508_v25 = vpop.permute.xlu2 %1006  ;;  %v887_v34 = vadd.f32 %v855_v10, %v693_v19  ;;  %v7512_v10 = vld [vmem:[%s10289_s5 + $0xcc] sm:$0xf]  ;;  %v852_v16 = vmul.f32 %v8343_v27, %v8452_v42 }
  0xfa   : > { %5866 = vmatmul.msk.bf16.gmra.mxu0 %vm1222_vm0, %v1172_v24  ;;  %v1076_v48 = vadd.f32 %v1044_v22, %v882_v29  ;;  %v1077_v50 = vadd.f32 %v1045_v30, %v883_v41  ;;  %v5991_v14 = vor.u32 %v7512_v10, %v5988_v11  ;;  %v1046_v22 = vmul.f32 %v8354_v32, %v8469_v52  ;;  %v7504_v42 = vld [vmem:[%s10289_s5 + $0x8c] sm:$0xf] }
  0xfb   : > { %v1081_v51 = vadd.f32 %v1049_v31, %v887_v34  ;;  %2079 = vmatpush.bf16.msrb.mxu0 %v6055_v17  ;;  %v885_v62 = vadd.f32 %v853_v13, %v691_v12  ;;  %v5959_v52 = vor.u32 %v7504_v42, %v5956_v23  ;;  %v884_v29 = vadd.f32 %v852_v16, %v690_v21  ;;  %v505_v16 = vld [vmem:[%s8266_s24 + $0x88] sm:$0xff]  ;;  %v8634_v23 = vld [vmem:[%s10288_s4] ss:$0 sm:$0xff] }
  0xfc   : > { %v1112_v54 = vadd.f32 %v8369_v43, %v1076_v48  ;;  %v1113_v0 = vadd.f32 %v8369_v43, %v1077_v50  ;;  %v5927_v48 = vor.u32 %v7496_v35, %v5924_v36  ;;  %v1062_v49 = vmul.f32 %v8354_v32, %v8508_v25  ;;  %v7488_v50 = vld [vmem:[%s10289_s5 + $0xc] sm:$0xf] }
  0xfd   : > { %v1117_v47 = vadd.f32 %v8369_v43, %v1081_v51  ;;  %v1078_v34 = vadd.f32 %v1046_v22, %v884_v29  ;;  %v1079_v41 = vadd.f32 %v1047_v9, %v885_v62  ;;  %v5892_v51 = vld [vmem:[%s10289_s5 + $0x28] sm:$0xf0] }
  0xfe   : > { %v1144_v56 = vmax.f32 %v1112_v54, 0.0  ;;  %v1145_v15 = vmax.f32 %v1113_v0, 0.0  ;;  %v707_v54 = vmul.f32 %v8348_v28, %v8476_v60 }
  0xff   : > { %668 = vperm.xlu2 %8010, %v8396_v61   ;;  %v951_v53 = vpop.permute.xlu1 %950  ;;  %2080 = vmatpush.bf16.msrb.mxu0 %v6023_v58  ;;  %v1149_v20 = vmax.f32 %v1117_v47, 0.0  ;;  %v1114_v17 = vadd.f32 %v8369_v43, %v1078_v34  ;;  %v8603_v47 = vld [vmem:[%s8266_s24 + $0x90] sm:$0xff] }
 0x100   : > { %v1048_v40 = vmul.f32 %v8354_v32, %v951_v53  ;;  %8011 = vset.pattern.permute.xlu1 %v8126_v4  ;;  %v1173_v24 = vpack.c.bf16 %v1145_v15, %v1144_v56  ;;  %v1011_v45 = vpop.permute.xlu0 %1010  ;;  %v1115_v53 = vadd.f32 %v8369_v43, %v1079_v41  ;;  %613 = vperm.xlu0 %8021, %v8603_v47  }
 0x101   : > { %663 = vperm.xlu1 %8011, %v8311_v18   ;;  %v1063_v55 = vmul.f32 %v8354_v32, %v1011_v45  ;;  %v1146_v58 = vmax.f32 %v1114_v17, 0.0 }
 0x102   : > { %v1080_v1 = vadd.f32 %v1048_v40, %v886_v63  ;;  %v8534_v5 = vpop.permute.xlu2 %588  ;;  %v5895_v63 = vor.u32 %v7488_v50, %v5892_v51 }
 0x103   : > { %2081 = vmatpush.bf16.msrb.mxu0 %v5991_v14 }
 0x104   : > { %v1116_v8 = vadd.f32 %v8369_v43, %v1080_v1 }
 0x106   : > { %v1148_v19 = vmax.f32 %v1116_v8, 0.0 }
 0x107   : > { %8013 = vset.pattern.permute.xlu2 %v8125_v3  ;;  %2082 = vmatpush.bf16.msrb.mxu0 %v5959_v52 }
 0x108   : > { %808 = vperm.xlu2 %8013, %v8460_v46   ;;  %v644_v59 = vpop.permute.xlu1 %643  ;;  %v1175_v33 = vpack.c.bf16 %v1149_v20, %v1148_v19  ;;  %8030 = vset.pattern.permute.xlu0 %v8125_v3 }
 0x109   : > { %8012 = vset.pattern.permute.xlu1 %v8125_v3  ;;  %v706_v30 = vmul.f32 %v8348_v28, %v644_v59  ;;  %v959_v8 = vpop.permute.xlu0 %958 }
 0x10a   : > { %5867 = vmatmul.msk.bf16.gmra.mxu0 %vm1222_vm0, %v1173_v24  ;;  %804 = vperm.xlu1 %8012, %v8481_v6   ;;  %v1050_v59 = vmul.f32 %v8354_v32, %v959_v8 }
 0x10b   : > { %5869 = vmatmul.msk.bf16.vlgmr.msra.gmra.mxu1 %vm1222_vm0, %v1175_v33  ;;  %v8571_v31 = vpop.permute.xlu2 %768  ;;  %v900_v38 = vadd.f32 %v868_v26, %v706_v30  ;;  %2083 = vmatpush.bf16.msrb.mxu0 %v5927_v48  ;;  %v695_v33 = vmul.f32 %v8348_v28, %v8534_v5 }
 0x10c   : > { %v857_v42 = vmul.f32 %v8343_v27, %v8571_v31 }
 0x10d   : > { %v1094_v40 = vadd.f32 %v1062_v49, %v900_v38  ;;  %v518_v49 = vld [vmem:[%s8266_s24 + $0xf0] sm:$0xff]  ;;  %v8648_v38 = vld [vmem:[%s8266_s24 + $0x98] sm:$0xff] }
 0x10e   : > { %v889_v5 = vadd.f32 %v857_v42, %v695_v33  ;;  %792 = vperm.xlu0 %8030, %v8648_v38  }
 0x10f   : > { %2084 = vmatpush.bf16.msrb.mxu0 %v5895_v63  ;;  %v1130_v60 = vadd.f32 %v8369_v43, %v1094_v40 }
 0x110   : > { %8015 = vset.pattern.permute.xlu2 %v8124_v2 }
 0x111   : > { %998 = vperm.xlu2 %8015, %v8481_v6   ;;  %v817_v25 = vpop.permute.xlu1 %816  ;;  %v1147_v6 = vmax.f32 %v1115_v53, 0.0  ;;  %v1162_v12 = vmax.f32 %v1130_v60, 0.0 }
 0x112   : > { %v869_v57 = vmul.f32 %v8343_v27, %v817_v25  ;;  %832 = vperm.xlu1 %8012, %v8396_v61   ;;  %v8617_v19 = vpop.permute.xlu0 %1018 }
 0x113   : > { %v1174_v10 = vpack.c.bf16 %v1147_v6, %v1146_v58 }
 0x114   : > { %v901_v0 = vadd.f32 %v869_v57, %v707_v54  ;;  %v8600_v1 = vpop.permute.xlu2 %623  ;;  %v870_v57 = vmul.f32 %v8343_v27, %v8448_v39 }
 0x116   : > { %v1095_v56 = vadd.f32 %v1063_v55, %v901_v0  ;;  %8033 = vset.pattern.permute.xlu0 %v8124_v2 }
 0x118   : > { %v1131_v11 = vadd.f32 %v8369_v43, %v1095_v56 }
 0x119   : > { %1022 = vperm.xlu2 %8015, %v8311_v18  }
 0x11a   : > { %5868 = vmatmul.msk.bf16.gmra.mxu0 %vm1222_vm0, %v1174_v10  ;;  %8016 = vset.pattern.permute.xlu1 %v8124_v2  ;;  %v584_v61 = vpop.permute.xlu1 %583  ;;  %v1163_v13 = vmax.f32 %v1131_v11, 0.0  ;;  %v1065_v10 = vmul.f32 %v8354_v32, %v8617_v19 }
 0x11b   : > { %1002 = vperm.xlu1 %8016, %v8460_v46   ;;  %v694_v46 = vmul.f32 %v8348_v28, %v584_v61  ;;  %v8637_v9 = vpop.permute.xlu0 %966 }
 0x11c   : > { %v1182_v14 = vpack.c.bf16 %v1163_v13, %v1162_v12  ;;  %v8612_v15 = vpop.permute.xlu2 %658  ;;  %v702_v12 = vmul.f32 %v8348_v28, %v8600_v1 }
 0x11d   : > { %v709_v8 = vmul.f32 %v8348_v28, %v8612_v15 }
 0x11e   : > { %5876 = vmatmul.msk.bf16.vlgmr.msra.gmra.mxu3 %vm1222_vm0, %v1182_v14 }
 0x121   : > { %8018 = vset.pattern.permute.xlu2 %v8126_v4 }
 0x122   : > { %608 = vperm.xlu2 %8018, %v505_v16  }
 0x123   : > { %8017 = vset.pattern.permute.xlu1 %v8126_v4  ;;  %v765_v18 = vpop.permute.xlu1 %764 }
 0x124   : > { %v856_v20 = vmul.f32 %v8343_v27, %v765_v18  ;;  %603 = vperm.xlu1 %8017, %v8412_v7   ;;  %v8654_v51 = vpop.permute.xlu0 %1026 }
 0x125   : > { %v8624_v22 = vpop.permute.xlu2 %800 }
 0x126   : > { %v1280_v21 = vpop.f32.mrf.mxu0  ;;  %v888_v24 = vadd.f32 %v856_v20, %v694_v46  ;;  %v865_v19 = vmul.f32 %v8343_v27, %v8624_v22 }
 0x127   : > { %v1281_v26 = vadd.f32 %v8634_v23, %v1280_v21 }
 0x128   : > { %v1082_v62 = vadd.f32 %v1050_v59, %v888_v24 }
 0x129   : > { %v1360_v41 = vmax.f32 %v1281_v26, 0.0 }
 0x12a   : > { %8020 = vset.pattern.permute.xlu2 %v8125_v3  ;;  %v1118_v35 = vadd.f32 %v8369_v43, %v1082_v62 }
 0x12b   : > { %784 = vperm.xlu2 %8020, %v505_v16  }
 0x12c   : > { %8019 = vset.pattern.permute.xlu1 %v8125_v3  ;;  %v963_v52 = vpop.permute.xlu1 %962 }
 0x12d   : > { %v1051_v29 = vmul.f32 %v8354_v32, %v963_v52  ;;  %780 = vperm.xlu1 %8019, %v8412_v7   ;;  %v1150_v7 = vmax.f32 %v1118_v35, 0.0  ;;  %v8664_v55 = vpop.permute.xlu0 %974 }
 0x12e   : > { %v1282_v30 = vpop.f32.mrf.mxu0  ;;  %v991_v36 = vpop.permute.xlu2 %990 }
 0x12f   : > { %v1083_v31 = vadd.f32 %v1051_v29, %v889_v5  ;;  %v1283_v34 = vadd.f32 %v8634_v23, %v1282_v30 }
 0x131   : > { %v1119_v45 = vadd.f32 %v8369_v43, %v1083_v31  ;;  %v1361_v48 = vmax.f32 %v1283_v34, 0.0 }
 0x133   : > { %v1151_v17 = vmax.f32 %v1119_v45, 0.0  ;;  %v8651_v50 = vpack.c.bf16 %v1361_v48, %v1360_v41  ;;  %8023 = vset.pattern.permute.xlu2 %v8126_v4 }
 0x134   : > { %673 = vperm.xlu2 %8023, %v518_v49  }
 0x135   : > { %8022 = vset.pattern.permute.xlu1 %v8124_v2  ;;  %v654_v53 = vpop.permute.xlu1 %653  ;;  %2085 = vmatmul.bf16.vlgmr.msrb.gmra.mxu0 %v8651_v50  ;;  %v1176_v25 = vpack.c.bf16 %v1151_v17, %v1150_v7 }
 0x136   : > { %978 = vperm.xlu1 %8022, %v505_v16   ;;  %v1015_v63 = vpop.permute.xlu2 %1014  ;;  %v708_v40 = vmul.f32 %v8348_v28, %v654_v53  ;;  %v629_v13 = vpop.permute.xlu0 %628 }
 0x137   : > { %5870 = vmatmul.msk.bf16.gmra.mxu1 %vm1222_vm0, %v1176_v25  ;;  %v1064_v6 = vmul.f32 %v8354_v32, %v1015_v63  ;;  %v703_v20 = vmul.f32 %v8348_v28, %v629_v13  ;;  %v1052_v63 = vmul.f32 %v8354_v32, %v8637_v9 }
 0x138   : > { %v902_v0 = vadd.f32 %v870_v57, %v708_v40 }
 0x139   : > { %v897_v52 = vadd.f32 %v865_v19, %v703_v20  ;;  %v6012_v19 = vld [vmem:[%s10289_s5 + $0x120] sm:$0xf0] }
 0x13a   : > { %v1096_v11 = vadd.f32 %v1064_v6, %v902_v0 }
 0x13c   : > { %8025 = vset.pattern.permute.xlu2 %v8125_v3  ;;  %v1132_v15 = vadd.f32 %v8369_v43, %v1096_v11 }
 0x13d   : > { %840 = vperm.xlu2 %8025, %v8574_v37  }
 0x13e   : > { %8024 = vset.pattern.permute.xlu1 %v8125_v3  ;;  %v797_v54 = vpop.permute.xlu1 %796  ;;  %v1164_v24 = vmax.f32 %v1132_v15, 0.0 }
 0x13f   : > { %836 = vperm.xlu1 %8024, %v518_v49   ;;  %v8668_v58 = vpop.permute.xlu2 %598  ;;  %v864_v56 = vmul.f32 %v8343_v27, %v797_v54  ;;  %v6108_v54 = vld [vmem:[%s10289_s5 + $0x1e0] sm:$0xf0] }
 0x141   : > { %v896_v16 = vadd.f32 %v864_v56, %v702_v12  ;;  %v6044_v12 = vld [vmem:[%s10289_s5 + $0x160] sm:$0xf0] }
 0x145   : > { %8027 = vset.pattern.permute.xlu2 %v8124_v2 }
 0x146   : > { %1034 = vperm.xlu2 %8027, %v8574_v37   ;;  %v825_v60 = vpop.permute.xlu1 %824  ;;  %v1058_v37 = vmul.f32 %v8354_v32, %v991_v36 }
 0x147   : > { %v871_v39 = vmul.f32 %v8343_v27, %v825_v60  ;;  %8026 = vset.pattern.permute.xlu1 %v8124_v2  ;;  %v1285_v61 = vpop.f32.mrf.mxu0  ;;  %v6076_v60 = vld [vmem:[%s10289_s5 + $0x1a0] sm:$0xf0] }
 0x148   : > { %1030 = vperm.xlu1 %8026, %v518_v49   ;;  %v777_v46 = vpop.permute.xlu2 %776  ;;  %v1090_v59 = vadd.f32 %v1058_v37, %v896_v16  ;;  %v1286_v1 = vadd.f32 %v8634_v23, %v1285_v61  ;;  %v7527_v61 = vld [vmem:[%s10289_s5 + $0x144] sm:$0xf] }
 0x149   : > { %v903_v14 = vadd.f32 %v871_v39, %v709_v8  ;;  %v6047_v13 = vor.u32 %v7527_v61, %v6044_v12 }
 0x14a   : > { %v1362_v29 = vmax.f32 %v1286_v1, 0.0  ;;  %v5980_v1 = vld [vmem:[%s10289_s5 + $0xe0] sm:$0xf0] }
 0x14b   : > { %v1097_v18 = vadd.f32 %v1065_v10, %v903_v14 }
 0x14d   : > { %v1133_v21 = vadd.f32 %v8369_v43, %v1097_v18  ;;  %v7519_v18 = vld [vmem:[%s10289_s5 + $0x104] sm:$0xf] }
 0x14e   : > { %8029 = vset.pattern.permute.xlu2 %v8125_v3  ;;  %v1126_v3 = vadd.f32 %v8369_v43, %v1090_v59  ;;  %v7511_v59 = vld [vmem:[%s10289_s5 + $0xc4] sm:$0xf] }
 0x14f   : > { %788 = vperm.xlu2 %8029, %v8603_v47   ;;  %v995_v33 = vpop.permute.xlu1 %994  ;;  %v1287_v42 = vpop.f32.mrf.mxu0  ;;  %v1165_v62 = vmax.f32 %v1133_v21, 0.0 }
 0x150   : > { %v1059_v5 = vmul.f32 %v8354_v32, %v995_v33  ;;  %v1288_v22 = vadd.f32 %v8634_v23, %v1287_v42  ;;  %8028 = vset.pattern.permute.xlu1 %v8126_v4  ;;  %v1158_v4 = vmax.f32 %v1126_v3, 0.0  ;;  %v6106_v33 = vld [vmem:[%s10289_s5 + $0x1c0] sm:$0xf]  ;;  %v872_v3 = vmul.f32 %v8343_v27, %v8455_v44  ;;  %v7487_v44 = vld [vmem:[%s10289_s5 + $0x4] sm:$0xf] }
 0x151   : > { %618 = vperm.xlu1 %8028, %v8648_v38   ;;  %v1183_v26 = vpack.c.bf16 %v1165_v62, %v1164_v24  ;;  %v8700_v41 = vpop.permute.xlu2 %633  ;;  %v5983_v24 = vor.u32 %v7511_v59, %v5980_v1  ;;  %v7547_v42 = vld [vmem:[%s10289_s5 + $0x1dc] sm:$0xf0] }
 0x152   : > { %v1091_v30 = vadd.f32 %v1059_v5, %v897_v52  ;;  %v1363_v31 = vmax.f32 %v1288_v22, 0.0  ;;  %v6107_v62 = vor.u32 %v7547_v42, %v6106_v33  ;;  %v7503_v52 = vld [vmem:[%s10289_s5 + $0x84] sm:$0xf] }
 0x153   : > { %5877 = vmatmul.msk.bf16.gmra.mxu3 %vm1222_vm0, %v1183_v26  ;;  %v5948_v5 = vld [vmem:[%s10289_s5 + $0xa0] sm:$0xf0] }
 0x154   : > { %v1127_v34 = vadd.f32 %v8369_v43, %v1091_v30  ;;  %v8698_v35 = vpack.c.bf16 %v1363_v31, %v1362_v29  ;;  %v5951_v26 = vor.u32 %v7503_v52, %v5948_v5  ;;  %1810 = vmatpush.bf16.msrb.mxu1 %v6107_v62 }
 0x156   : > { %v1159_v36 = vmax.f32 %v1127_v34, 0.0  ;;  %2090 = vmatmul.bf16.gmra.mxu0 %v8698_v35 }
 0x157   : > { %8032 = vset.pattern.permute.xlu2 %v8124_v2 }
 0x158   : > { %v594_v45 = vpop.permute.xlu1 %593  ;;  %v1180_v48 = vpack.c.bf16 %v1159_v36, %v1158_v4  ;;  %986 = vperm.xlu2 %8032, %v8648_v38   ;;  %v697_v38 = vmul.f32 %v8348_v28, %v8668_v58  ;;  %v7535_v58 = vld [vmem:[%s10289_s5 + $0x184] sm:$0xf] }
 0x159   : > { %8031 = vset.pattern.permute.xlu1 %v8124_v2  ;;  %v8708_v49 = vpop.permute.xlu2 %668  ;;  %v696_v53 = vmul.f32 %v8348_v28, %v594_v45  ;;  %v859_v2 = vmul.f32 %v8343_v27, %v777_v46  ;;  %v6079_v8 = vor.u32 %v7535_v58, %v6076_v60  ;;  %v6015_v46 = vor.u32 %v7519_v18, %v6012_v19  ;;  %v7495_v36 = vld [vmem:[%s10289_s5 + $0x44] sm:$0xf]  ;;  %v639_v58 = vpop.permute.xlu0 %638 }
 0x15a   : > { %982 = vperm.xlu1 %8031, %v8603_v47   ;;  %5874 = vmatmul.msk.bf16.vlgmr.msra.gmra.mxu2 %vm1222_vm0, %v1180_v48  ;;  %v7543_v47 = vld [vmem:[%s10289_s5 + $0x1c4] sm:$0xf] }
 0x15b   : > { %v6111_v40 = vor.u32 %v7543_v47, %v6108_v54  ;;  %v891_v9 = vadd.f32 %v859_v2, %v697_v38  ;;  %v5916_v4 = vld [vmem:[%s10289_s5 + $0x60] sm:$0xf0] }
 0x15c   : > { %v5919_v48 = vor.u32 %v7495_v36, %v5916_v4 }
 0x15d   : > { %1899 = vmatpush.bf16.msrb.mxu2 %v6111_v40  ;;  %v711_v40 = vmul.f32 %v8348_v28, %v8708_v49  ;;  %v7539_v49 = vld [vmem:[%s10289_s5 + $0x19c] sm:$0xf0] }
 0x161   : > { %v773_v17 = vpop.permute.xlu1 %772  ;;  %1900 = vmatpush.bf16.msrb.mxu2 %v6079_v8 }
 0x162   : > { %v858_v7 = vmul.f32 %v8343_v27, %v773_v17  ;;  %v8723_v0 = vpop.permute.xlu2 %808 }
 0x164   : > { %v890_v25 = vadd.f32 %v858_v7, %v696_v53 }
 0x165   : > { %1901 = vmatpush.bf16.msrb.mxu2 %v6047_v13 }
 0x166   : > { %v1084_v57 = vadd.f32 %v1052_v63, %v890_v25  ;;  %v5884_v63 = vld [vmem:[%s10289_s5 + $0x20] sm:$0xf0] }
 0x167   : > { %v5887_v54 = vor.u32 %v7487_v44, %v5884_v63  ;;  %v7523_v44 = vld [vmem:[%s10289_s5 + $0x11c] sm:$0xf0] }
 0x168   : > { %v1120_v11 = vadd.f32 %v8369_v43, %v1084_v57 }
 0x169   : > { %1902 = vmatpush.bf16.msrb.mxu2 %v6015_v46 }
 0x16a   : > { %v971_v6 = vpop.permute.xlu1 %970  ;;  %v1152_v37 = vmax.f32 %v1120_v11, 0.0 }
 0x16b   : > { %v1053_v56 = vmul.f32 %v8354_v32, %v971_v6  ;;  %v999_v20 = vpop.permute.xlu2 %998 }
 0x16c   : > { %v1060_v11 = vmul.f32 %v8354_v32, %v999_v20 }
 0x16d   : > { %v1085_v10 = vadd.f32 %v1053_v56, %v891_v9  ;;  %1903 = vmatpush.bf16.msrb.mxu2 %v5983_v24  ;;  %v704_v9 = vmul.f32 %v8348_v28, %v8700_v41  ;;  %v1067_v56 = vmul.f32 %v8354_v32, %v8654_v51  ;;  %v6114_v41 = vld [vmem:[%s10289_s5 + $0x1c8] sm:$0xf] }
 0x16e   : > { %v7548_v51 = vld [vmem:[%s10289_s5 + $0x1e4] sm:$0xf0] }
 0x16f   : > { %v1121_v39 = vadd.f32 %v8369_v43, %v1085_v10  ;;  %v6074_v10 = vld [vmem:[%s10289_s5 + $0x180] sm:$0xf] }
 0x170   : > { %v6075_v61 = vor.u32 %v7539_v49, %v6074_v10 }
 0x171   : > { %v1153_v14 = vmax.f32 %v1121_v39, 0.0  ;;  %1904 = vmatpush.bf16.msrb.mxu2 %v5951_v26 }
 0x172   : > { %1811 = vmatpush.bf16.msrb.mxu1 %v6075_v61 }
 0x173   : > { %v664_v16 = vpop.permute.xlu1 %663  ;;  %v1177_v15 = vpack.c.bf16 %v1153_v14, %v1152_v37  ;;  %v1023_v30 = vpop.permute.xlu2 %1022  ;;  %v6115_v14 = vor.u32 %v7548_v51, %v6114_v41  ;;  %v867_v37 = vmul.f32 %v8343_v27, %v8723_v0  ;;  %v6042_v0 = vld [vmem:[%s10289_s5 + $0x140] sm:$0xf] }
 0x174   : > { %v710_v29 = vmul.f32 %v8348_v28, %v664_v16  ;;  %v1066_v7 = vmul.f32 %v8354_v32, %v1023_v30  ;;  %v705_v16 = vmul.f32 %v8348_v28, %v639_v58  ;;  %v7540_v28 = vld [vmem:[%s10289_s5 + $0x1a4] sm:$0xf0]  ;;  %v5978_v41 = vld [vmem:[%s10289_s5 + $0xc0] sm:$0xf] }
 0x175   : > { %5871 = vmatmul.msk.bf16.gmra.mxu1 %vm1222_vm0, %v1177_v15  ;;  %1905 = vmatpush.bf16.msrb.mxu2 %v5919_v48  ;;  %v7532_v48 = vld [vmem:[%s10289_s5 + $0x164] sm:$0xf0] }
 0x176   : > { %v904_v17 = vadd.f32 %v872_v3, %v710_v29  ;;  %1988 = vmatpush.bf16.msrb.mxu3 %v6115_v14  ;;  %v899_v59 = vadd.f32 %v867_v37, %v705_v16  ;;  %v6018_v58 = vld [vmem:[%s10289_s5 + $0x108] sm:$0xf] }
 0x177   : > { %v1290_v21 = vpop.f32.mrf.mxu0 }
 0x178   : > { %v1291_v31 = vadd.f32 %v8634_v23, %v1290_v21  ;;  %v1098_v57 = vadd.f32 %v1066_v7, %v904_v17 }
 0x179   : > { %1906 = vmatpush.bf16.msrb.mxu2 %v5887_v54 }
 0x17a   : > { %v1364_v53 = vmax.f32 %v1291_v31, 0.0  ;;  %v1134_v12 = vadd.f32 %v8369_v43, %v1098_v57 }
 0x17c   : > { %v805_v22 = vpop.permute.xlu1 %804  ;;  %v8811_v15 = vpop.permute.xlu2 %608  ;;  %v1166_v20 = vmax.f32 %v1134_v12, 0.0 }
 0x17d   : > { %v866_v38 = vmul.f32 %v8343_v27, %v805_v22  ;;  %v7531_v22 = vld [vmem:[%s10289_s5 + $0x15c] sm:$0xf0] }
 0x17e   : > { %v6043_v26 = vor.u32 %v7531_v22, %v6042_v0  ;;  %v8906_v0 = vld [vmem:[%s10286_s2] ss:$0 sm:$0xff] }
 0x17f   : > { %v1292_v34 = vpop.f32.mrf.mxu0  ;;  %v898_v39 = vadd.f32 %v866_v38, %v704_v9  ;;  %v8855_v9 = vld [vmem:[%s10285_s1 + $0x1] ss:$0 sm:$0xff] }
 0x180   : > { %v1293_v45 = vadd.f32 %v8634_v23, %v1292_v34  ;;  %1812 = vmatpush.bf16.msrb.mxu1 %v6043_v26 }
 0x181   : > { %v1092_v19 = vadd.f32 %v1060_v11, %v898_v39  ;;  %v7515_v11 = vld [vmem:[%s10289_s5 + $0xdc] sm:$0xf0]  ;;  %v5986_v39 = vld [vmem:[%s10289_s5 + $0xc8] sm:$0xf] }
 0x182   : > { %v1365_v25 = vmax.f32 %v1293_v45, 0.0  ;;  %v6050_v45 = vld [vmem:[%s10289_s5 + $0x148] sm:$0xf]  ;;  %v5979_v12 = vor.u32 %v7515_v11, %v5978_v41  ;;  %v5914_v41 = vld [vmem:[%s10289_s5 + $0x40] sm:$0xf] }
 0x183   : > { %v1128_v5 = vadd.f32 %v8369_v43, %v1092_v19  ;;  %v6051_v7 = vor.u32 %v7532_v48, %v6050_v45 }
 0x184   : > { %v8784_v2 = vpack.c.bf16 %v1365_v25, %v1364_v53  ;;  %v833_v47 = vpop.permute.xlu1 %832  ;;  %v6010_v25 = vld [vmem:[%s10289_s5 + $0x100] sm:$0xf] }
 0x185   : > { %v873_v6 = vmul.f32 %v8343_v27, %v833_v47  ;;  %v6082_v27 = vld [vmem:[%s10289_s5 + $0x188] sm:$0xf]  ;;  %v785_v3 = vpop.permute.xlu2 %784  ;;  %v1160_v4 = vmax.f32 %v1128_v5, 0.0  ;;  %v6011_v63 = vor.u32 %v7523_v44, %v6010_v25  ;;  %v5946_v5 = vld [vmem:[%s10289_s5 + $0x80] sm:$0xf] }
 0x186   : > { %2095 = vmatmul.bf16.gmra.mxu0 %v8784_v2 }
 0x187   : > { %v905_v60 = vadd.f32 %v873_v6, %v711_v40  ;;  %v1295_v8 = vpop.f32.mrf.mxu0  ;;  %1813 = vmatpush.bf16.msrb.mxu1 %v6011_v63 }
 0x188   : > { %v1296_v1 = vadd.f32 %v8634_v23, %v1295_v8  ;;  %v1305_v38 = vpop.f32.mrf.mxu1  ;;  %v8867_v8 = vld [vmem:[%s10285_s1] ss:$0 sm:$0xff] }
 0x189   : > { %v1099_v13 = vadd.f32 %v1067_v56, %v905_v60  ;;  %v7524_v60 = vld [vmem:[%s10289_s5 + $0x124] sm:$0xf0] }
 0x18a   : > { %v1366_v29 = vmax.f32 %v1296_v1, 0.0  ;;  %v6019_v49 = vor.u32 %v7524_v60, %v6018_v58 }
 0x18b   : > { %v1135_v18 = vadd.f32 %v8369_v43, %v1099_v13  ;;  %v7516_v13 = vld [vmem:[%s10289_s5 + $0xe4] sm:$0xf0]  ;;  %1814 = vmatpush.bf16.msrb.mxu1 %v5979_v12 }
 0x18c   : > { %v5987_v37 = vor.u32 %v7516_v13, %v5986_v39 }
 0x18d   : > { %v1003_v46 = vpop.permute.xlu1 %1002  ;;  %v1167_v21 = vmax.f32 %v1135_v18, 0.0  ;;  %v8887_v18 = vld [vmem:[%s10285_s1 + $0x2] ss:$0 sm:$0xff] }
 0x18e   : > { %v1061_v24 = vmul.f32 %v8354_v32, %v1003_v46  ;;  %v6083_v32 = vor.u32 %v7540_v28, %v6082_v27  ;;  %v8848_v47 = vpop.permute.xlu2 %673  ;;  %v1054_v19 = vmul.f32 %v8887_v18, %v8664_v55  ;;  %v861_v46 = vmul.f32 %v8855_v9, %v785_v3  ;;  %v7508_v55 = vld [vmem:[%s10289_s5 + $0xa4] sm:$0xf0]  ;;  %v679_v3 = vpop.permute.xlu0 %678 }
 0x18f   : > { %v1297_v33 = vpop.f32.mrf.mxu0  ;;  %v1184_v42 = vpack.c.bf16 %v1167_v21, %v1166_v20  ;;  %v699_v20 = vmul.f32 %v8867_v8, %v8811_v15  ;;  %v712_v11 = vmul.f32 %v8867_v8, %v8848_v47 }
 0x190   : > { %v1093_v62 = vadd.f32 %v1061_v24, %v899_v59  ;;  %v1298_v52 = vadd.f32 %v8634_v23, %v1297_v33  ;;  %1989 = vmatpush.bf16.msrb.mxu3 %v6083_v32  ;;  %v5954_v24 = vld [vmem:[%s10289_s5 + $0x88] sm:$0xf]  ;;  %v1307_v15 = vpop.f32.mrf.mxu1  ;;  %v7507_v32 = vld [vmem:[%s10289_s5 + $0x9c] sm:$0xf0] }
 0x191   : > { %5878 = vmatmul.msk.bf16.gmra.mxu3 %vm1222_vm0, %v1184_v42  ;;  %v893_v33 = vadd.f32 %v861_v46, %v699_v20  ;;  %v5955_v27 = vor.u32 %v7508_v55, %v5954_v24  ;;  %v5947_v26 = vor.u32 %v7507_v32, %v5946_v5 }
 0x192   : > { %v1129_v30 = vadd.f32 %v8369_v43, %v1093_v62  ;;  %v1367_v31 = vmax.f32 %v1298_v52, 0.0  ;;  %v1308_v52 = vadd.f32 %v8634_v23, %v1307_v15 }
 0x193   : > { %1815 = vmatpush.bf16.msrb.mxu1 %v5947_v26  ;;  %v6130_v26 = vld [vmem:[%s10289_s5 + $0x1d8] sm:$0xf] }
 0x194   : > { %v1161_v34 = vmax.f32 %v1129_v30, 0.0  ;;  %v8832_v36 = vpack.c.bf16 %v1367_v31, %v1366_v29  ;;  %1990 = vmatpush.bf16.msrb.mxu3 %v6051_v7  ;;  %v5922_v29 = vld [vmem:[%s10289_s5 + $0x48] sm:$0xf]  ;;  %v1306_v31 = vadd.f32 %v8634_v23, %v1305_v38  ;;  %v1371_v48 = vmax.f32 %v1308_v52, 0.0 }
 0x195   : > { %v7500_v30 = vld [vmem:[%s10289_s5 + $0x64] sm:$0xf0] }
 0x196   : > { %2100 = vmatmul.bf16.gmra.mxu0 %v8832_v36  ;;  %v604_v17 = vpop.permute.xlu1 %603  ;;  %v1181_v43 = vpack.c.bf16 %v1161_v34, %v1160_v4  ;;  %v5923_v34 = vor.u32 %v7500_v30, %v5922_v29  ;;  %v1370_v38 = vmax.f32 %v1306_v31, 0.0  ;;  %v614_v60 = vpop.permute.xlu0 %613  ;;  %v7550_v29 = vld [vmem:[%s10289_s5 + $0x1f4] sm:$0xf0] }
 0x197   : > { %v1300_v53 = vpop.f32.mrf.mxu0  ;;  %v698_v10 = vmul.f32 %v8867_v8, %v604_v17  ;;  %v841_v59 = vpop.permute.xlu2 %840  ;;  %v5890_v17 = vld [vmem:[%s10289_s5 + $0x8] sm:$0xf] }
 0x198   : > { %5875 = vmatmul.msk.bf16.gmra.mxu2 %vm1222_vm0, %v1181_v43  ;;  %v1301_v54 = vadd.f32 %v8634_v23, %v1300_v53  ;;  %1991 = vmatpush.bf16.msrb.mxu3 %v6019_v49  ;;  %v7492_v43 = vld [vmem:[%s10289_s5 + $0x24] sm:$0xf0]  ;;  %v875_v7 = vmul.f32 %v8855_v9, %v841_v59  ;;  %v713_v53 = vmul.f32 %v8867_v8, %v679_v3  ;;  %v6124_v49 = vld [vmem:[%s10289_s5 + $0x1f0] sm:$0xf0] }
 0x199   : > { %v5891_v63 = vor.u32 %v7492_v43, %v5890_v17  ;;  %v8982_v17 = vld [vmem:[%s10290_s6] sm:$0xff]  ;;  %v6122_v43 = vld [vmem:[%s10289_s5 + $0x1d0] sm:$0xf] }
 0x19a   : > { %v1368_v61 = vmax.f32 %v1301_v54, 0.0 }
 0x19c   : > { %1992 = vmatpush.bf16.msrb.mxu3 %v5987_v37 }
 0x19e   : > { %v793_v55 = vpop.permute.xlu0 %792 }
 0x19f   : > { %v1302_v40 = vpop.f32.mrf.mxu0  ;;  %v781_v57 = vpop.permute.xlu1 %780  ;;  %v863_v5 = vmul.f32 %v8855_v9, %v793_v55 }
 0x1a0   : > { %v1303_v6 = vadd.f32 %v8634_v23, %v1302_v40  ;;  %v860_v56 = vmul.f32 %v8855_v9, %v781_v57  ;;  %1993 = vmatpush.bf16.msrb.mxu3 %v5955_v27  ;;  %v1035_v54 = vpop.permute.xlu2 %1034  ;;  %v8933_v40 = vpack.c.bf16 %v1371_v48, %v1370_v38 }
 0x1a2   : > { %v1369_v51 = vmax.f32 %v1303_v6, 0.0  ;;  %v892_v14 = vadd.f32 %v860_v56, %v698_v10  ;;  %v907_v6 = vadd.f32 %v875_v7, %v713_v53  ;;  %v1069_v56 = vmul.f32 %v8887_v18, %v1035_v54  ;;  %v7545_v10 = vld [vmem:[%s10289_s5 + $0x1d4] sm:$0xf]  ;;  %v7549_v7 = vld [vmem:[%s10289_s5 + $0x1ec] sm:$0xf0] }
 0x1a3   : > { %v700_v53 = vmul.f32 %v8867_v8, %v614_v60 }
 0x1a4   : > { %v8882_v16 = vpack.c.bf16 %v1369_v51, %v1368_v61  ;;  %v1086_v21 = vadd.f32 %v1054_v19, %v892_v14  ;;  %1994 = vmatpush.bf16.msrb.mxu3 %v5923_v34  ;;  %v1101_v39 = vadd.f32 %v1069_v56, %v907_v6  ;;  %v6127_v61 = vor.u32 %v7545_v10, %v6124_v49  ;;  %v7499_v51 = vld [vmem:[%s10289_s5 + $0x5c] sm:$0xf0] }
 0x1a5   : > { %v5915_v13 = vor.u32 %v7499_v51, %v5914_v41  ;;  %v6131_v34 = vor.u32 %v7550_v29, %v6130_v26  ;;  %v7537_v51 = vld [vmem:[%s10289_s5 + $0x194] sm:$0xf] }
 0x1a6   : > { %2105 = vmatmul.bf16.gmra.mxu0 %v8882_v16  ;;  %v1122_v62 = vadd.f32 %v8906_v0, %v1086_v21  ;;  %2255 = vmatpush.bf16.msra.mxu2 %v6127_v61  ;;  %v1137_v46 = vadd.f32 %v8906_v0, %v1101_v39 }
 0x1a7   : > { %1816 = vmatpush.bf16.msrb.mxu1 %v5915_v13 }
 0x1a8   : > { %v979_v1 = vpop.permute.xlu1 %978  ;;  %1907 = vmatmul.bf16.vlgmr.msrb.gmra.mxu2 %v8651_v50  ;;  %v1154_v45 = vmax.f32 %v1122_v62, 0.0  ;;  %1995 = vmatpush.bf16.msrb.mxu3 %v5891_v63  ;;  %v7491_v62 = vld [vmem:[%s10289_s5 + $0x1c] sm:$0xf0]  ;;  %v6123_v63 = vor.u32 %v7549_v7, %v6122_v43 }
 0x1a9   : > { %v1055_v42 = vmul.f32 %v8887_v18, %v979_v1  ;;  %v789_v19 = vpop.permute.xlu2 %788 }
 0x1aa   : > { %v862_v48 = vmul.f32 %v8855_v9, %v789_v19  ;;  %v6132_v19 = vld [vmem:[%s10289_s5 + $0x1f8] sm:$0xf0] }
 0x1ab   : > { %v1087_v28 = vadd.f32 %v1055_v42, %v893_v33  ;;  %v1169_v33 = vmax.f32 %v1137_v46, 0.0 }
 0x1ac   : > { %2344 = vmatpush.bf16.msra.mxu3 %v6131_v34  ;;  %v894_v54 = vadd.f32 %v862_v48, %v700_v53 }
 0x1ad   : > { %v1123_v22 = vadd.f32 %v8906_v0, %v1087_v28  ;;  %v5882_v28 = vld [vmem:[%s10289_s5] sm:$0xf] }
 0x1af   : > { %v1155_v4 = vmax.f32 %v1123_v22, 0.0  ;;  %v5883_v22 = vor.u32 %v7491_v62, %v5882_v28 }
 0x1b1   : > { %v837_v25 = vpop.permute.xlu1 %836  ;;  %v1178_v44 = vpack.c.bf16 %v1155_v4, %v1154_v45  ;;  %1817 = vmatpush.bf16.msrb.mxu1 %v5883_v22 }
 0x1b2   : > { %v874_v58 = vmul.f32 %v8855_v9, %v837_v25  ;;  %v2086_v15 = vpop.f32.mrf.mxu0  ;;  %v987_v3 = vpop.permute.xlu2 %986  ;;  %v8992_v9 = vperm.slane %v8982_v17, 3 }
 0x1b3   : > { %5872 = vmatmul.msk.bf16.gmra.mxu1 %vm1222_vm0, %v1178_v44  ;;  %v1057_v45 = vmul.f32 %v8887_v18, %v987_v3 }
 0x1b4   : > { %v1310_v57 = vpop.f32.mrf.mxu1  ;;  %v906_v14 = vadd.f32 %v874_v58, %v712_v11  ;;  %v2087_v10 = vadd.f32 %v2086_v15, %v8992_v9  ;;  %v7529_v15 = vld [vmem:[%s10289_s5 + $0x154] sm:$0xf] }
 0x1b5   : > { %v1311_v59 = vadd.f32 %v8634_v23, %v1310_v57  ;;  %2166 = vmatpush.bf16.msra.mxu1 %v6123_v63  ;;  %v6058_v63 = vld [vmem:[%s10289_s5 + $0x150] sm:$0xf] }
 0x1b6   : > { %2110 = vmatmul.bf16.gmra.mxu0 %v8933_v40  ;;  %v2525_v39 = vmax.f32 %v2087_v10, 0.0  ;;  %v9076_v10 = vpop.f32.mrf.mxu3 }
 0x1b7   : > { %v1372_v27 = vmax.f32 %v1311_v59, 0.0 }
 0x1b8   : > { %1912 = vmatmul.bf16.gmra.mxu2 %v8698_v35 }
 0x1ba   : > { %v1031_v12 = vpop.permute.xlu1 %1030  ;;  %v2088_v25 = vpop.f32.mrf.mxu0 }
 0x1bb   : > { %v1068_v37 = vmul.f32 %v8887_v18, %v1031_v12  ;;  %v2089_v6 = vadd.f32 %v2088_v25, %v8992_v9  ;;  %v6092_v12 = vld [vmem:[%s10289_s5 + $0x1b0] sm:$0xf0]  ;;  %v6066_v25 = vld [vmem:[%s10289_s5 + $0x158] sm:$0xf] }
 0x1bc   : > { %v1312_v20 = vpop.f32.mrf.mxu1 }
 0x1bd   : > { %v1100_v21 = vadd.f32 %v1068_v37, %v906_v14  ;;  %v1313_v47 = vadd.f32 %v8634_v23, %v1312_v20  ;;  %v2533_v60 = vmax.f32 %v2089_v6, 0.0  ;;  %v6095_v37 = vor.u32 %v7537_v51, %v6092_v12  ;;  %v6028_v51 = vld [vmem:[%s10289_s5 + $0x130] sm:$0xf0]  ;;  %v7530_v12 = vld [vmem:[%s10289_s5 + $0x15c] sm:$0xf] }
 0x1bf   : > { %v1136_v1 = vadd.f32 %v8906_v0, %v1100_v21  ;;  %v1373_v24 = vmax.f32 %v1313_v47, 0.0  ;;  %v2890_v13 = vmax.f32 %v2525_v39, %v2533_v60  ;;  %2256 = vmatpush.bf16.msra.mxu2 %v6095_v37  ;;  %v6098_v21 = vld [vmem:[%s10289_s5 + $0x198] sm:$0xf] }
 0x1c0   : > { %v7542_v47 = vld [vmem:[%s10289_s5 + $0x1b4] sm:$0xf0] }
 0x1c1   : > { %v1168_v42 = vmax.f32 %v1136_v1, 0.0  ;;  %v8971_v30 = vpack.c.bf16 %v1373_v24, %v1372_v27  ;;  %v6099_v59 = vor.u32 %v7542_v47, %v6098_v21  ;;  %v6090_v1 = vld [vmem:[%s10289_s5 + $0x190] sm:$0xf]  ;;  %v7538_v27 = vld [vmem:[%s10289_s5 + $0x19c] sm:$0xf] }
 0x1c2   : > { %v7541_v24 = vld [vmem:[%s10289_s5 + $0x1ac] sm:$0xf0] }
 0x1c3   : > { %v619_v52 = vpop.permute.xlu1 %618  ;;  %v1185_v32 = vpack.c.bf16 %v1169_v33, %v1168_v42  ;;  %v6091_v55 = vor.u32 %v7541_v24, %v6090_v1  ;;  %2345 = vmatpush.bf16.msra.mxu3 %v6099_v59  ;;  %v6060_v42 = vld [vmem:[%s10289_s5 + $0x170] sm:$0xf0] }
 0x1c4   : > { %v701_v31 = vmul.f32 %v8867_v8, %v619_v52  ;;  %v6063_v62 = vor.u32 %v7529_v15, %v6060_v42  ;;  %v6100_v52 = vld [vmem:[%s10289_s5 + $0x1b8] sm:$0xf0] }
 0x1c5   : > { %5879 = vmatmul.msk.bf16.gmra.mxu3 %vm1222_vm0, %v1185_v32  ;;  %2167 = vmatpush.bf16.msra.mxu1 %v6091_v55  ;;  %v9049_v32 = vor.u32 %v7538_v27, %v6100_v52  ;;  %v6034_v27 = vld [vmem:[%s10289_s5 + $0x118] sm:$0xf] }
 0x1c6   : > { %2115 = vmatmul.bf16.gmra.mxu0 %v8971_v30  ;;  %v895_v4 = vadd.f32 %v863_v5, %v701_v31  ;;  %2257 = vmatpush.bf16.msra.mxu2 %v6063_v62 }
 0x1c8   : > { %1917 = vmatmul.bf16.gmra.mxu2 %v8784_v2  ;;  %v1089_v44 = vadd.f32 %v1057_v45, %v895_v4 }
 0x1ca   : > { %v1125_v56 = vadd.f32 %v8906_v0, %v1089_v44  ;;  %v7534_v44 = vld [vmem:[%s10289_s5 + $0x174] sm:$0xf0] }
 0x1cc   : > { %v983_v38 = vpop.permute.xlu1 %982  ;;  %v1157_v49 = vmax.f32 %v1125_v56, 0.0 }
 0x1cd   : > { %v1056_v57 = vmul.f32 %v8887_v18, %v983_v38 }
 0x1cf   : > { %v1088_v58 = vadd.f32 %v1056_v57, %v894_v54  ;;  %v6067_v54 = vor.u32 %v7534_v44, %v6066_v25  ;;  %v7533_v57 = vld [vmem:[%s10289_s5 + $0x16c] sm:$0xf0] }
 0x1d0   : > { %v6059_v6 = vor.u32 %v7533_v57, %v6058_v63 }
 0x1d1   : > { %v1124_v8 = vadd.f32 %v8906_v0, %v1088_v58  ;;  %v7546_v0 = vld [vmem:[%s10289_s5 + $0x1dc] sm:$0xf]  ;;  %2346 = vmatpush.bf16.msra.mxu3 %v6067_v54 }
 0x1d2   : > { %v9014_v20 = vor.u32 %v7546_v0, %v6132_v19  ;;  %2168 = vmatpush.bf16.msra.mxu1 %v6059_v6 }
 0x1d3   : > { %v1156_v41 = vmax.f32 %v1124_v8, 0.0  ;;  %v2091_v11 = vpop.f32.mrf.mxu0 }
 0x1d4   : > { %v2092_v61 = vadd.f32 %v2091_v11, %v8992_v9  ;;  %2433 = vmatpush.bf16.msra.mxu0 %v9014_v20 }
 0x1d5   : > { %1996 = vmatmul.bf16.vlgmr.msrb.gmra.mxu3 %v8651_v50  ;;  %v1179_v18 = vpack.c.bf16 %v1157_v49, %v1156_v41 }
 0x1d6   : > { %v2541_v14 = vmax.f32 %v2092_v61, 0.0 }
 0x1d7   : > { %5873 = vmatmul.msk.bf16.gmra.mxu1 %vm1222_vm0, %v1179_v18  ;;  %v7521_v18 = vld [vmem:[%s10289_s5 + $0x114] sm:$0xf] }
 0x1d8   : > { %v2891_v46 = vmax.f32 %v2890_v13, %v2541_v14  ;;  %1922 = vmatmul.bf16.gmra.mxu2 %v8832_v36  ;;  %2434 = vmatpush.bf16.msra.mxu0 %v9049_v32  ;;  %v6031_v0 = vor.u32 %v7521_v18, %v6028_v51  ;;  %v6068_v13 = vld [vmem:[%s10289_s5 + $0x178] sm:$0xf0] }
 0x1d9   : > { %v9096_v14 = vor.u32 %v7530_v12, %v6068_v13 }
 0x1da   : > { %2258 = vmatpush.bf16.msra.mxu2 %v6031_v0 }
 0x1db   : > { %v2093_v22 = vpop.f32.mrf.mxu0 }
 0x1dc   : > { %v2094_v3 = vadd.f32 %v2093_v22, %v8992_v9  ;;  %2435 = vmatpush.bf16.msra.mxu0 %v9096_v14  ;;  %v6026_v22 = vld [vmem:[%s10289_s5 + $0x110] sm:$0xf] }
 0x1dd   : > { %v9070_v38 = vpop.f32.mrf.mxu2 }
 0x1de   : > { %v2549_v4 = vmax.f32 %v2094_v3, 0.0 }
 0x1e0   : > { %v2892_v43 = vmax.f32 %v2891_v46, %v2549_v4  ;;  %v9100_v46 = vpop.f32.mrf.mxu3 }
 0x1e5   : > { %2001 = vmatmul.bf16.gmra.mxu3 %v8698_v35  ;;  %v9078_v60 = vpop.f32.mrf.mxu2 }
 0x1e7   : > { %1818 = vmatmul.bf16.vlgmr.msrb.gmra.mxu1 %v8651_v50 }
 0x1e8   : > { %1927 = vmatmul.bf16.gmra.mxu2 %v8882_v16  ;;  %v9106_v24 = vpop.f32.mrf.mxu3 }
 0x1f2   : > { %v1315_v33 = vpop.f32.mrf.mxu1 }
 0x1f3   : > { %v1316_v28 = vadd.f32 %v8634_v23, %v1315_v33 }
 0x1f5   : > { %2006 = vmatmul.bf16.gmra.mxu3 %v8784_v2  ;;  %v1374_v29 = vmax.f32 %v1316_v28, 0.0  ;;  %v7526_v28 = vld [vmem:[%s10289_s5 + $0x134] sm:$0xf0] }
 0x1f6   : > { %v6035_v62 = vor.u32 %v7526_v28, %v6034_v27 }
 0x1f7   : > { %1823 = vmatmul.bf16.gmra.mxu1 %v8698_v35 }
 0x1f8   : > { %1932 = vmatmul.bf16.gmra.mxu2 %v8933_v40  ;;  %2347 = vmatpush.bf16.msra.mxu3 %v6035_v62 }
 0x1fa   : > { %v1317_v5 = vpop.f32.mrf.mxu1 }
 0x1fb   : > { %v1318_v26 = vadd.f32 %v8634_v23, %v1317_v5 }
 0x1fd   : > { %v1375_v31 = vmax.f32 %v1318_v26, 0.0  ;;  %v7525_v26 = vld [vmem:[%s10289_s5 + $0x12c] sm:$0xf0] }
 0x1ff   : > { %v9054_v34 = vpack.c.bf16 %v1375_v31, %v1374_v29  ;;  %v6027_v29 = vor.u32 %v7525_v26, %v6026_v22  ;;  %v9123_v31 = vpop.f32.mrf.mxu3 }
 0x201   : > { %2120 = vmatmul.bf16.gmra.mxu0 %v9054_v34  ;;  %2169 = vmatpush.bf16.msra.mxu1 %v6027_v29 }
 0x203   : > { %v2096_v45 = vpop.f32.mrf.mxu0 }
 0x204   : > { %v2097_v48 = vadd.f32 %v2096_v45, %v8992_v9 }
 0x205   : > { %2011 = vmatmul.bf16.gmra.mxu3 %v8832_v36 }
 0x206   : > { %v2557_v7 = vmax.f32 %v2097_v48, 0.0 }
 0x207   : > { %1828 = vmatmul.bf16.gmra.mxu1 %v8784_v2 }
 0x208   : > { %v2893_v53 = vmax.f32 %v2892_v43, %v2557_v7  ;;  %1937 = vmatmul.bf16.gmra.mxu2 %v8971_v30  ;;  %v9127_v7 = vperm.slane %v8982_v17, 1 }
 0x20b   : > { %v2098_v56 = vpop.f32.mrf.mxu0 }
 0x20c   : > { %v2099_v58 = vadd.f32 %v2098_v56, %v8992_v9 }
 0x20e   : > { %v2565_v8 = vmax.f32 %v2099_v58, 0.0 }
 0x210   : > { %v2894_v11 = vmax.f32 %v2893_v53, %v2565_v8  ;;  %v7513_v8 = vld [vmem:[%s10289_s5 + $0xd4] sm:$0xf] }
 0x213   : > { %v2101_v49 = vpop.f32.mrf.mxu0 }
 0x214   : > { %v2102_v41 = vadd.f32 %v2101_v49, %v8992_v9  ;;  %v9131_v25 = vpop.f32.mrf.mxu3  ;;  %v5996_v49 = vld [vmem:[%s10289_s5 + $0xf0] sm:$0xf0] }
 0x215   : > { %2016 = vmatmul.bf16.gmra.mxu3 %v8882_v16 }
 0x216   : > { %v2573_v39 = vmax.f32 %v2102_v41, 0.0  ;;  %v7522_v41 = vld [vmem:[%s10289_s5 + $0x11c] sm:$0xf] }
 0x217   : > { %1833 = vmatmul.bf16.gmra.mxu1 %v8832_v36 }
 0x218   : > { %v2895_v61 = vmax.f32 %v2894_v11, %v2573_v39  ;;  %1942 = vmatmul.bf16.gmra.mxu2 %v9054_v34  ;;  %v5999_v39 = vor.u32 %v7513_v8, %v5996_v49 }
 0x21a   : > { %2259 = vmatpush.bf16.msra.mxu2 %v5999_v39 }
 0x21b   : > { %v2103_v37 = vpop.f32.mrf.mxu0  ;;  %v9098_v19 = vpop.f32.mrf.mxu2 }
 0x21c   : > { %v2104_v21 = vadd.f32 %v2103_v37, %v8992_v9 }
 0x21e   : > { %v2581_v47 = vmax.f32 %v2104_v21, 0.0 }
 0x220   : > { %v2896_v33 = vmax.f32 %v2895_v61, %v2581_v47  ;;  %v6036_v61 = vld [vmem:[%s10289_s5 + $0x138] sm:$0xf0] }
 0x221   : > { %v9155_v51 = vor.u32 %v7522_v41, %v6036_v61 }
 0x223   : > { %v2106_v59 = vpop.f32.mrf.mxu0  ;;  %v9104_v1 = vpop.f32.mrf.mxu2  ;;  %2436 = vmatpush.bf16.msra.mxu0 %v9155_v51 }
 0x224   : > { %v2107_v55 = vadd.f32 %v2106_v59, %v8992_v9 }
 0x225   : > { %2021 = vmatmul.bf16.gmra.mxu3 %v8933_v40 }
 0x226   : > { %v2589_v15 = vmax.f32 %v2107_v55, 0.0 }
 0x227   : > { %1838 = vmatmul.bf16.gmra.mxu1 %v8882_v16 }
 0x228   : > { %v2897_v42 = vmax.f32 %v2896_v33, %v2589_v15 }
 0x22b   : > { %v2108_v52 = vpop.f32.mrf.mxu0  ;;  %v1908_v5 = vpop.f32.mrf.mxu2 }
 0x22c   : > { %v2109_v3 = vadd.f32 %v2108_v52, %v8992_v9  ;;  %v1909_v6 = vadd.f32 %v1908_v5, %v9127_v7 }
 0x22e   : > { %v2597_v45 = vmax.f32 %v2109_v3, 0.0  ;;  %v2523_v21 = vmax.f32 %v1909_v6, 0.0 }
 0x230   : > { %v1320_v4 = vpop.f32.mrf.mxu1  ;;  %v2898_v44 = vmax.f32 %v2897_v42, %v2597_v45  ;;  %v9164_v42 = vpop.f32.mrf.mxu3  ;;  %v6002_v45 = vld [vmem:[%s10289_s5 + $0xd8] sm:$0xf] }
 0x231   : > { %v1321_v57 = vadd.f32 %v8634_v23, %v1320_v4  ;;  %v9149_v23 = vld [vmem:[%s10288_s4] ss:$0 sm:$0xff] }
 0x233   : > { %v2111_v48 = vpop.f32.mrf.mxu0  ;;  %v1910_v43 = vpop.f32.mrf.mxu2  ;;  %v1376_v12 = vmax.f32 %v1321_v57, 0.0  ;;  %v7517_v57 = vld [vmem:[%s10289_s5 + $0xec] sm:$0xf0] }
 0x234   : > { %v2112_v53 = vadd.f32 %v2111_v48, %v8992_v9  ;;  %v1911_v54 = vadd.f32 %v1910_v43, %v9127_v7  ;;  %v7518_v48 = vld [vmem:[%s10289_s5 + $0xf4] sm:$0xf0] }
 0x235   : > { %2026 = vmatmul.bf16.gmra.mxu3 %v8971_v30  ;;  %v6003_v43 = vor.u32 %v7518_v48, %v6002_v45 }
 0x236   : > { %v2605_v63 = vmax.f32 %v2112_v53, 0.0  ;;  %v2531_v18 = vmax.f32 %v1911_v54, 0.0  ;;  %v5994_v54 = vld [vmem:[%s10289_s5 + $0xd0] sm:$0xf] }
 0x237   : > { %1843 = vmatmul.bf16.gmra.mxu1 %v8933_v40  ;;  %2348 = vmatpush.bf16.msra.mxu3 %v6003_v43 }
 0x238   : > { %v2899_v56 = vmax.f32 %v2898_v44, %v2605_v63  ;;  %v1322_v58 = vpop.f32.mrf.mxu1  ;;  %v2816_v55 = vmax.f32 %v2523_v21, %v2531_v18  ;;  %v7505_v21 = vld [vmem:[%s10289_s5 + $0x94] sm:$0xf] }
 0x239   : > { %v1323_v11 = vadd.f32 %v9149_v23, %v1322_v58  ;;  %v5995_v58 = vor.u32 %v7517_v57, %v5994_v54 }
 0x23b   : > { %v1377_v0 = vmax.f32 %v1323_v11, 0.0  ;;  %v2113_v13 = vpop.f32.mrf.mxu0  ;;  %v1913_v37 = vpop.f32.mrf.mxu2  ;;  %2170 = vmatpush.bf16.msra.mxu1 %v5995_v58 }
 0x23c   : > { %v1914_v47 = vadd.f32 %v1913_v37, %v9127_v7  ;;  %v2114_v33 = vadd.f32 %v2113_v13, %v8992_v9 }
 0x23d   : > { %v9159_v59 = vpack.c.bf16 %v1377_v0, %v1376_v12 }
 0x23e   : > { %v2539_v15 = vmax.f32 %v1914_v47, 0.0  ;;  %v2613_v28 = vmax.f32 %v2114_v33, 0.0  ;;  %v5964_v47 = vld [vmem:[%s10289_s5 + $0xb0] sm:$0xf0]  ;;  %v7514_v33 = vld [vmem:[%s10289_s5 + $0xdc] sm:$0xf] }
 0x23f   : > { %1947 = vmatmul.bf16.gmra.mxu2 %v9159_v59  ;;  %2125 = vmatmul.bf16.gmra.mxu0 %v9159_v59 }
 0x240   : > { %v2817_v27 = vmax.f32 %v2816_v55, %v2539_v15  ;;  %v2900_v22 = vmax.f32 %v2899_v56, %v2613_v28  ;;  %v5967_v55 = vor.u32 %v7505_v21, %v5964_v47  ;;  %v6004_v15 = vld [vmem:[%s10289_s5 + $0xf8] sm:$0xf0] }
 0x241   : > { %v9204_v28 = vor.u32 %v7514_v33, %v6004_v15 }
 0x242   : > { %2260 = vmatpush.bf16.msra.mxu2 %v5967_v55 }
 0x243   : > { %v2116_v62 = vpop.f32.mrf.mxu0  ;;  %v1915_v52 = vpop.f32.mrf.mxu2  ;;  %2437 = vmatpush.bf16.msra.mxu0 %v9204_v28 }
 0x244   : > { %v2117_v5 = vadd.f32 %v2116_v62, %v8992_v9  ;;  %v1916_v29 = vadd.f32 %v1915_v52, %v9127_v7  ;;  %v9208_v52 = vperm.slane %v8982_v17, 2 }
 0x245   : > { %2031 = vmatmul.bf16.gmra.mxu3 %v9054_v34 }
 0x246   : > { %v2621_v26 = vmax.f32 %v2117_v5, 0.0  ;;  %v2547_v53 = vmax.f32 %v1916_v29, 0.0 }
 0x247   : > { %1848 = vmatmul.bf16.gmra.mxu1 %v8971_v30 }
 0x248   : > { %v9170_v3 = vmax.f32 %v2900_v22, %v2621_v26  ;;  %v1355_v4 = vpop.f32.mrf.mxu3  ;;  %v2818_v6 = vmax.f32 %v2817_v27, %v2547_v53 }
 0x249   : > { %v1356_v8 = vadd.f32 %v9149_v23, %v1355_v4 }
 0x24b   : > { %v1918_v44 = vpop.f32.mrf.mxu2  ;;  %v1390_v39 = vmax.f32 %v1356_v8, 0.0 }
 0x24c   : > { %v1919_v63 = vadd.f32 %v1918_v44, %v9127_v7 }
 0x24e   : > { %v2555_v56 = vmax.f32 %v1919_v63, 0.0 }
 0x250   : > { %v2819_v49 = vmax.f32 %v2818_v6, %v2555_v56  ;;  %v1357_v41 = vpop.f32.mrf.mxu3 }
 0x251   : > { %v1358_v11 = vadd.f32 %v9149_v23, %v1357_v41 }
 0x253   : > { %v1391_v61 = vmax.f32 %v1358_v11, 0.0  ;;  %v1920_v18 = vpop.f32.mrf.mxu2  ;;  %v9222_v11 = vperm.slane %v8982_v17, 0  ;;  %v1331_v17 = vadd.f32 %v9149_v23, %v9070_v38  ;;  %v7509_v38 = vld [vmem:[%s10289_s5 + $0xac] sm:$0xf0] }
 0x254   : > { %v1325_v12 = vpop.f32.mrf.mxu1  ;;  %v1921_v13 = vadd.f32 %v1920_v18, %v9127_v7  ;;  %v7510_v18 = vld [vmem:[%s10289_s5 + $0xb4] sm:$0xf0] }
 0x255   : > { %v9187_v0 = vpack.c.bf16 %v1391_v61, %v1390_v39  ;;  %2036 = vmatmul.bf16.gmra.mxu3 %v9159_v59  ;;  %v1326_v62 = vadd.f32 %v9149_v23, %v1325_v12  ;;  %v5970_v61 = vld [vmem:[%s10289_s5 + $0x98] sm:$0xf]  ;;  %v1333_v12 = vadd.f32 %v9149_v23, %v9078_v60  ;;  %v5962_v60 = vld [vmem:[%s10289_s5 + $0x90] sm:$0xf] }
 0x256   : > { %v2563_v27 = vmax.f32 %v1921_v13, 0.0 }
 0x257   : > { %1853 = vmatmul.bf16.gmra.mxu1 %v9054_v34  ;;  %v1378_v48 = vmax.f32 %v1326_v62, 0.0  ;;  %v1381_v62 = vmax.f32 %v1333_v12, 0.0  ;;  %v1338_v12 = vadd.f32 %v9149_v23, %v9104_v1  ;;  %v5972_v1 = vld [vmem:[%s10289_s5 + $0xb8] sm:$0xf0] }
 0x258   : > { %v1997_v37 = vpop.f32.mrf.mxu3  ;;  %v2820_v4 = vmax.f32 %v2819_v49, %v2563_v27 }
 0x259   : > { %v1998_v43 = vadd.f32 %v1997_v37, %v9208_v52  ;;  %v5971_v37 = vor.u32 %v7510_v18, %v5970_v61 }
 0x25b   : > { %v1923_v5 = vpop.f32.mrf.mxu2  ;;  %v2524_v6 = vmax.f32 %v1998_v43, 0.0  ;;  %2349 = vmatpush.bf16.msra.mxu3 %v5971_v37  ;;  %v7497_v37 = vld [vmem:[%s10289_s5 + $0x54] sm:$0xf] }
 0x25c   : > { %v1924_v22 = vadd.f32 %v1923_v5, %v9127_v7  ;;  %v1327_v26 = vpop.f32.mrf.mxu1 }
 0x25d   : > { %v1328_v29 = vadd.f32 %v9149_v23, %v1327_v26 }
 0x25e   : > { %v2571_v45 = vmax.f32 %v1924_v22, 0.0 }
 0x25f   : > { %v1379_v53 = vmax.f32 %v1328_v29, 0.0 }
 0x260   : > { %v2821_v44 = vmax.f32 %v2820_v4, %v2571_v45  ;;  %v1999_v63 = vpop.f32.mrf.mxu3  ;;  %v5963_v4 = vor.u32 %v7509_v38, %v5962_v60  ;;  %v1380_v45 = vmax.f32 %v1331_v17, 0.0  ;;  %v1383_v38 = vmax.f32 %v1338_v12, 0.0 }
 0x261   : > { %v9214_v54 = vpack.c.bf16 %v1379_v53, %v1378_v48  ;;  %v2000_v57 = vadd.f32 %v1999_v63, %v9208_v52 }
 0x262   : > { %2171 = vmatpush.bf16.msra.mxu1 %v5963_v4 }
 0x263   : > { %v2532_v56 = vmax.f32 %v2000_v57, 0.0  ;;  %v1925_v58 = vpop.f32.mrf.mxu2  ;;  %1952 = vmatmul.bf16.gmra.mxu2 %v9214_v54  ;;  %2130 = vmatmul.bf16.gmra.mxu0 %v9214_v54  ;;  %v9245_v57 = vpack.c.bf16 %v1381_v62, %v1380_v45 }
 0x264   : > { %v1819_v8 = vpop.f32.mrf.mxu1  ;;  %v1926_v41 = vadd.f32 %v1925_v58, %v9127_v7 }
 0x265   : > { %v2853_v49 = vmax.f32 %v2524_v6, %v2532_v56  ;;  %2041 = vmatmul.bf16.gmra.mxu3 %v9214_v54  ;;  %v1820_v47 = vadd.f32 %v1819_v8, %v9222_v11 }
 0x266   : > { %v2579_v21 = vmax.f32 %v1926_v41, 0.0 }
 0x267   : > { %1858 = vmatmul.bf16.gmra.mxu1 %v9159_v59  ;;  %v2522_v48 = vmax.f32 %v1820_v47, 0.0 }
 0x268   : > { %v2002_v39 = vpop.f32.mrf.mxu3  ;;  %v2822_v26 = vmax.f32 %v2821_v44, %v2579_v21  ;;  %v5932_v21 = vld [vmem:[%s10289_s5 + $0x70] sm:$0xf0] }
 0x269   : > { %v2003_v13 = vadd.f32 %v2002_v39, %v9208_v52  ;;  %v2118_v39 = vpop.f32.mrf.mxu0 }
 0x26a   : > { %v2119_v17 = vadd.f32 %v2118_v39, %v8992_v9 }
 0x26b   : > { %v2540_v55 = vmax.f32 %v2003_v13, 0.0  ;;  %v1928_v33 = vpop.f32.mrf.mxu2 }
 0x26c   : > { %v1929_v15 = vadd.f32 %v1928_v33, %v9127_v7  ;;  %v1821_v27 = vpop.f32.mrf.mxu1  ;;  %v5935_v33 = vor.u32 %v7497_v37, %v5932_v21  ;;  %v2629_v4 = vmax.f32 %v2119_v17, 0.0 }
 0x26d   : > { %v2854_v5 = vmax.f32 %v2853_v49, %v2540_v55  ;;  %v1822_v22 = vadd.f32 %v1821_v27, %v9222_v11  ;;  %v1336_v27 = vadd.f32 %v9149_v23, %v9098_v19 }
 0x26e   : > { %v2587_v29 = vmax.f32 %v1929_v15, 0.0  ;;  %v7506_v15 = vld [vmem:[%s10289_s5 + $0x9c] sm:$0xf]  ;;  %2261 = vmatpush.bf16.msra.mxu2 %v5935_v33  ;;  %v2902_v39 = vmax.f32 %v9170_v3, %v2629_v4  ;;  %v5938_v33 = vld [vmem:[%s10289_s5 + $0x58] sm:$0xf] }
 0x26f   : > { %v2530_v43 = vmax.f32 %v1822_v22, 0.0 }
 0x270   : > { %v2823_v53 = vmax.f32 %v2822_v26, %v2587_v29  ;;  %v2004_v63 = vpop.f32.mrf.mxu3 }
 0x271   : > { %v2779_v6 = vmax.f32 %v2522_v48, %v2530_v43  ;;  %v2005_v56 = vadd.f32 %v2004_v63, %v9208_v52  ;;  %v1382_v43 = vmax.f32 %v1336_v27, 0.0 }
 0x273   : > { %v2548_v58 = vmax.f32 %v2005_v56, 0.0  ;;  %v1930_v8 = vpop.f32.mrf.mxu2  ;;  %1957 = vmatmul.bf16.gmra.mxu2 %v9245_v57  ;;  %2135 = vmatmul.bf16.gmra.mxu0 %v9245_v57 }
 0x274   : > { %v1824_v44 = vpop.f32.mrf.mxu1  ;;  %v1931_v61 = vadd.f32 %v1930_v8, %v9127_v7  ;;  %v9278_v8 = vpack.c.bf16 %v1383_v38, %v1382_v43  ;;  %v1341_v38 = vadd.f32 %v9149_v23, %v9076_v10 }
 0x275   : > { %v2855_v49 = vmax.f32 %v2854_v5, %v2548_v58  ;;  %v1825_v41 = vadd.f32 %v1824_v44, %v9222_v11  ;;  %2046 = vmatmul.bf16.gmra.mxu3 %v9245_v57  ;;  %v9272_v5 = vor.u32 %v7506_v15, %v5972_v1  ;;  %v7502_v15 = vld [vmem:[%s10289_s5 + $0x74] sm:$0xf0]  ;;  %v1343_v1 = vadd.f32 %v9149_v23, %v9100_v46  ;;  %v5930_v46 = vld [vmem:[%s10289_s5 + $0x50] sm:$0xf] }
 0x276   : > { %v2595_v62 = vmax.f32 %v1931_v61, 0.0 }
 0x277   : > { %v2538_v18 = vmax.f32 %v1825_v41, 0.0  ;;  %1863 = vmatmul.bf16.gmra.mxu1 %v9214_v54  ;;  %2438 = vmatpush.bf16.msra.mxu0 %v9272_v5 }
 0x278   : > { %v2007_v13 = vpop.f32.mrf.mxu3  ;;  %v2824_v63 = vmax.f32 %v2823_v53, %v2595_v62 }
 0x279   : > { %v2780_v47 = vmax.f32 %v2779_v6, %v2538_v18  ;;  %v2008_v55 = vadd.f32 %v2007_v13, %v9208_v52 }
 0x27b   : > { %v2556_v22 = vmax.f32 %v2008_v55, 0.0  ;;  %v1933_v60 = vpop.f32.mrf.mxu2 }
 0x27c   : > { %v1934_v26 = vadd.f32 %v1933_v60, %v9127_v7  ;;  %v1826_v29 = vpop.f32.mrf.mxu1 }
 0x27d   : > { %v2856_v45 = vmax.f32 %v2855_v49, %v2556_v22  ;;  %v1827_v48 = vadd.f32 %v1826_v29, %v9222_v11  ;;  %v5939_v22 = vor.u32 %v7502_v15, %v5938_v33 }
 0x27e   : > { %v2603_v6 = vmax.f32 %v1934_v26, 0.0  ;;  %v2121_v19 = vpop.f32.mrf.mxu0 }
 0x27f   : > { %v2546_v56 = vmax.f32 %v1827_v48, 0.0  ;;  %v2122_v58 = vadd.f32 %v2121_v19, %v8992_v9  ;;  %2350 = vmatpush.bf16.msra.mxu3 %v5939_v22  ;;  %v1385_v48 = vmax.f32 %v1343_v1, 0.0 }
 0x280   : > { %v2825_v44 = vmax.f32 %v2824_v63, %v2603_v6  ;;  %v2009_v41 = vpop.f32.mrf.mxu3  ;;  %v7501_v6 = vld [vmem:[%s10289_s5 + $0x6c] sm:$0xf0] }
 0x281   : > { %v2781_v61 = vmax.f32 %v2780_v47, %v2546_v56  ;;  %v2637_v18 = vmax.f32 %v2122_v58, 0.0  ;;  %v2010_v12 = vadd.f32 %v2009_v41, %v9208_v52  ;;  %v5931_v56 = vor.u32 %v7501_v6, %v5930_v46 }
 0x282   : > { %v1384_v58 = vmax.f32 %v1341_v38, 0.0  ;;  %v5940_v38 = vld [vmem:[%s10289_s5 + $0x78] sm:$0xf0] }
 0x283   : > { %v9282_v49 = vmax.f32 %v2902_v39, %v2637_v18  ;;  %v2564_v13 = vmax.f32 %v2010_v12, 0.0  ;;  %v1935_v37 = vpop.f32.mrf.mxu2  ;;  %1962 = vmatmul.bf16.gmra.mxu2 %v9278_v8  ;;  %2140 = vmatmul.bf16.gmra.mxu0 %v9278_v8 }
 0x284   : > { %v1829_v53 = vpop.f32.mrf.mxu1  ;;  %v1936_v3 = vadd.f32 %v1935_v37, %v9127_v7  ;;  %2172 = vmatpush.bf16.msra.mxu1 %v5931_v56  ;;  %v9309_v18 = vpack.c.bf16 %v1385_v48, %v1384_v58 }
 0x285   : > { %v2857_v21 = vmax.f32 %v2856_v45, %v2564_v13  ;;  %v1830_v17 = vadd.f32 %v1829_v53, %v9222_v11  ;;  %2051 = vmatmul.bf16.gmra.mxu3 %v9278_v8 }
 0x286   : > { %v2611_v60 = vmax.f32 %v1936_v3, 0.0  ;;  %v7489_v3 = vld [vmem:[%s10289_s5 + $0x14] sm:$0xf] }
 0x287   : > { %v2554_v47 = vmax.f32 %v1830_v17, 0.0  ;;  %1868 = vmatmul.bf16.gmra.mxu1 %v9245_v57 }
 0x288   : > { %v2012_v55 = vpop.f32.mrf.mxu3  ;;  %v2826_v19 = vmax.f32 %v2825_v44, %v2611_v60  ;;  %v7498_v60 = vld [vmem:[%s10289_s5 + $0x5c] sm:$0xf] }
 0x289   : > { %v2782_v27 = vmax.f32 %v2781_v61, %v2554_v47  ;;  %v2013_v62 = vadd.f32 %v2012_v55, %v9208_v52  ;;  %v5900_v47 = vld [vmem:[%s10289_s5 + $0x30] sm:$0xf0] }
 0x28a   : > { %v5903_v33 = vor.u32 %v7489_v3, %v5900_v47  ;;  %v1353_v3 = vadd.f32 %v9149_v23, %v9164_v42  ;;  %v7493_v42 = vld [vmem:[%s10289_s5 + $0x2c] sm:$0xf0] }
 0x28b   : > { %v2572_v26 = vmax.f32 %v2013_v62, 0.0  ;;  %v1938_v29 = vpop.f32.mrf.mxu2 }
 0x28c   : > { %v1939_v4 = vadd.f32 %v1938_v29, %v9127_v7  ;;  %v1831_v45 = vpop.f32.mrf.mxu1  ;;  %2262 = vmatpush.bf16.msra.mxu2 %v5903_v33  ;;  %v5943_v29 = vor.u32 %v7498_v60, %v5940_v38 }
 0x28d   : > { %v2858_v43 = vmax.f32 %v2857_v21, %v2572_v26  ;;  %v1832_v63 = vadd.f32 %v1831_v45, %v9222_v11 }
 0x28e   : > { %v2619_v10 = vmax.f32 %v1939_v4, 0.0  ;;  %v1346_v4 = vadd.f32 %v9149_v23, %v9106_v24  ;;  %2439 = vmatpush.bf16.msra.mxu0 %v5943_v29 }
 0x28f   : > { %v2562_v41 = vmax.f32 %v1832_v63, 0.0 }
 0x290   : > { %v2827_v39 = vmax.f32 %v2826_v19, %v2619_v10  ;;  %v2014_v61 = vpop.f32.mrf.mxu3  ;;  %7899 = vmatpush.bf16.msrb.mxu2 %v9014_v20  ;;  %v1386_v20 = vmax.f32 %v1346_v4, 0.0 }
 0x291   : > { %v2783_v12 = vmax.f32 %v2782_v27, %v2562_v41  ;;  %v2015_v13 = vadd.f32 %v2014_v61, %v9208_v52  ;;  %v1348_v27 = vadd.f32 %v9149_v23, %v9123_v31 }
 0x293   : > { %v2580_v37 = vmax.f32 %v2015_v13, 0.0  ;;  %v1940_v53 = vpop.f32.mrf.mxu2  ;;  %1967 = vmatmul.bf16.gmra.mxu2 %v9309_v18  ;;  %2145 = vmatmul.bf16.gmra.mxu0 %v9309_v18  ;;  %v1387_v63 = vmax.f32 %v1348_v27, 0.0 }
 0x294   : > { %v1834_v21 = vpop.f32.mrf.mxu1  ;;  %v1941_v55 = vadd.f32 %v1940_v53, %v9127_v7  ;;  %7900 = vmatpush.bf16.msrb.mxu2 %v9049_v32 }
 0x295   : > { %v2859_v44 = vmax.f32 %v2858_v43, %v2580_v37  ;;  %v1835_v17 = vadd.f32 %v1834_v21, %v9222_v11  ;;  %2056 = vmatmul.bf16.gmra.mxu3 %v9309_v18  ;;  %v9341_v24 = vpack.c.bf16 %v1387_v63, %v1386_v20  ;;  %v7494_v21 = vld [vmem:[%s10289_s5 + $0x34] sm:$0xf0] }
 0x296   : > { %v2627_v26 = vmax.f32 %v1941_v55, 0.0 }
 0x297   : > { %v2570_v15 = vmax.f32 %v1835_v17, 0.0  ;;  %1873 = vmatmul.bf16.gmra.mxu1 %v9278_v8 }
 0x298   : > { %v2017_v1 = vpop.f32.mrf.mxu3  ;;  %v2828_v19 = vmax.f32 %v2827_v39, %v2627_v26  ;;  %7901 = vmatpush.bf16.msrb.mxu2 %v9096_v14  ;;  %v5906_v14 = vld [vmem:[%s10289_s5 + $0x18] sm:$0xf] }
 0x299   : > { %v2784_v62 = vmax.f32 %v2783_v12, %v2570_v15  ;;  %v2018_v22 = vadd.f32 %v2017_v1, %v9208_v52  ;;  %v5907_v17 = vor.u32 %v7494_v21, %v5906_v14  ;;  %v1389_v1 = vmax.f32 %v1353_v3, 0.0 }
 0x29b   : > { %v2588_v45 = vmax.f32 %v2018_v22, 0.0  ;;  %v1943_v31 = vpop.f32.mrf.mxu2  ;;  %2351 = vmatpush.bf16.msra.mxu3 %v5907_v17  ;;  %v5898_v22 = vld [vmem:[%s10289_s5 + $0x10] sm:$0xf] }
 0x29c   : > { %v1944_v48 = vadd.f32 %v1943_v31, %v9127_v7  ;;  %v1836_v43 = vpop.f32.mrf.mxu1  ;;  %7902 = vmatpush.bf16.msrb.mxu2 %v9155_v51  ;;  %v1351_v51 = vadd.f32 %v9149_v23, %v9131_v25  ;;  %v7490_v25 = vld [vmem:[%s10289_s5 + $0x1c] sm:$0xf] }
 0x29d   : > { %v2860_v46 = vmax.f32 %v2859_v44, %v2588_v45  ;;  %v1837_v6 = vadd.f32 %v1836_v43, %v9222_v11  ;;  %v5908_v23 = vld [vmem:[%s10289_s5 + $0x38] sm:$0xf0]  ;;  %v2123_v43 = vpop.f32.mrf.mxu0 }
 0x29e   : > { %v2635_v10 = vmax.f32 %v1944_v48, 0.0  ;;  %v1388_v60 = vmax.f32 %v1351_v51, 0.0  ;;  %v5911_v26 = vor.u32 %v7490_v25, %v5908_v23 }
 0x29f   : > { %v2578_v56 = vmax.f32 %v1837_v6, 0.0 }
 0x2a0   : > { %v9339_v58 = vmax.f32 %v2828_v19, %v2635_v10  ;;  %v2019_v41 = vpop.f32.mrf.mxu3  ;;  %7903 = vmatpush.bf16.msrb.mxu2 %v9204_v28  ;;  %v5899_v28 = vor.u32 %v7493_v42, %v5898_v22  ;;  %v9377_v45 = vpack.c.bf16 %v1389_v1, %v1388_v60  ;;  %2440 = vmatpush.bf16.msra.mxu0 %v5911_v26 }
 0x2a1   : > { %v2785_v61 = vmax.f32 %v2784_v62, %v2578_v56  ;;  %v2020_v12 = vadd.f32 %v2019_v41, %v9208_v52  ;;  %v2124_v19 = vadd.f32 %v2123_v43, %v8992_v9 }
 0x2a2   : > { %2173 = vmatpush.bf16.msra.mxu1 %v5899_v28 }
 0x2a3   : > { %v2596_v13 = vmax.f32 %v2020_v12, 0.0  ;;  %1972 = vmatmul.bf16.gmra.mxu2 %v9341_v24  ;;  %2150 = vmatmul.bf16.gmra.mxu0 %v9341_v24  ;;  %v1945_v41 = vpop.f32.mrf.mxu2 }
 0x2a4   : > { %v1839_v32 = vpop.f32.mrf.mxu1  ;;  %7904 = vmatpush.bf16.msrb.mxu2 %v9272_v5 }
 0x2a5   : > { %v2861_v39 = vmax.f32 %v2860_v46, %v2596_v13  ;;  %v1840_v37 = vadd.f32 %v1839_v32, %v9222_v11  ;;  %2061 = vmatmul.bf16.gmra.mxu3 %v9341_v24 }
 0x2a7   : > { %v2586_v53 = vmax.f32 %v1840_v37, 0.0  ;;  %1878 = vmatmul.bf16.gmra.mxu1 %v9309_v18 }
 0x2a8   : > { %v2022_v44 = vpop.f32.mrf.mxu3  ;;  %7905 = vmatpush.bf16.msrb.mxu2 %v5943_v29 }
 0x2a9   : > { %v2786_v47 = vmax.f32 %v2785_v61, %v2586_v53  ;;  %v2023_v55 = vadd.f32 %v2022_v44, %v9208_v52  ;;  %v2645_v61 = vmax.f32 %v2124_v19, 0.0 }
 0x2ab   : > { %v2604_v33 = vmax.f32 %v2023_v55, 0.0  ;;  %v2904_v21 = vmax.f32 %v9282_v49, %v2645_v61 }
 0x2ac   : > { %v1841_v15 = vpop.f32.mrf.mxu1  ;;  %7906 = vmatpush.bf16.msrb.mxu2 %v5911_v26 }
 0x2ad   : > { %v2862_v27 = vmax.f32 %v2861_v39, %v2604_v33  ;;  %v1842_v62 = vadd.f32 %v1841_v15, %v9222_v11  ;;  %v1946_v39 = vadd.f32 %v1945_v41, %v9127_v7 }
 0x2af   : > { %v2594_v38 = vmax.f32 %v1842_v62, 0.0 }
 0x2b0   : > { %v2024_v4 = vpop.f32.mrf.mxu3 }
 0x2b1   : > { %v2787_v31 = vmax.f32 %v2786_v47, %v2594_v38  ;;  %v2025_v48 = vadd.f32 %v2024_v4, %v9208_v52  ;;  %v2643_v47 = vmax.f32 %v1946_v39, 0.0 }
 0x2b3   : > { %v2612_v5 = vmax.f32 %v2025_v48, 0.0  ;;  %1977 = vmatmul.bf16.gmra.mxu2 %v9377_v45  ;;  %2155 = vmatmul.bf16.gmra.mxu0 %v9377_v45  ;;  %v2830_v22 = vmax.f32 %v9339_v58, %v2643_v47 }
 0x2b4   : > { %v1844_v63 = vpop.f32.mrf.mxu1 }
 0x2b5   : > { %v2863_v46 = vmax.f32 %v2862_v27, %v2612_v5  ;;  %v1845_v6 = vadd.f32 %v1844_v63, %v9222_v11  ;;  %2066 = vmatmul.bf16.gmra.mxu3 %v9377_v45 }
 0x2b7   : > { %v2602_v10 = vmax.f32 %v1845_v6, 0.0  ;;  %1883 = vmatmul.bf16.gmra.mxu1 %v9341_v24 }
 0x2b8   : > { %v2027_v20 = vpop.f32.mrf.mxu3 }
 0x2b9   : > { %v2788_v29 = vmax.f32 %v2787_v31, %v2602_v10  ;;  %v2028_v56 = vadd.f32 %v2027_v20, %v9208_v52 }
 0x2bb   : > { %v2620_v12 = vmax.f32 %v2028_v56, 0.0 }
 0x2bc   : > { %v1846_v13 = vpop.f32.mrf.mxu1  ;;  %v2126_v32 = vpop.f32.mrf.mxu0 }
 0x2bd   : > { %v2864_v37 = vmax.f32 %v2863_v46, %v2620_v12  ;;  %v1847_v53 = vadd.f32 %v1846_v13, %v9222_v11  ;;  %v2127_v14 = vadd.f32 %v2126_v32, %v8992_v9 }
 0x2bf   : > { %v2610_v44 = vmax.f32 %v1847_v53, 0.0  ;;  %v2653_v17 = vmax.f32 %v2127_v14, 0.0 }
 0x2c0   : > { %v2029_v3 = vpop.f32.mrf.mxu3 }
 0x2c1   : > { %v2789_v55 = vmax.f32 %v2788_v29, %v2610_v44  ;;  %v2905_v51 = vmax.f32 %v2904_v21, %v2653_v17  ;;  %v2030_v33 = vadd.f32 %v2029_v3, %v9208_v52 }
 0x2c2   : > { %v1948_v15 = vpop.f32.mrf.mxu2 }
 0x2c3   : > { %v2628_v1 = vmax.f32 %v2030_v33, 0.0  ;;  %v1949_v27 = vadd.f32 %v1948_v15, %v9127_v7  ;;  %1982 = vmatmul.bf16.gmra.mxu2 %v9187_v0  ;;  %2160 = vmatmul.bf16.gmra.mxu0 %v9187_v0 }
 0x2c4   : > { %v1849_v62 = vpop.f32.mrf.mxu1  ;;  %v2128_v56 = vpop.f32.mrf.mxu0 }
 0x2c5   : > { %v2865_v49 = vmax.f32 %v2864_v37, %v2628_v1  ;;  %v2651_v42 = vmax.f32 %v1949_v27, 0.0  ;;  %v1850_v28 = vadd.f32 %v1849_v62, %v9222_v11  ;;  %2071 = vmatmul.bf16.gmra.mxu3 %v9187_v0  ;;  %v2129_v13 = vadd.f32 %v2128_v56, %v8992_v9 }
 0x2c7   : > { %v2831_v25 = vmax.f32 %v2830_v22, %v2651_v42  ;;  %v2618_v23 = vmax.f32 %v1850_v28, 0.0  ;;  %1888 = vmatmul.bf16.gmra.mxu1 %v9377_v45  ;;  %v2661_v21 = vmax.f32 %v2129_v13, 0.0 }
 0x2c8   : > { %v2032_v60 = vpop.f32.mrf.mxu3 }
 0x2c9   : > { %v2790_v38 = vmax.f32 %v2789_v55, %v2618_v23  ;;  %v2033_v26 = vadd.f32 %v2032_v60, %v9208_v52  ;;  %v2906_v1 = vmax.f32 %v2905_v51, %v2661_v21 }
 0x2ca   : > { %v1950_v37 = vpop.f32.mrf.mxu2 }
 0x2cb   : > { %v2636_v4 = vmax.f32 %v2033_v26, 0.0  ;;  %v1951_v17 = vadd.f32 %v1950_v37, %v9127_v7 }
 0x2cc   : > { %v1851_v31 = vpop.f32.mrf.mxu1 }
 0x2cd   : > { %v2866_v48 = vmax.f32 %v2865_v49, %v2636_v4  ;;  %v1852_v5 = vadd.f32 %v1851_v31, %v9222_v11  ;;  %v2659_v22 = vmax.f32 %v1951_v17, 0.0 }
 0x2cf   : > { %v2626_v58 = vmax.f32 %v1852_v5, 0.0  ;;  %v2832_v51 = vmax.f32 %v2831_v25, %v2659_v22 }
 0x2d0   : > { %v2034_v43 = vpop.f32.mrf.mxu3 }
 0x2d1   : > { %v2791_v63 = vmax.f32 %v2790_v38, %v2626_v58  ;;  %v2035_v46 = vadd.f32 %v2034_v43, %v9208_v52 }
 0x2d3   : > { %v2644_v6 = vmax.f32 %v2035_v46, 0.0  ;;  %2263 = vmatmul.bf16.vlgmr.msra.gmra.mxu2 %v8651_v50  ;;  %2441 = vmatmul.bf16.vlgmr.msra.gmra.mxu0 %v8651_v50 }
 0x2d4   : > { %v1854_v19 = vpop.f32.mrf.mxu1 }
 0x2d5   : > { %v2867_v10 = vmax.f32 %v2866_v48, %v2644_v6  ;;  %v1855_v20 = vadd.f32 %v1854_v19, %v9222_v11  ;;  %2352 = vmatmul.bf16.vlgmr.msra.gmra.mxu3 %v8651_v50 }
 0x2d7   : > { %v2634_v29 = vmax.f32 %v1855_v20, 0.0  ;;  %1893 = vmatmul.bf16.gmra.mxu1 %v9187_v0 }
 0x2d8   : > { %v2037_v41 = vpop.f32.mrf.mxu3 }
 0x2d9   : > { %v2792_v61 = vmax.f32 %v2791_v63, %v2634_v29  ;;  %v2038_v12 = vadd.f32 %v2037_v41, %v9208_v52 }
 0x2db   : > { %v2652_v32 = vmax.f32 %v2038_v12, 0.0 }
 0x2dc   : > { %v1856_v39 = vpop.f32.mrf.mxu1 }
 0x2dd   : > { %v2868_v53 = vmax.f32 %v2867_v10, %v2652_v32  ;;  %v1857_v14 = vadd.f32 %v1856_v39, %v9222_v11 }
 0x2df   : > { %v2642_v44 = vmax.f32 %v1857_v14, 0.0 }
 0x2e0   : > { %v2039_v3 = vpop.f32.mrf.mxu3  ;;  %v2131_v47 = vpop.f32.mrf.mxu0 }
 0x2e1   : > { %v2793_v55 = vmax.f32 %v2792_v61, %v2642_v44  ;;  %v2040_v33 = vadd.f32 %v2039_v3, %v9208_v52  ;;  %v2132_v15 = vadd.f32 %v2131_v47, %v8992_v9 }
 0x2e3   : > { %v2660_v27 = vmax.f32 %v2040_v33, 0.0  ;;  %v2669_v62 = vmax.f32 %v2132_v15, 0.0  ;;  %2268 = vmatmul.bf16.gmra.mxu2 %v8698_v35  ;;  %2446 = vmatmul.bf16.gmra.mxu0 %v8698_v35 }
 0x2e4   : > { %v1859_v49 = vpop.f32.mrf.mxu1 }
 0x2e5   : > { %v2869_v42 = vmax.f32 %v2868_v53, %v2660_v27  ;;  %v2907_v28 = vmax.f32 %v2906_v1, %v2669_v62  ;;  %v1860_v23 = vadd.f32 %v1859_v49, %v9222_v11  ;;  %2357 = vmatmul.bf16.gmra.mxu3 %v8698_v35 }
 0x2e6   : > { %v1953_v60 = vpop.f32.mrf.mxu2 }
 0x2e7   : > { %v2650_v38 = vmax.f32 %v1860_v23, 0.0  ;;  %v1954_v26 = vadd.f32 %v1953_v60, %v9127_v7  ;;  %2174 = vmatmul.bf16.vlgmr.msra.gmra.mxu1 %v8651_v50 }
 0x2e8   : > { %v2042_v4 = vpop.f32.mrf.mxu3  ;;  %v2133_v31 = vpop.f32.mrf.mxu0 }
 0x2e9   : > { %v2794_v48 = vmax.f32 %v2793_v55, %v2650_v38  ;;  %v2667_v5 = vmax.f32 %v1954_v26, 0.0  ;;  %v2043_v58 = vadd.f32 %v2042_v4, %v9208_v52  ;;  %v2134_v43 = vadd.f32 %v2133_v31, %v8992_v9 }
 0x2eb   : > { %v2833_v63 = vmax.f32 %v2832_v51, %v2667_v5  ;;  %v2668_v46 = vmax.f32 %v2043_v58, 0.0  ;;  %v2677_v6 = vmax.f32 %v2134_v43, 0.0 }
 0x2ec   : > { %v1861_v19 = vpop.f32.mrf.mxu1 }
 0x2ed   : > { %v2870_v10 = vmax.f32 %v2869_v42, %v2668_v46  ;;  %v2908_v20 = vmax.f32 %v2907_v28, %v2677_v6  ;;  %v1862_v29 = vadd.f32 %v1861_v19, %v9222_v11 }
 0x2ee   : > { %v1955_v56 = vpop.f32.mrf.mxu2 }
 0x2ef   : > { %v2658_v41 = vmax.f32 %v1862_v29, 0.0  ;;  %v1956_v50 = vadd.f32 %v1955_v56, %v9127_v7 }
 0x2f0   : > { %v2044_v25 = vpop.f32.mrf.mxu3  ;;  %v2136_v61 = vpop.f32.mrf.mxu0 }
 0x2f1   : > { %v2795_v12 = vmax.f32 %v2794_v48, %v2658_v41  ;;  %v2675_v13 = vmax.f32 %v1956_v50, 0.0  ;;  %v2045_v32 = vadd.f32 %v2044_v25, %v9208_v52  ;;  %v2137_v39 = vadd.f32 %v2136_v61, %v8992_v9 }
 0x2f3   : > { %v2834_v37 = vmax.f32 %v2833_v63, %v2675_v13  ;;  %v2676_v53 = vmax.f32 %v2045_v32, 0.0  ;;  %v2685_v14 = vmax.f32 %v2137_v39, 0.0  ;;  %2273 = vmatmul.bf16.gmra.mxu2 %v8784_v2  ;;  %2451 = vmatmul.bf16.gmra.mxu0 %v8784_v2 }
 0x2f4   : > { %v1864_v21 = vpop.f32.mrf.mxu1 }
 0x2f5   : > { %v2871_v44 = vmax.f32 %v2870_v10, %v2676_v53  ;;  %v2909_v17 = vmax.f32 %v2908_v20, %v2685_v14  ;;  %v1865_v3 = vadd.f32 %v1864_v21, %v9222_v11  ;;  %2362 = vmatmul.bf16.gmra.mxu3 %v8784_v2 }
 0x2f6   : > { %v1958_v47 = vpop.f32.mrf.mxu2 }
 0x2f7   : > { %v2666_v55 = vmax.f32 %v1865_v3, 0.0  ;;  %v1959_v33 = vadd.f32 %v1958_v47, %v9127_v7  ;;  %2179 = vmatmul.bf16.gmra.mxu1 %v8698_v35 }
 0x2f8   : > { %v2047_v15 = vpop.f32.mrf.mxu3  ;;  %v2138_v1 = vpop.f32.mrf.mxu0 }
 0x2f9   : > { %v2796_v27 = vmax.f32 %v2795_v12, %v2666_v55  ;;  %v2683_v62 = vmax.f32 %v1959_v33, 0.0  ;;  %v2048_v22 = vadd.f32 %v2047_v15, %v9208_v52  ;;  %v2139_v49 = vadd.f32 %v2138_v1, %v8992_v9 }
 0x2fb   : > { %v2835_v42 = vmax.f32 %v2834_v37, %v2683_v62  ;;  %v2684_v28 = vmax.f32 %v2048_v22, 0.0  ;;  %v2693_v23 = vmax.f32 %v2139_v49, 0.0 }
 0x2fc   : > { %v1866_v60 = vpop.f32.mrf.mxu1 }
 0x2fd   : > { %v2872_v38 = vmax.f32 %v2871_v44, %v2684_v28  ;;  %v2910_v26 = vmax.f32 %v2909_v17, %v2693_v23  ;;  %v1867_v51 = vadd.f32 %v1866_v60, %v9222_v11 }
 0x2fe   : > { %v1960_v4 = vpop.f32.mrf.mxu2 }
 0x2ff   : > { %v2674_v31 = vmax.f32 %v1867_v51, 0.0  ;;  %v1961_v35 = vadd.f32 %v1960_v4, %v9127_v7 }
 0x300   : > { %v2049_v48 = vpop.f32.mrf.mxu3  ;;  %v2141_v5 = vpop.f32.mrf.mxu0 }
 0x301   : > { %v2797_v58 = vmax.f32 %v2796_v27, %v2674_v31  ;;  %v2691_v43 = vmax.f32 %v1961_v35, 0.0  ;;  %v2050_v63 = vadd.f32 %v2049_v48, %v9208_v52  ;;  %v2142_v46 = vadd.f32 %v2141_v5, %v8992_v9 }
 0x303   : > { %v2836_v6 = vmax.f32 %v2835_v42, %v2691_v43  ;;  %v2692_v19 = vmax.f32 %v2050_v63, 0.0  ;;  %v2701_v10 = vmax.f32 %v2142_v46, 0.0  ;;  %2278 = vmatmul.bf16.gmra.mxu2 %v8832_v36  ;;  %2456 = vmatmul.bf16.gmra.mxu0 %v8832_v36 }
 0x304   : > { %v1869_v20 = vpop.f32.mrf.mxu1 }
 0x305   : > { %v2873_v29 = vmax.f32 %v2872_v38, %v2692_v19  ;;  %v2911_v56 = vmax.f32 %v2910_v26, %v2701_v10  ;;  %v1870_v41 = vadd.f32 %v1869_v20, %v9222_v11  ;;  %2367 = vmatmul.bf16.gmra.mxu3 %v8832_v36 }
 0x306   : > { %v1963_v50 = vpop.f32.mrf.mxu2 }
 0x307   : > { %v2682_v25 = vmax.f32 %v1870_v41, 0.0  ;;  %v1964_v61 = vadd.f32 %v1963_v50, %v9127_v7  ;;  %2184 = vmatmul.bf16.gmra.mxu1 %v8784_v2 }
 0x308   : > { %v2052_v12 = vpop.f32.mrf.mxu3  ;;  %v2143_v13 = vpop.f32.mrf.mxu0 }
 0x309   : > { %v2798_v32 = vmax.f32 %v2797_v58, %v2682_v25  ;;  %v2699_v39 = vmax.f32 %v1964_v61, 0.0  ;;  %v2053_v37 = vadd.f32 %v2052_v12, %v9208_v52  ;;  %v2144_v53 = vadd.f32 %v2143_v13, %v8992_v9 }
 0x30b   : > { %v2837_v14 = vmax.f32 %v2836_v6, %v2699_v39  ;;  %v2700_v21 = vmax.f32 %v2053_v37, 0.0  ;;  %v2709_v44 = vmax.f32 %v2144_v53, 0.0 }
 0x30c   : > { %v1871_v17 = vpop.f32.mrf.mxu1 }
 0x30d   : > { %v2874_v3 = vmax.f32 %v2873_v29, %v2700_v21  ;;  %v2912_v47 = vmax.f32 %v2911_v56, %v2709_v44  ;;  %v1872_v55 = vadd.f32 %v1871_v17, %v9222_v11 }
 0x30e   : > { %v1965_v33 = vpop.f32.mrf.mxu2 }
 0x30f   : > { %v2690_v15 = vmax.f32 %v1872_v55, 0.0  ;;  %v1966_v2 = vadd.f32 %v1965_v33, %v9127_v7 }
 0x310   : > { %v2054_v1 = vpop.f32.mrf.mxu3  ;;  %v2146_v27 = vpop.f32.mrf.mxu0 }
 0x311   : > { %v2799_v62 = vmax.f32 %v2798_v32, %v2690_v15  ;;  %v2707_v22 = vmax.f32 %v1966_v2, 0.0  ;;  %v2055_v49 = vadd.f32 %v2054_v1, %v9208_v52  ;;  %v2147_v42 = vadd.f32 %v2146_v27, %v8992_v9 }
 0x313   : > { %v2838_v28 = vmax.f32 %v2837_v14, %v2707_v22  ;;  %v2708_v23 = vmax.f32 %v2055_v49, 0.0  ;;  %v2717_v60 = vmax.f32 %v2147_v42, 0.0  ;;  %2283 = vmatmul.bf16.gmra.mxu2 %v8882_v16  ;;  %2461 = vmatmul.bf16.gmra.mxu0 %v8882_v16 }
 0x314   : > { %v1874_v38 = vpop.f32.mrf.mxu1 }
 0x315   : > { %v2875_v26 = vmax.f32 %v2874_v3, %v2708_v23  ;;  %v2913_v51 = vmax.f32 %v2912_v47, %v2717_v60  ;;  %v1875_v4 = vadd.f32 %v1874_v38, %v9222_v11  ;;  %2372 = vmatmul.bf16.gmra.mxu3 %v8882_v16 }
 0x316   : > { %v1968_v31 = vpop.f32.mrf.mxu2 }
 0x317   : > { %v2698_v35 = vmax.f32 %v1875_v4, 0.0  ;;  %v1969_v48 = vadd.f32 %v1968_v31, %v9127_v7  ;;  %2189 = vmatmul.bf16.gmra.mxu1 %v8832_v36 }
 0x318   : > { %v2057_v5 = vpop.f32.mrf.mxu3  ;;  %v2148_v58 = vpop.f32.mrf.mxu0 }
 0x319   : > { %v2800_v43 = vmax.f32 %v2799_v62, %v2698_v35  ;;  %v2715_v63 = vmax.f32 %v1969_v48, 0.0  ;;  %v2058_v46 = vadd.f32 %v2057_v5, %v9208_v52  ;;  %v2149_v6 = vadd.f32 %v2148_v58, %v8992_v9 }
 0x31b   : > { %v2839_v19 = vmax.f32 %v2838_v28, %v2715_v63  ;;  %v2716_v10 = vmax.f32 %v2058_v46, 0.0  ;;  %v2725_v20 = vmax.f32 %v2149_v6, 0.0 }
 0x31c   : > { %v1876_v29 = vpop.f32.mrf.mxu1 }
 0x31d   : > { %v2876_v56 = vmax.f32 %v2875_v26, %v2716_v10  ;;  %v2914_v41 = vmax.f32 %v2913_v51, %v2725_v20  ;;  %v1877_v50 = vadd.f32 %v1876_v29, %v9222_v11 }
 0x31e   : > { %v1970_v25 = vpop.f32.mrf.mxu2 }
 0x31f   : > { %v2706_v61 = vmax.f32 %v1877_v50, 0.0  ;;  %v1971_v36 = vadd.f32 %v1970_v25, %v9127_v7 }
 0x320   : > { %v2059_v12 = vpop.f32.mrf.mxu3  ;;  %v2151_v13 = vpop.f32.mrf.mxu0 }
 0x321   : > { %v2801_v32 = vmax.f32 %v2800_v43, %v2706_v61  ;;  %v2723_v39 = vmax.f32 %v1971_v36, 0.0  ;;  %v2060_v37 = vadd.f32 %v2059_v12, %v9208_v52  ;;  %v2152_v53 = vadd.f32 %v2151_v13, %v8992_v9 }
 0x323   : > { %v2840_v14 = vmax.f32 %v2839_v19, %v2723_v39  ;;  %v2724_v21 = vmax.f32 %v2060_v37, 0.0  ;;  %v2733_v44 = vmax.f32 %v2152_v53, 0.0  ;;  %2288 = vmatmul.bf16.gmra.mxu2 %v8933_v40  ;;  %2466 = vmatmul.bf16.gmra.mxu0 %v8933_v40 }
 0x324   : > { %v1879_v17 = vpop.f32.mrf.mxu1 }
 0x325   : > { %v2877_v3 = vmax.f32 %v2876_v56, %v2724_v21  ;;  %v2915_v47 = vmax.f32 %v2914_v41, %v2733_v44  ;;  %v1880_v55 = vadd.f32 %v1879_v17, %v9222_v11  ;;  %2377 = vmatmul.bf16.gmra.mxu3 %v8933_v40 }
 0x326   : > { %v1973_v33 = vpop.f32.mrf.mxu2 }
 0x327   : > { %v2714_v15 = vmax.f32 %v1880_v55, 0.0  ;;  %v1974_v2 = vadd.f32 %v1973_v33, %v9127_v7  ;;  %2194 = vmatmul.bf16.gmra.mxu1 %v8882_v16 }
 0x328   : > { %v2062_v1 = vpop.f32.mrf.mxu3  ;;  %v2153_v27 = vpop.f32.mrf.mxu0 }
 0x329   : > { %v2802_v62 = vmax.f32 %v2801_v32, %v2714_v15  ;;  %v2731_v22 = vmax.f32 %v1974_v2, 0.0  ;;  %v2063_v49 = vadd.f32 %v2062_v1, %v9208_v52  ;;  %v2154_v42 = vadd.f32 %v2153_v27, %v8992_v9 }
 0x32b   : > { %v2841_v28 = vmax.f32 %v2840_v14, %v2731_v22  ;;  %v2732_v23 = vmax.f32 %v2063_v49, 0.0  ;;  %v2741_v60 = vmax.f32 %v2154_v42, 0.0 }
 0x32c   : > { %v1881_v38 = vpop.f32.mrf.mxu1 }
 0x32d   : > { %v2878_v26 = vmax.f32 %v2877_v3, %v2732_v23  ;;  %v2916_v51 = vmax.f32 %v2915_v47, %v2741_v60  ;;  %v1882_v4 = vadd.f32 %v1881_v38, %v9222_v11 }
 0x32e   : > { %v1975_v31 = vpop.f32.mrf.mxu2 }
 0x32f   : > { %v2722_v35 = vmax.f32 %v1882_v4, 0.0  ;;  %v1976_v16 = vadd.f32 %v1975_v31, %v9127_v7 }
 0x330   : > { %v2064_v48 = vpop.f32.mrf.mxu3  ;;  %v2156_v5 = vpop.f32.mrf.mxu0 }
 0x331   : > { %v2803_v58 = vmax.f32 %v2802_v62, %v2722_v35  ;;  %v2739_v43 = vmax.f32 %v1976_v16, 0.0  ;;  %v2065_v63 = vadd.f32 %v2064_v48, %v9208_v52  ;;  %v2157_v46 = vadd.f32 %v2156_v5, %v8992_v9 }
 0x333   : > { %v2842_v6 = vmax.f32 %v2841_v28, %v2739_v43  ;;  %v2740_v19 = vmax.f32 %v2065_v63, 0.0  ;;  %v2749_v10 = vmax.f32 %v2157_v46, 0.0  ;;  %2293 = vmatmul.bf16.gmra.mxu2 %v8971_v30  ;;  %2471 = vmatmul.bf16.gmra.mxu0 %v8971_v30 }
 0x334   : > { %v1884_v20 = vpop.f32.mrf.mxu1 }
 0x335   : > { %v2879_v29 = vmax.f32 %v2878_v26, %v2740_v19  ;;  %v2917_v56 = vmax.f32 %v2916_v51, %v2749_v10  ;;  %v1885_v41 = vadd.f32 %v1884_v20, %v9222_v11  ;;  %2382 = vmatmul.bf16.gmra.mxu3 %v8971_v30 }
 0x336   : > { %v1978_v50 = vpop.f32.mrf.mxu2 }
 0x337   : > { %v2730_v25 = vmax.f32 %v1885_v41, 0.0  ;;  %v1979_v61 = vadd.f32 %v1978_v50, %v9127_v7  ;;  %2199 = vmatmul.bf16.gmra.mxu1 %v8933_v40 }
 0x338   : > { %v2067_v36 = vpop.f32.mrf.mxu3  ;;  %v2158_v12 = vpop.f32.mrf.mxu0 }
 0x339   : > { %v2804_v13 = vmax.f32 %v2803_v58, %v2730_v25  ;;  %v2747_v32 = vmax.f32 %v1979_v61, 0.0  ;;  %v2068_v39 = vadd.f32 %v2067_v36, %v9208_v52  ;;  %v2159_v37 = vadd.f32 %v2158_v12, %v8992_v9 }
 0x33b   : > { %v2843_v53 = vmax.f32 %v2842_v6, %v2747_v32  ;;  %v2748_v14 = vmax.f32 %v2068_v39, 0.0  ;;  %v2757_v21 = vmax.f32 %v2159_v37, 0.0 }
 0x33c   : > { %v1886_v44 = vpop.f32.mrf.mxu1 }
 0x33d   : > { %v2880_v17 = vmax.f32 %v2879_v29, %v2748_v14  ;;  %v2918_v3 = vmax.f32 %v2917_v56, %v2757_v21  ;;  %v1887_v47 = vadd.f32 %v1886_v44, %v9222_v11 }
 0x33e   : > { %v1980_v55 = vpop.f32.mrf.mxu2 }
 0x33f   : > { %v2738_v33 = vmax.f32 %v1887_v47, 0.0  ;;  %v1981_v40 = vadd.f32 %v1980_v55, %v9127_v7 }
 0x340   : > { %v2069_v15 = vpop.f32.mrf.mxu3  ;;  %v2161_v2 = vpop.f32.mrf.mxu0 }
 0x341   : > { %v2805_v1 = vmax.f32 %v2804_v13, %v2738_v33  ;;  %v2755_v27 = vmax.f32 %v1981_v40, 0.0  ;;  %v2070_v62 = vadd.f32 %v2069_v15, %v9208_v52  ;;  %v2162_v22 = vadd.f32 %v2161_v2, %v8992_v9 }
 0x343   : > { %v2844_v49 = vmax.f32 %v2843_v53, %v2755_v27  ;;  %v2756_v42 = vmax.f32 %v2070_v62, 0.0  ;;  %v2765_v28 = vmax.f32 %v2162_v22, 0.0  ;;  %2298 = vmatmul.bf16.gmra.mxu2 %v9054_v34  ;;  %2476 = vmatmul.bf16.gmra.mxu0 %v9054_v34  ;;  %v9501_v53 = vld [vmem:[%s10290_s6] sm:$0xff] }
 0x344   : > { %v1889_v23 = vpop.f32.mrf.mxu1  ;;  %v9511_v62 = vperm.slane %v9501_v53, 5 }
 0x345   : > { %v2881_v60 = vmax.f32 %v2880_v17, %v2756_v42  ;;  %v2919_v38 = vmax.f32 %v2918_v3, %v2765_v28  ;;  %v1890_v26 = vadd.f32 %v1889_v23, %v9222_v11  ;;  %2387 = vmatmul.bf16.gmra.mxu3 %v9054_v34 }
 0x346   : > { %v1983_v51 = vpop.f32.mrf.mxu2 }
 0x347   : > { %v2746_v4 = vmax.f32 %v1890_v26, 0.0  ;;  %v1984_v31 = vadd.f32 %v1983_v51, %v9127_v7  ;;  %2204 = vmatmul.bf16.gmra.mxu1 %v8971_v30 }
 0x348   : > { %v2072_v35 = vpop.f32.mrf.mxu3  ;;  %v2163_v16 = vpop.f32.mrf.mxu0 }
 0x349   : > { %v2806_v48 = vmax.f32 %v2805_v1, %v2746_v4  ;;  %v2763_v5 = vmax.f32 %v1984_v31, 0.0  ;;  %v2073_v58 = vadd.f32 %v2072_v35, %v9208_v52  ;;  %v2164_v43 = vadd.f32 %v2163_v16, %v8992_v9 }
 0x34b   : > { %v2845_v63 = vmax.f32 %v2844_v49, %v2763_v5  ;;  %v2764_v46 = vmax.f32 %v2073_v58, 0.0  ;;  %v2773_v6 = vmax.f32 %v2164_v43, 0.0 }
 0x34c   : > { %v1891_v19 = vpop.f32.mrf.mxu1 }
 0x34d   : > { %v2882_v10 = vmax.f32 %v2881_v60, %v2764_v46  ;;  %v2920_v20 = vmax.f32 %v2919_v38, %v2773_v6  ;;  %v1892_v29 = vadd.f32 %v1891_v19, %v9222_v11  ;;  %v9515_v60 = vperm.slane %v9501_v53, 6 }
 0x34e   : > { %v1985_v56 = vpop.f32.mrf.mxu2 }
 0x34f   : > { %v2921_v41 = vrot.slane %v2920_v20, 4  ;;  %v2754_v50 = vmax.f32 %v1892_v29, 0.0  ;;  %v1986_v30 = vadd.f32 %v1985_v56, %v9127_v7  ;;  %v9504_v7 = vperm.slane %v9501_v53, 7 }
 0x350   : > { %v2074_v25 = vpop.f32.mrf.mxu3  ;;  %v2442_v61 = vpop.f32.mrf.mxu0 }
 0x351   : > { %v2922_v36 = vmax.f32 %v2920_v20, %v2921_v41  ;;  %v2807_v12 = vmax.f32 %v2806_v48, %v2754_v50  ;;  %v2771_v13 = vmax.f32 %v1986_v30, 0.0  ;;  %v2075_v9 = vadd.f32 %v2074_v25, %v9208_v52 }
 0x352   : > { %v2443_v40 = vadd.f32 %v2442_v61, %v9504_v7 }
 0x353   : > { %v2923_v32 = vrot.slane %v2922_v36, 2  ;;  %v2846_v39 = vmax.f32 %v2845_v63, %v2771_v13  ;;  %v2772_v37 = vmax.f32 %v2075_v9, 0.0  ;;  %2303 = vmatmul.bf16.gmra.mxu2 %v9159_v59  ;;  %2481 = vmatmul.bf16.gmra.mxu0 %v9159_v59 }
 0x354   : > { %v1894_v14 = vpop.f32.mrf.mxu1  ;;  %v2529_v23 = vmax.f32 %v2443_v40, 0.0 }
 0x355   : > { %v2847_v21 = vrot.slane %v2846_v39, 4  ;;  %v2883_v44 = vmax.f32 %v2882_v10, %v2772_v37  ;;  %v1895_v52 = vadd.f32 %v1894_v14, %v9222_v11  ;;  %2392 = vmatmul.bf16.gmra.mxu3 %v9159_v59  ;;  %v2924_v3 = vmax.f32 %v2922_v36, %v2923_v32 }
 0x356   : > { %v2264_v17 = vpop.f32.mrf.mxu2 }
 0x357   : > { %v2884_v47 = vrot.slane %v2883_v44, 4  ;;  %v2762_v55 = vmax.f32 %v1895_v52, 0.0  ;;  %2209 = vmatmul.bf16.gmra.mxu1 %v9054_v34  ;;  %v2848_v33 = vmax.f32 %v2846_v39, %v2847_v21  ;;  %v2925_v49 = vrot.slane %v2924_v3, 1 }
 0x358   : > { %v2353_v15 = vpop.f32.mrf.mxu3  ;;  %v2444_v2 = vpop.f32.mrf.mxu0  ;;  %v2265_v51 = vadd.f32 %v2264_v17, %v9511_v62  ;;  %v9527_v21 = vperm.slane %v9501_v53, 4 }
 0x359   : > { %v2885_v1 = vmax.f32 %v2883_v44, %v2884_v47  ;;  %v2808_v27 = vmax.f32 %v2807_v12, %v2762_v55  ;;  %v2445_v22 = vadd.f32 %v2444_v2, %v9504_v7  ;;  %v2849_v28 = vrot.slane %v2848_v33, 2 }
 0x35a   : > { %v2926_v16 = vmax.f32 %v2924_v3, %v2925_v49  ;;  %v2354_v63 = vadd.f32 %v2353_v15, %v9515_v60  ;;  %v2527_v10 = vmax.f32 %v2265_v51, 0.0 }
 0x35b   : > { %v2886_v42 = vrot.slane %v2885_v1, 2  ;;  %v2537_v34 = vmax.f32 %v2445_v22, 0.0  ;;  %v2850_v43 = vmax.f32 %v2848_v33, %v2849_v28 }
 0x35c   : > { %v1896_v38 = vpop.f32.mrf.mxu1  ;;  %v3085_v41 = vrot.slane %v2926_v16, 5  ;;  %v2528_v36 = vmax.f32 %v2354_v63, 0.0 }
 0x35d   : > { %v2887_v26 = vmax.f32 %v2885_v1, %v2886_v42  ;;  %v1897_v4 = vadd.f32 %v1896_v38, %v9222_v11  ;;  %v3038_v31 = vmax.f32 %v2529_v23, %v2537_v34  ;;  %v2851_v61 = vrot.slane %v2850_v43, 1 }
 0x35e   : > { %v2266_v35 = vpop.f32.mrf.mxu2 }
 0x35f   : > { %v2888_v48 = vrot.slane %v2887_v26, 1  ;;  %v2770_v5 = vmax.f32 %v1897_v4, 0.0  ;;  %v2267_v58 = vadd.f32 %v2266_v35, %v9511_v62  ;;  %v2852_v3 = vmax.f32 %v2850_v43, %v2851_v61 }
 0x360   : > { %v2355_v46 = vpop.f32.mrf.mxu3  ;;  %v2447_v6 = vpop.f32.mrf.mxu0 }
 0x361   : > { %v2889_v19 = vmax.f32 %v2887_v26, %v2888_v48  ;;  %v2809_v20 = vmax.f32 %v2808_v27, %v2770_v5  ;;  %v2535_v29 = vmax.f32 %v2267_v58, 0.0  ;;  %v2356_v56 = vadd.f32 %v2355_v46, %v9515_v60 }
 0x362   : > { %v2448_v11 = vadd.f32 %v2447_v6, %v9504_v7  ;;  %v3083_v42 = vrot.slane %v2852_v3, 7 }
 0x363   : > { %v3084_v50 = vrot.slane %v2889_v19, 6  ;;  %v2810_v30 = vrot.slane %v2809_v20, 4  ;;  %v2964_v25 = vmax.f32 %v2527_v10, %v2535_v29  ;;  %2308 = vmatmul.bf16.gmra.mxu2 %v9214_v54  ;;  %2486 = vmatmul.bf16.gmra.mxu0 %v9214_v54  ;;  %v2536_v12 = vmax.f32 %v2356_v56, 0.0 }
 0x364   : > { %v2545_v13 = vmax.f32 %v2448_v11, 0.0  ;;  %v2175_v9 = vpop.f32.mrf.mxu1 }
 0x365   : > { %v3093_v32 = vsel %vm3092_vm1, %v3084_v50, %v3085_v41  ;;  %v2811_v39 = vmax.f32 %v2809_v20, %v2810_v30  ;;  %2397 = vmatmul.bf16.gmra.mxu3 %v9214_v54  ;;  %v3001_v37 = vmax.f32 %v2528_v36, %v2536_v12  ;;  %v2176_v1 = vadd.f32 %v2175_v9, %v9527_v21 }
 0x366   : > { %v3039_v14 = vmax.f32 %v3038_v31, %v2545_v13  ;;  %v2269_v44 = vpop.f32.mrf.mxu2 }
 0x367   : > { %v2812_v52 = vrot.slane %v2811_v39, 2  ;;  %v2270_v17 = vadd.f32 %v2269_v44, %v9511_v62  ;;  %2214 = vmatmul.bf16.gmra.mxu1 %v9159_v59  ;;  %v2526_v4 = vmax.f32 %v2176_v1, 0.0 }
 0x368   : > { %v2358_v47 = vpop.f32.mrf.mxu3  ;;  %v2449_v55 = vpop.f32.mrf.mxu0 }
 0x369   : > { %v2813_v33 = vmax.f32 %v2811_v39, %v2812_v52  ;;  %v2543_v40 = vmax.f32 %v2270_v17, 0.0  ;;  %v2359_v15 = vadd.f32 %v2358_v47, %v9515_v60  ;;  %v2450_v2 = vadd.f32 %v2449_v55, %v9504_v7 }
 0x36b   : > { %v2814_v27 = vrot.slane %v2813_v33, 1  ;;  %v2965_v53 = vmax.f32 %v2964_v25, %v2543_v40  ;;  %v2544_v22 = vmax.f32 %v2359_v15, 0.0  ;;  %v2553_v49 = vmax.f32 %v2450_v2, 0.0 }
 0x36c   : > { %v2177_v28 = vpop.f32.mrf.mxu1 }
 0x36d   : > { %v2815_v59 = vmax.f32 %v2813_v33, %v2814_v27  ;;  %v3002_v23 = vmax.f32 %v3001_v37, %v2544_v22  ;;  %v3040_v34 = vmax.f32 %v3039_v14, %v2553_v49  ;;  %v2178_v38 = vadd.f32 %v2177_v28, %v9527_v21 }
 0x36e   : > { %v2271_v26 = vpop.f32.mrf.mxu2 }
 0x36f   : > { %v3091_v51 = vsel %vm3090_vm2, %v2815_v59, %v3083_v42  ;;  %v2534_v31 = vmax.f32 %v2178_v38, 0.0  ;;  %v2272_v35 = vadd.f32 %v2271_v26, %v9511_v62 }
 0x370   : > { %v9536_v16 = vsel %vm3094_vm3, %v3091_v51, %v3093_v32  ;;  %v2360_v48 = vpop.f32.mrf.mxu3  ;;  %v2452_v5 = vpop.f32.mrf.mxu0 }
 0x371   : > { %v2927_v58 = vmax.f32 %v2526_v4, %v2534_v31  ;;  %v2551_v43 = vmax.f32 %v2272_v35, 0.0  ;;  %v2361_v63 = vadd.f32 %v2360_v48, %v9515_v60  ;;  %v2453_v46 = vadd.f32 %v2452_v5, %v9504_v7 }
 0x373   : > { %v2966_v6 = vmax.f32 %v2965_v53, %v2551_v43  ;;  %v2552_v19 = vmax.f32 %v2361_v63, 0.0  ;;  %v2561_v10 = vmax.f32 %v2453_v46, 0.0  ;;  %2313 = vmatmul.bf16.gmra.mxu2 %v9245_v57  ;;  %2491 = vmatmul.bf16.gmra.mxu0 %v9245_v57 }
 0x374   : > { %v2180_v20 = vpop.f32.mrf.mxu1 }
 0x375   : > { %v3003_v29 = vmax.f32 %v3002_v23, %v2552_v19  ;;  %v3041_v56 = vmax.f32 %v3040_v34, %v2561_v10  ;;  %v2181_v11 = vadd.f32 %v2180_v20, %v9527_v21  ;;  %2402 = vmatmul.bf16.gmra.mxu3 %v9245_v57 }
 0x376   : > { %v2274_v41 = vpop.f32.mrf.mxu2 }
 0x377   : > { %v2542_v50 = vmax.f32 %v2181_v11, 0.0  ;;  %v2275_v30 = vadd.f32 %v2274_v41, %v9511_v62  ;;  %2219 = vmatmul.bf16.gmra.mxu1 %v9214_v54 }
 0x378   : > { %v2363_v25 = vpop.f32.mrf.mxu3  ;;  %v2454_v61 = vpop.f32.mrf.mxu0 }
 0x379   : > { %v2928_v36 = vmax.f32 %v2927_v58, %v2542_v50  ;;  %v2559_v12 = vmax.f32 %v2275_v30, 0.0  ;;  %v2364_v13 = vadd.f32 %v2363_v25, %v9515_v60  ;;  %v2455_v9 = vadd.f32 %v2454_v61, %v9504_v7 }
 0x37b   : > { %v2967_v32 = vmax.f32 %v2966_v6, %v2559_v12  ;;  %v2560_v39 = vmax.f32 %v2364_v13, 0.0  ;;  %v2569_v37 = vmax.f32 %v2455_v9, 0.0 }
 0x37c   : > { %v2182_v14 = vpop.f32.mrf.mxu1 }
 0x37d   : > { %v3004_v44 = vmax.f32 %v3003_v29, %v2560_v39  ;;  %v3042_v52 = vmax.f32 %v3041_v56, %v2569_v37  ;;  %v2183_v17 = vadd.f32 %v2182_v14, %v9527_v21 }
 0x37e   : > { %v2276_v3 = vpop.f32.mrf.mxu2 }
 0x37f   : > { %v2550_v47 = vmax.f32 %v2183_v17, 0.0  ;;  %v2277_v54 = vadd.f32 %v2276_v3, %v9511_v62 }
 0x380   : > { %v2365_v55 = vpop.f32.mrf.mxu3  ;;  %v2457_v33 = vpop.f32.mrf.mxu0 }
 0x381   : > { %v2929_v40 = vmax.f32 %v2928_v36, %v2550_v47  ;;  %v2567_v15 = vmax.f32 %v2277_v54, 0.0  ;;  %v2366_v2 = vadd.f32 %v2365_v55, %v9515_v60  ;;  %v2458_v1 = vadd.f32 %v2457_v33, %v9504_v7 }
 0x383   : > { %v2968_v27 = vmax.f32 %v2967_v32, %v2567_v15  ;;  %v2568_v53 = vmax.f32 %v2366_v2, 0.0  ;;  %v2577_v22 = vmax.f32 %v2458_v1, 0.0  ;;  %2318 = vmatmul.bf16.gmra.mxu2 %v9278_v8  ;;  %2496 = vmatmul.bf16.gmra.mxu0 %v9278_v8 }
 0x384   : > { %v2185_v49 = vpop.f32.mrf.mxu1 }
 0x385   : > { %v3005_v42 = vmax.f32 %v3004_v44, %v2568_v53  ;;  %v3043_v28 = vmax.f32 %v3042_v52, %v2577_v22  ;;  %v2186_v59 = vadd.f32 %v2185_v49, %v9527_v21  ;;  %2407 = vmatmul.bf16.gmra.mxu3 %v9278_v8 }
 0x386   : > { %v2279_v23 = vpop.f32.mrf.mxu2 }
 0x387   : > { %v2558_v34 = vmax.f32 %v2186_v59, 0.0  ;;  %v2280_v38 = vadd.f32 %v2279_v23, %v9511_v62  ;;  %2224 = vmatmul.bf16.gmra.mxu1 %v9245_v57 }
 0x388   : > { %v2368_v26 = vpop.f32.mrf.mxu3  ;;  %v2459_v51 = vpop.f32.mrf.mxu0 }
 0x389   : > { %v2930_v4 = vmax.f32 %v2929_v40, %v2558_v34  ;;  %v2575_v31 = vmax.f32 %v2280_v38, 0.0  ;;  %v2369_v35 = vadd.f32 %v2368_v26, %v9515_v60  ;;  %v2460_v48 = vadd.f32 %v2459_v51, %v9504_v7 }
 0x38b   : > { %v2969_v5 = vmax.f32 %v2968_v27, %v2575_v31  ;;  %v2576_v58 = vmax.f32 %v2369_v35, 0.0  ;;  %v2585_v43 = vmax.f32 %v2460_v48, 0.0 }
 0x38c   : > { %v2187_v63 = vpop.f32.mrf.mxu1 }
 0x38d   : > { %v3006_v46 = vmax.f32 %v3005_v42, %v2576_v58  ;;  %v3044_v6 = vmax.f32 %v3043_v28, %v2585_v43  ;;  %v2188_v19 = vadd.f32 %v2187_v63, %v9527_v21 }
 0x38e   : > { %v2281_v10 = vpop.f32.mrf.mxu2 }
 0x38f   : > { %v2566_v20 = vmax.f32 %v2188_v19, 0.0  ;;  %v2282_v57 = vadd.f32 %v2281_v10, %v9511_v62 }
 0x390   : > { %v2370_v29 = vpop.f32.mrf.mxu3  ;;  %v2462_v56 = vpop.f32.mrf.mxu0 }
 0x391   : > { %v2931_v11 = vmax.f32 %v2930_v4, %v2566_v20  ;;  %v2583_v41 = vmax.f32 %v2282_v57, 0.0  ;;  %v2371_v50 = vadd.f32 %v2370_v29, %v9515_v60  ;;  %v2463_v30 = vadd.f32 %v2462_v56, %v9504_v7 }
 0x393   : > { %v2970_v25 = vmax.f32 %v2969_v5, %v2583_v41  ;;  %v2584_v61 = vmax.f32 %v2371_v50, 0.0  ;;  %v2593_v36 = vmax.f32 %v2463_v30, 0.0  ;;  %2323 = vmatmul.bf16.gmra.mxu2 %v9309_v18  ;;  %2501 = vmatmul.bf16.gmra.mxu0 %v9309_v18 }
 0x394   : > { %v2190_v12 = vpop.f32.mrf.mxu1 }
 0x395   : > { %v3007_v13 = vmax.f32 %v3006_v46, %v2584_v61  ;;  %v3045_v9 = vmax.f32 %v3044_v6, %v2593_v36  ;;  %v2191_v32 = vadd.f32 %v2190_v12, %v9527_v21  ;;  %2412 = vmatmul.bf16.gmra.mxu3 %v9309_v18 }
 0x396   : > { %v2284_v39 = vpop.f32.mrf.mxu2 }
 0x397   : > { %v2574_v37 = vmax.f32 %v2191_v32, 0.0  ;;  %v2285_v14 = vadd.f32 %v2284_v39, %v9511_v62  ;;  %2229 = vmatmul.bf16.gmra.mxu1 %v9278_v8 }
 0x398   : > { %v2373_v44 = vpop.f32.mrf.mxu3  ;;  %v2464_v52 = vpop.f32.mrf.mxu0 }
 0x399   : > { %v2932_v17 = vmax.f32 %v2931_v11, %v2574_v37  ;;  %v2591_v3 = vmax.f32 %v2285_v14, 0.0  ;;  %v2374_v47 = vadd.f32 %v2373_v44, %v9515_v60  ;;  %v2465_v54 = vadd.f32 %v2464_v52, %v9504_v7 }
 0x39b   : > { %v2971_v55 = vmax.f32 %v2970_v25, %v2591_v3  ;;  %v2592_v33 = vmax.f32 %v2374_v47, 0.0  ;;  %v2601_v40 = vmax.f32 %v2465_v54, 0.0 }
 0x39c   : > { %v2192_v15 = vpop.f32.mrf.mxu1 }
 0x39d   : > { %v3008_v2 = vmax.f32 %v3007_v13, %v2592_v33  ;;  %v3046_v1 = vmax.f32 %v3045_v9, %v2601_v40  ;;  %v2193_v27 = vadd.f32 %v2192_v15, %v9527_v21 }
 0x39e   : > { %v2286_v53 = vpop.f32.mrf.mxu2 }
 0x39f   : > { %v2582_v22 = vmax.f32 %v2193_v27, 0.0  ;;  %v2287_v8 = vadd.f32 %v2286_v53, %v9511_v62 }
 0x3a0   : > { %v2375_v49 = vpop.f32.mrf.mxu3  ;;  %v2467_v42 = vpop.f32.mrf.mxu0 }
 0x3a1   : > { %v2933_v28 = vmax.f32 %v2932_v17, %v2582_v22  ;;  %v2599_v59 = vmax.f32 %v2287_v8, 0.0  ;;  %v2376_v23 = vadd.f32 %v2375_v49, %v9515_v60  ;;  %v2468_v34 = vadd.f32 %v2467_v42, %v9504_v7 }
 0x3a3   : > { %v2972_v38 = vmax.f32 %v2971_v55, %v2599_v59  ;;  %v2600_v26 = vmax.f32 %v2376_v23, 0.0  ;;  %v2609_v51 = vmax.f32 %v2468_v34, 0.0  ;;  %2328 = vmatmul.bf16.gmra.mxu2 %v9341_v24  ;;  %2506 = vmatmul.bf16.gmra.mxu0 %v9341_v24 }
 0x3a4   : > { %v2195_v4 = vpop.f32.mrf.mxu1 }
 0x3a5   : > { %v3009_v31 = vmax.f32 %v3008_v2, %v2600_v26  ;;  %v3047_v35 = vmax.f32 %v3046_v1, %v2609_v51  ;;  %v2196_v48 = vadd.f32 %v2195_v4, %v9527_v21  ;;  %2417 = vmatmul.bf16.gmra.mxu3 %v9341_v24 }
 0x3a6   : > { %v2289_v5 = vpop.f32.mrf.mxu2 }
 0x3a7   : > { %v2590_v58 = vmax.f32 %v2196_v48, 0.0  ;;  %v2290_v43 = vadd.f32 %v2289_v5, %v9511_v62  ;;  %2234 = vmatmul.bf16.gmra.mxu1 %v9309_v18 }
 0x3a8   : > { %v2378_v63 = vpop.f32.mrf.mxu3  ;;  %v2469_v46 = vpop.f32.mrf.mxu0 }
 0x3a9   : > { %v2934_v6 = vmax.f32 %v2933_v28, %v2590_v58  ;;  %v2607_v19 = vmax.f32 %v2290_v43, 0.0  ;;  %v2379_v10 = vadd.f32 %v2378_v63, %v9515_v60  ;;  %v2470_v20 = vadd.f32 %v2469_v46, %v9504_v7 }
 0x3ab   : > { %v2973_v57 = vmax.f32 %v2972_v38, %v2607_v19  ;;  %v2608_v29 = vmax.f32 %v2379_v10, 0.0  ;;  %v2617_v56 = vmax.f32 %v2470_v20, 0.0 }
 0x3ac   : > { %v2197_v11 = vpop.f32.mrf.mxu1 }
 0x3ad   : > { %v3010_v41 = vmax.f32 %v3009_v31, %v2608_v29  ;;  %v3048_v50 = vmax.f32 %v3047_v35, %v2617_v56  ;;  %v2198_v30 = vadd.f32 %v2197_v11, %v9527_v21 }
 0x3ae   : > { %v2291_v25 = vpop.f32.mrf.mxu2 }
 0x3af   : > { %v2598_v61 = vmax.f32 %v2198_v30, 0.0  ;;  %v2292_v18 = vadd.f32 %v2291_v25, %v9511_v62 }
 0x3b0   : > { %v2380_v36 = vpop.f32.mrf.mxu3  ;;  %v2472_v12 = vpop.f32.mrf.mxu0 }
 0x3b1   : > { %v2935_v13 = vmax.f32 %v2934_v6, %v2598_v61  ;;  %v2615_v9 = vmax.f32 %v2292_v18, 0.0  ;;  %v2381_v32 = vadd.f32 %v2380_v36, %v9515_v60  ;;  %v2473_v39 = vadd.f32 %v2472_v12, %v9504_v7 }
 0x3b3   : > { %v2974_v37 = vmax.f32 %v2973_v57, %v2615_v9  ;;  %v2616_v14 = vmax.f32 %v2381_v32, 0.0  ;;  %v2625_v44 = vmax.f32 %v2473_v39, 0.0  ;;  %2333 = vmatmul.bf16.gmra.mxu2 %v9377_v45  ;;  %2511 = vmatmul.bf16.gmra.mxu0 %v9377_v45 }
 0x3b4   : > { %v2200_v52 = vpop.f32.mrf.mxu1 }
 0x3b5   : > { %v3011_v17 = vmax.f32 %v3010_v41, %v2616_v14  ;;  %v3049_v3 = vmax.f32 %v3048_v50, %v2625_v44  ;;  %v2201_v47 = vadd.f32 %v2200_v52, %v9527_v21  ;;  %2422 = vmatmul.bf16.gmra.mxu3 %v9377_v45 }
 0x3b6   : > { %v2294_v54 = vpop.f32.mrf.mxu2 }
 0x3b7   : > { %v2606_v55 = vmax.f32 %v2201_v47, 0.0  ;;  %v2295_v33 = vadd.f32 %v2294_v54, %v9511_v62  ;;  %2239 = vmatmul.bf16.gmra.mxu1 %v9341_v24 }
 0x3b8   : > { %v2383_v40 = vpop.f32.mrf.mxu3  ;;  %v2474_v15 = vpop.f32.mrf.mxu0 }
 0x3b9   : > { %v2936_v2 = vmax.f32 %v2935_v13, %v2606_v55  ;;  %v2623_v1 = vmax.f32 %v2295_v33, 0.0  ;;  %v2384_v27 = vadd.f32 %v2383_v40, %v9515_v60  ;;  %v2475_v53 = vadd.f32 %v2474_v15, %v9504_v7 }
 0x3bb   : > { %v2975_v22 = vmax.f32 %v2974_v37, %v2623_v1  ;;  %v2624_v8 = vmax.f32 %v2384_v27, 0.0  ;;  %v2633_v49 = vmax.f32 %v2475_v53, 0.0 }
 0x3bc   : > { %v2202_v42 = vpop.f32.mrf.mxu1 }
 0x3bd   : > { %v3012_v28 = vmax.f32 %v3011_v17, %v2624_v8  ;;  %v3050_v59 = vmax.f32 %v3049_v3, %v2633_v49  ;;  %v2203_v23 = vadd.f32 %v2202_v42, %v9527_v21 }
 0x3be   : > { %v2296_v34 = vpop.f32.mrf.mxu2 }
 0x3bf   : > { %v2614_v38 = vmax.f32 %v2203_v23, 0.0  ;;  %v2297_v24 = vadd.f32 %v2296_v34, %v9511_v62 }
 0x3c0   : > { %v2385_v26 = vpop.f32.mrf.mxu3  ;;  %v2477_v51 = vpop.f32.mrf.mxu0 }
 0x3c1   : > { %v2937_v4 = vmax.f32 %v2936_v2, %v2614_v38  ;;  %v2631_v31 = vmax.f32 %v2297_v24, 0.0  ;;  %v2386_v35 = vadd.f32 %v2385_v26, %v9515_v60  ;;  %v2478_v48 = vadd.f32 %v2477_v51, %v9504_v7 }
 0x3c3   : > { %v2976_v5 = vmax.f32 %v2975_v22, %v2631_v31  ;;  %v2632_v58 = vmax.f32 %v2386_v35, 0.0  ;;  %v2641_v43 = vmax.f32 %v2478_v48, 0.0  ;;  %2338 = vmatmul.bf16.gmra.mxu2 %v9187_v0 }
 0x3c4   : > { %v2205_v63 = vpop.f32.mrf.mxu1 }
 0x3c5   : > { %v3013_v46 = vmax.f32 %v3012_v28, %v2632_v58  ;;  %v3051_v6 = vmax.f32 %v3050_v59, %v2641_v43  ;;  %v2206_v19 = vadd.f32 %v2205_v63, %v9527_v21  ;;  %2427 = vmatmul.bf16.gmra.mxu3 %v9187_v0 }
 0x3c6   : > { %v2299_v10 = vpop.f32.mrf.mxu2 }
 0x3c7   : > { %v2622_v20 = vmax.f32 %v2206_v19, 0.0  ;;  %v2300_v57 = vadd.f32 %v2299_v10, %v9511_v62  ;;  %2244 = vmatmul.bf16.gmra.mxu1 %v9377_v45 }
 0x3c8   : > { %v2388_v29 = vpop.f32.mrf.mxu3  ;;  %v2479_v56 = vpop.f32.mrf.mxu0 }
 0x3c9   : > { %v2938_v11 = vmax.f32 %v2937_v4, %v2622_v20  ;;  %v2639_v41 = vmax.f32 %v2300_v57, 0.0  ;;  %v2389_v50 = vadd.f32 %v2388_v29, %v9515_v60  ;;  %v2480_v30 = vadd.f32 %v2479_v56, %v9504_v7 }
 0x3cb   : > { %v2977_v25 = vmax.f32 %v2976_v5, %v2639_v41  ;;  %v2640_v61 = vmax.f32 %v2389_v50, 0.0  ;;  %v2649_v18 = vmax.f32 %v2480_v30, 0.0 }
 0x3cc   : > { %v2207_v36 = vpop.f32.mrf.mxu1 }
 0x3cd   : > { %v3014_v12 = vmax.f32 %v3013_v46, %v2640_v61  ;;  %v3052_v13 = vmax.f32 %v3051_v6, %v2649_v18  ;;  %v2208_v9 = vadd.f32 %v2207_v36, %v9527_v21 }
 0x3ce   : > { %v2301_v32 = vpop.f32.mrf.mxu2 }
 0x3cf   : > { %v2630_v39 = vmax.f32 %v2208_v9, 0.0  ;;  %v2302_v45 = vadd.f32 %v2301_v32, %v9511_v62 }
 0x3d0   : > { %v2390_v37 = vpop.f32.mrf.mxu3  ;;  %v2482_v14 = vpop.f32.mrf.mxu0 }
 0x3d1   : > { %v2939_v44 = vmax.f32 %v2938_v11, %v2630_v39  ;;  %v2647_v52 = vmax.f32 %v2302_v45, 0.0  ;;  %v2391_v17 = vadd.f32 %v2390_v37, %v9515_v60  ;;  %v2483_v3 = vadd.f32 %v2482_v14, %v9504_v7 }
 0x3d3   : > { %v2978_v47 = vmax.f32 %v2977_v25, %v2647_v52  ;;  %v2648_v54 = vmax.f32 %v2391_v17, 0.0  ;;  %v2657_v55 = vmax.f32 %v2483_v3, 0.0  ;;  %2516 = vmatmul.bf16.vlgmr.msrb.gmra.mxu2 %v9187_v0 }
 0x3d4   : > { %v2210_v33 = vpop.f32.mrf.mxu1 }
 0x3d5   : > { %v3015_v40 = vmax.f32 %v3014_v12, %v2648_v54  ;;  %v3053_v15 = vmax.f32 %v3052_v13, %v2657_v55  ;;  %v2211_v2 = vadd.f32 %v2210_v33, %v9527_v21 }
 0x3d6   : > { %v2304_v1 = vpop.f32.mrf.mxu2 }
 0x3d7   : > { %v2638_v27 = vmax.f32 %v2211_v2, 0.0  ;;  %v2305_v53 = vadd.f32 %v2304_v1, %v9511_v62  ;;  %2249 = vmatmul.bf16.gmra.mxu1 %v9187_v0 }
 0x3d8   : > { %v2393_v22 = vpop.f32.mrf.mxu3  ;;  %v2484_v8 = vpop.f32.mrf.mxu0 }
 0x3d9   : > { %v2940_v49 = vmax.f32 %v2939_v44, %v2638_v27  ;;  %v2655_v42 = vmax.f32 %v2305_v53, 0.0  ;;  %v2394_v28 = vadd.f32 %v2393_v22, %v9515_v60  ;;  %v2485_v59 = vadd.f32 %v2484_v8, %v9504_v7 }
 0x3db   : > { %v2979_v23 = vmax.f32 %v2978_v47, %v2655_v42  ;;  %v2656_v34 = vmax.f32 %v2394_v28, 0.0  ;;  %v2665_v38 = vmax.f32 %v2485_v59, 0.0 }
 0x3dc   : > { %v2212_v24 = vpop.f32.mrf.mxu1 }
 0x3dd   : > { %v3016_v26 = vmax.f32 %v3015_v40, %v2656_v34  ;;  %v3054_v51 = vmax.f32 %v3053_v15, %v2665_v38  ;;  %v2213_v4 = vadd.f32 %v2212_v24, %v9527_v21 }
 0x3de   : > { %v2306_v31 = vpop.f32.mrf.mxu2 }
 0x3df   : > { %v2646_v35 = vmax.f32 %v2213_v4, 0.0  ;;  %v2307_v0 = vadd.f32 %v2306_v31, %v9511_v62 }
 0x3e0   : > { %v2395_v48 = vpop.f32.mrf.mxu3  ;;  %v2487_v5 = vpop.f32.mrf.mxu0 }
 0x3e1   : > { %v2941_v58 = vmax.f32 %v2940_v49, %v2646_v35  ;;  %v2663_v43 = vmax.f32 %v2307_v0, 0.0  ;;  %v2396_v63 = vadd.f32 %v2395_v48, %v9515_v60  ;;  %v2488_v46 = vadd.f32 %v2487_v5, %v9504_v7 }
 0x3e3   : > { %v2980_v6 = vmax.f32 %v2979_v23, %v2663_v43  ;;  %v2664_v19 = vmax.f32 %v2396_v63, 0.0  ;;  %v2673_v10 = vmax.f32 %v2488_v46, 0.0 }
 0x3e4   : > { %v2215_v20 = vpop.f32.mrf.mxu1 }
 0x3e5   : > { %v3017_v57 = vmax.f32 %v3016_v26, %v2664_v19  ;;  %v9621_v29 = vmax.f32 %v3054_v51, %v2673_v10  ;;  %v2216_v56 = vadd.f32 %v2215_v20, %v9527_v21 }
 0x3e6   : > { %v2309_v11 = vpop.f32.mrf.mxu2 }
 0x3e7   : > { %v2654_v41 = vmax.f32 %v2216_v56, 0.0  ;;  %v2310_v50 = vadd.f32 %v2309_v11, %v9511_v62 }
 0x3e8   : > { %v2398_v30 = vpop.f32.mrf.mxu3  ;;  %v9627_v45 = vpop.f32.mrf.mxu0 }
 0x3e9   : > { %v2942_v25 = vmax.f32 %v2941_v58, %v2654_v41  ;;  %v2671_v61 = vmax.f32 %v2310_v50, 0.0  ;;  %v2399_v18 = vadd.f32 %v2398_v30, %v9515_v60 }
 0x3eb   : > { %v2981_v36 = vmax.f32 %v2980_v6, %v2671_v61  ;;  %v2672_v12 = vmax.f32 %v2399_v18, 0.0 }
 0x3ec   : > { %v2217_v13 = vpop.f32.mrf.mxu1 }
 0x3ed   : > { %v3018_v9 = vmax.f32 %v3017_v57, %v2672_v12  ;;  %v2218_v32 = vadd.f32 %v2217_v13, %v9527_v21 }
 0x3ee   : > { %v2311_v39 = vpop.f32.mrf.mxu2 }
 0x3ef   : > { %v2662_v37 = vmax.f32 %v2218_v32, 0.0  ;;  %v2312_v14 = vadd.f32 %v2311_v39, %v9511_v62 }
 0x3f0   : > { %v2400_v44 = vpop.f32.mrf.mxu3  ;;  %v2492_v53 = vpop.f32.mrf.mxu0 }
 0x3f1   : > { %v2943_v52 = vmax.f32 %v2942_v25, %v2662_v37  ;;  %v2679_v17 = vmax.f32 %v2312_v14, 0.0  ;;  %v2401_v3 = vadd.f32 %v2400_v44, %v9515_v60 }
 0x3f3   : > { %v2982_v47 = vmax.f32 %v2981_v36, %v2679_v17  ;;  %v2680_v54 = vmax.f32 %v2401_v3, 0.0 }
 0x3f4   : > { %v2220_v55 = vpop.f32.mrf.mxu1 }
 0x3f5   : > { %v3019_v33 = vmax.f32 %v3018_v9, %v2680_v54  ;;  %v2221_v40 = vadd.f32 %v2220_v55, %v9527_v21 }
 0x3f6   : > { %v2314_v15 = vpop.f32.mrf.mxu2 }
 0x3f7   : > { %v2670_v2 = vmax.f32 %v2221_v40, 0.0  ;;  %v2315_v1 = vadd.f32 %v2314_v15, %v9511_v62 }
 0x3f8   : > { %v2403_v27 = vpop.f32.mrf.mxu3  ;;  %v2494_v35 = vpop.f32.mrf.mxu0 }
 0x3f9   : > { %v2944_v22 = vmax.f32 %v2943_v52, %v2670_v2  ;;  %v2687_v8 = vmax.f32 %v2315_v1, 0.0  ;;  %v2404_v49 = vadd.f32 %v2403_v27, %v9515_v60  ;;  %v2493_v2 = vadd.f32 %v2492_v53, %v9504_v7 }
 0x3fb   : > { %v2983_v42 = vmax.f32 %v2982_v47, %v2687_v8  ;;  %v2688_v28 = vmax.f32 %v2404_v49, 0.0 }
 0x3fc   : > { %v2222_v59 = vpop.f32.mrf.mxu1 }
 0x3fd   : > { %v9634_v23 = vmax.f32 %v3019_v33, %v2688_v28  ;;  %v2223_v34 = vadd.f32 %v2222_v59, %v9527_v21  ;;  %v2490_v33 = vadd.f32 %v9627_v45, %v9504_v7  ;;  %v2689_v59 = vmax.f32 %v2493_v2, 0.0 }
 0x3fe   : > { %v2316_v38 = vpop.f32.mrf.mxu2 }
 0x3ff   : > { %v2678_v24 = vmax.f32 %v2223_v34, 0.0  ;;  %v2317_v26 = vadd.f32 %v2316_v38, %v9511_v62  ;;  %v2681_v27 = vmax.f32 %v2490_v33, 0.0 }
 0x400   : > { %v2405_v51 = vpop.f32.mrf.mxu3  ;;  %v2497_v57 = vpop.f32.mrf.mxu0 }
 0x401   : > { %v2945_v4 = vmax.f32 %v2944_v22, %v2678_v24  ;;  %v2695_v31 = vmax.f32 %v2317_v26, 0.0  ;;  %v2406_v40 = vadd.f32 %v2405_v51, %v9515_v60  ;;  %v2495_v22 = vadd.f32 %v2494_v35, %v9504_v7 }
 0x402   : > { %v2498_v45 = vadd.f32 %v2497_v57, %v9504_v7  ;;  %v3056_v26 = vmax.f32 %v9621_v29, %v2681_v27 }
 0x403   : > { %v2984_v0 = vmax.f32 %v2983_v42, %v2695_v31  ;;  %v2696_v8 = vmax.f32 %v2406_v40, 0.0  ;;  %v2697_v51 = vmax.f32 %v2495_v22, 0.0 }
 0x404   : > { %v2225_v48 = vpop.f32.mrf.mxu1 }
 0x405   : > { %v2226_v5 = vadd.f32 %v2225_v48, %v9527_v21 }
 0x406   : > { %v2319_v58 = vpop.f32.mrf.mxu2 }
 0x407   : > { %v2686_v43 = vmax.f32 %v2226_v5, 0.0  ;;  %v2320_v63 = vadd.f32 %v2319_v58, %v9511_v62 }
 0x408   : > { %v2408_v46 = vpop.f32.mrf.mxu3  ;;  %v2499_v18 = vpop.f32.mrf.mxu0 }
 0x409   : > { %v9640_v6 = vmax.f32 %v2945_v4, %v2686_v43  ;;  %v2703_v19 = vmax.f32 %v2320_v63, 0.0  ;;  %v2409_v1 = vadd.f32 %v2408_v46, %v9515_v60  ;;  %v3021_v4 = vmax.f32 %v9634_v23, %v2696_v8 }
 0x40a   : > { %v3057_v43 = vmax.f32 %v3056_v26, %v2689_v59  ;;  %v2705_v63 = vmax.f32 %v2498_v45, 0.0  ;;  %v2500_v46 = vadd.f32 %v2499_v18, %v9504_v7 }
 0x40b   : > { %v2985_v10 = vmax.f32 %v2984_v0, %v2703_v19  ;;  %v2704_v34 = vmax.f32 %v2409_v1, 0.0 }
 0x40c   : > { %v2227_v20 = vpop.f32.mrf.mxu1 }
 0x40d   : > { %v3022_v19 = vmax.f32 %v3021_v4, %v2704_v34  ;;  %v2228_v23 = vadd.f32 %v2227_v20, %v9527_v21 }
 0x40e   : > { %v2321_v56 = vpop.f32.mrf.mxu2 }
 0x40f   : > { %v2322_v11 = vadd.f32 %v2321_v56, %v9511_v62  ;;  %v3058_v56 = vmax.f32 %v3057_v43, %v2697_v51 }
 0x410   : > { %v2410_v41 = vpop.f32.mrf.mxu3  ;;  %v9647_v32 = vpop.f32.mrf.mxu0 }
 0x411   : > { %v2711_v50 = vmax.f32 %v2322_v11, 0.0  ;;  %v2411_v49 = vadd.f32 %v2410_v41, %v9515_v60  ;;  %v2503_v8 = vadd.f32 %v9647_v32, %v9504_v7 }
 0x413   : > { %v2986_v30 = vmax.f32 %v2985_v10, %v2711_v50  ;;  %v2712_v35 = vmax.f32 %v2411_v49, 0.0 }
 0x414   : > { %v9643_v25 = vpop.f32.mrf.mxu1 }
 0x415   : > { %v3023_v41 = vmax.f32 %v3022_v19, %v2712_v35 }
 0x416   : > { %v2324_v61 = vpop.f32.mrf.mxu2 }
 0x417   : > { %v2325_v42 = vadd.f32 %v2324_v61, %v9511_v62 }
 0x418   : > { %v2413_v36 = vpop.f32.mrf.mxu3  ;;  %v9651_v44 = vpop.f32.mrf.mxu0 }
 0x419   : > { %v2414_v38 = vadd.f32 %v2413_v36, %v9515_v60  ;;  %v2719_v0 = vmax.f32 %v2325_v42, 0.0 }
 0x41b   : > { %v2720_v10 = vmax.f32 %v2414_v38, 0.0  ;;  %v2987_v50 = vmax.f32 %v2986_v30, %v2719_v0  ;;  %v2721_v0 = vmax.f32 %v2503_v8, 0.0 }
 0x41c   : > { %v9645_v12 = vpop.f32.mrf.mxu1 }
 0x41d   : > { %v3024_v40 = vmax.f32 %v3023_v41, %v2720_v10 }
 0x41e   : > { %v2326_v13 = vpop.f32.mrf.mxu2 }
 0x41f   : > { %v2327_v53 = vadd.f32 %v2326_v13, %v9511_v62 }
 0x420   : > { %v2415_v9 = vpop.f32.mrf.mxu3  ;;  %v9657_v54 = vpop.f32.mrf.mxu0 }
 0x421   : > { %v2416_v48 = vadd.f32 %v2415_v9, %v9515_v60  ;;  %v2727_v57 = vmax.f32 %v2327_v53, 0.0  ;;  %v3059_v9 = vmax.f32 %v3058_v56, %v2705_v63 }
 0x423   : > { %v2728_v61 = vmax.f32 %v2416_v48, 0.0  ;;  %v2988_v2 = vmax.f32 %v2987_v50, %v2727_v57  ;;  %v2508_v50 = vadd.f32 %v9657_v54, %v9504_v7 }
 0x424   : > { %v9649_v39 = vpop.f32.mrf.mxu1 }
 0x426   : > { %v2329_v37 = vpop.f32.mrf.mxu2 }
 0x427   : > { %v2330_v5 = vadd.f32 %v2329_v37, %v9511_v62  ;;  %v2713_v37 = vmax.f32 %v2500_v46, 0.0 }
 0x428   : > { %v2418_v14 = vpop.f32.mrf.mxu3  ;;  %v9674_v31 = vpop.f32.mrf.mxu0 }
 0x429   : > { %v2419_v29 = vadd.f32 %v2418_v14, %v9515_v60  ;;  %v2735_v36 = vmax.f32 %v2330_v5, 0.0  ;;  %v2231_v14 = vadd.f32 %v9643_v25, %v9527_v21  ;;  %v3060_v53 = vmax.f32 %v3059_v9, %v2713_v37 }
 0x42b   : > { %v2736_v20 = vmax.f32 %v2419_v29, 0.0  ;;  %v2989_v49 = vmax.f32 %v2988_v2, %v2735_v36 }
 0x42c   : > { %v9653_v52 = vpop.f32.mrf.mxu1 }
 0x42d   : > { %v2238_v5 = vadd.f32 %v9653_v52, %v9527_v21 }
 0x42e   : > { %v2331_v17 = vpop.f32.mrf.mxu2 }
 0x42f   : > { %v2332_v11 = vadd.f32 %v2331_v17, %v9511_v62  ;;  %v2694_v17 = vmax.f32 %v2228_v23, 0.0 }
 0x430   : > { %v2420_v3 = vpop.f32.mrf.mxu3  ;;  %v2512_v59 = vpop.f32.mrf.mxu0 }
 0x431   : > { %v2421_v18 = vadd.f32 %v2420_v3, %v9515_v60  ;;  %v2743_v27 = vmax.f32 %v2332_v11, 0.0  ;;  %v2233_v3 = vadd.f32 %v9645_v12, %v9527_v21  ;;  %v2947_v35 = vmax.f32 %v9640_v6, %v2694_v17 }
 0x433   : > { %v2744_v25 = vmax.f32 %v2421_v18, 0.0  ;;  %v2990_v32 = vmax.f32 %v2989_v49, %v2743_v27  ;;  %v2710_v48 = vmax.f32 %v2233_v3, 0.0  ;;  %v2737_v27 = vmax.f32 %v2508_v50, 0.0 }
 0x434   : > { %v9655_v47 = vpop.f32.mrf.mxu1 }
 0x435   : > { %v2241_v29 = vadd.f32 %v9655_v47, %v9527_v21 }
 0x436   : > { %v2334_v55 = vpop.f32.mrf.mxu2 }
 0x437   : > { %v2335_v33 = vadd.f32 %v2334_v55, %v9511_v62  ;;  %v3025_v55 = vmax.f32 %v3024_v40, %v2728_v61  ;;  %v2726_v61 = vmax.f32 %v2238_v5, 0.0  ;;  %v2510_v40 = vadd.f32 %v9674_v31, %v9504_v7 }
 0x438   : > { %v2423_v15 = vpop.f32.mrf.mxu3  ;;  %v2514_v2 = vpop.f32.mrf.mxu0 }
 0x439   : > { %v2424_v30 = vadd.f32 %v2423_v15, %v9515_v60  ;;  %v2751_v45 = vmax.f32 %v2335_v33, 0.0  ;;  %v2702_v15 = vmax.f32 %v2231_v14, 0.0  ;;  %v3026_v26 = vmax.f32 %v3025_v55, %v2736_v20 }
 0x43a   : > { %v2745_v31 = vmax.f32 %v2510_v40, 0.0 }
 0x43b   : > { %v2752_v51 = vmax.f32 %v2424_v30, 0.0  ;;  %v3027_v43 = vmax.f32 %v3026_v26, %v2744_v25  ;;  %v2991_v63 = vmax.f32 %v2990_v32, %v2751_v45  ;;  %v2948_v10 = vmax.f32 %v2947_v35, %v2702_v15 }
 0x43c   : > { %v9667_v28 = vpop.f32.mrf.mxu1  ;;  %v2513_v30 = vadd.f32 %v2512_v59, %v9504_v7 }
 0x43d   : > { %v3028_v6 = vmax.f32 %v3027_v43, %v2752_v51  ;;  %v2949_v52 = vmax.f32 %v2948_v10, %v2710_v48  ;;  %v2243_v36 = vadd.f32 %v9667_v28, %v9527_v21  ;;  %v3061_v28 = vmax.f32 %v3060_v53, %v2721_v0 }
 0x43e   : > { %v2336_v24 = vpop.f32.mrf.mxu2  ;;  %v2753_v15 = vmax.f32 %v2513_v30, 0.0 }
 0x43f   : > { %v2337_v22 = vadd.f32 %v2336_v24, %v9511_v62  ;;  %v2236_v24 = vadd.f32 %v9649_v39, %v9527_v21  ;;  %v2505_v39 = vadd.f32 %v9651_v44, %v9504_v7 }
 0x440   : > { %v2425_v58 = vpop.f32.mrf.mxu3 }
 0x441   : > { %v2426_v34 = vadd.f32 %v2425_v58, %v9515_v60  ;;  %v2759_v4 = vmax.f32 %v2337_v22, 0.0  ;;  %v2718_v57 = vmax.f32 %v2236_v24, 0.0  ;;  %v2729_v33 = vmax.f32 %v2505_v39, 0.0 }
 0x443   : > { %v2760_v46 = vmax.f32 %v2426_v34, 0.0  ;;  %v2992_v23 = vmax.f32 %v2991_v63, %v2759_v4  ;;  %v2950_v14 = vmax.f32 %v2949_v52, %v2718_v57  ;;  %v3062_v49 = vmax.f32 %v3061_v28, %v2729_v33 }
 0x444   : > { %v9682_v13 = vpop.f32.mrf.mxu1 }
 0x445   : > { %v3029_v44 = vmax.f32 %v3028_v6, %v2760_v46  ;;  %v2246_v54 = vadd.f32 %v9682_v13, %v9527_v21  ;;  %v2951_v8 = vmax.f32 %v2950_v14, %v2726_v61  ;;  %v3063_v53 = vmax.f32 %v3062_v49, %v2737_v27 }
 0x446   : > { %v2339_v1 = vpop.f32.mrf.mxu2 }
 0x447   : > { %v2340_v38 = vadd.f32 %v2339_v1, %v9511_v62  ;;  %v2750_v13 = vmax.f32 %v2246_v54, 0.0  ;;  %v3064_v51 = vmax.f32 %v3063_v53, %v2745_v31 }
 0x448   : > { %v2428_v42 = vpop.f32.mrf.mxu3 }
 0x449   : > { %v2429_v12 = vadd.f32 %v2428_v42, %v9515_v60  ;;  %v2767_v19 = vmax.f32 %v2340_v38, 0.0  ;;  %v2515_v42 = vadd.f32 %v2514_v2, %v9504_v7  ;;  %v3065_v48 = vmax.f32 %v3064_v51, %v2753_v15 }
 0x44b   : > { %v2768_v11 = vmax.f32 %v2429_v12, 0.0  ;;  %v2993_v37 = vmax.f32 %v2992_v23, %v2767_v19  ;;  %v2761_v4 = vmax.f32 %v2515_v42, 0.0 }
 0x44c   : > { %v2247_v58 = vpop.f32.mrf.mxu1 }
 0x44d   : > { %v3030_v20 = vmax.f32 %v3029_v44, %v2768_v11  ;;  %v2248_v3 = vadd.f32 %v2247_v58, %v9527_v21  ;;  %v3066_v19 = vmax.f32 %v3065_v48, %v2761_v4 }
 0x44e   : > { %v2341_v56 = vpop.f32.mrf.mxu2 }
 0x44f   : > { %v2342_v41 = vadd.f32 %v2341_v56, %v9511_v62  ;;  %v2734_v62 = vmax.f32 %v2241_v29, 0.0  ;;  %v2758_v59 = vmax.f32 %v2248_v3, 0.0 }
 0x450   : > { %v2430_v9 = vpop.f32.mrf.mxu3 }
 0x451   : > { %v2775_v18 = vmax.f32 %v2342_v41, 0.0  ;;  %v2431_v47 = vadd.f32 %v2430_v9, %v9515_v60  ;;  %v2742_v60 = vmax.f32 %v2243_v36, 0.0  ;;  %v2952_v45 = vmax.f32 %v2951_v8, %v2734_v62  ;;  %v2778_v8 = vld [vmem:[#allocation2] sm:$0xff] }
 0x453   : > { %v2994_v1 = vmax.f32 %v2993_v37, %v2775_v18  ;;  %v2776_v17 = vmax.f32 %v2431_v47, 0.0  ;;  %v2953_v24 = vmax.f32 %v2952_v45, %v2742_v60 }
 0x454   : > { %v2250_v22 = vpop.f32.mrf.mxu1 }
 0x455   : > { %v3031_v55 = vmax.f32 %v3030_v20, %v2776_v17  ;;  %v2995_v34 = vrot.slane %v2994_v1, 4  ;;  %v2251_v38 = vadd.f32 %v2250_v22, %v9527_v21  ;;  %v2954_v12 = vmax.f32 %v2953_v24, %v2750_v13 }
 0x456   : > { %v2517_v25 = vpop.f32.mrf.mxu2 }
 0x457   : > { %v3032_v26 = vrot.slane %v3031_v55, 4  ;;  %v2518_v32 = vadd.f32 %v2517_v25, %v9504_v7  ;;  %v2996_v35 = vmax.f32 %v2994_v1, %v2995_v34  ;;  %v2766_v0 = vmax.f32 %v2251_v38, 0.0 }
 0x458   : > { %v2955_v58 = vmax.f32 %v2954_v12, %v2758_v59 }
 0x459   : > { %v3033_v43 = vmax.f32 %v3031_v55, %v3032_v26  ;;  %v2769_v63 = vmax.f32 %v2518_v32, 0.0  ;;  %v2997_v39 = vrot.slane %v2996_v35, 2 }
 0x45a   : > { %v2956_v57 = vmax.f32 %v2955_v58, %v2766_v0 }
 0x45b   : > { %v3034_v6 = vrot.slane %v3033_v43, 2  ;;  %v3067_v23 = vmax.f32 %v3066_v19, %v2769_v63  ;;  %v2998_v52 = vmax.f32 %v2996_v35, %v2997_v39 }
 0x45c   : > { %v2252_v5 = vpop.f32.mrf.mxu1 }
 0x45d   : > { %v2253_v46 = vadd.f32 %v2252_v5, %v9527_v21  ;;  %v3035_v36 = vmax.f32 %v3033_v43, %v3034_v6  ;;  %v2999_v37 = vrot.slane %v2998_v52, 1 }
 0x45e   : > { %v2519_v10 = vpop.f32.mrf.mxu2 }
 0x45f   : > { %v2774_v29 = vmax.f32 %v2253_v46, 0.0  ;;  %v2520_v56 = vadd.f32 %v2519_v10, %v9504_v7  ;;  %v3036_v47 = vrot.slane %v3035_v36, 1  ;;  %v3000_v40 = vmax.f32 %v2998_v52, %v2999_v37 }
 0x461   : > { %v2957_v11 = vmax.f32 %v2956_v57, %v2774_v29  ;;  %v2777_v41 = vmax.f32 %v2520_v56, 0.0  ;;  %v3037_v7 = vmax.f32 %v3035_v36, %v3036_v47  ;;  %v3087_v1 = vrot.slane %v3000_v40, 3 }
 0x463   : > { %v2958_v50 = vrot.slane %v2957_v11, 4  ;;  %v3068_v61 = vmax.f32 %v3067_v23, %v2777_v41  ;;  %v3088_v27 = vrot.slane %v3037_v7, 2 }
 0x465   : > { %v2959_v9 = vmax.f32 %v2957_v11, %v2958_v50  ;;  %v3069_v44 = vrot.slane %v3068_v61, 4 }
 0x467   : > { %v2960_v18 = vrot.slane %v2959_v9, 2  ;;  %v3070_v21 = vmax.f32 %v3068_v61, %v3069_v44 }
 0x469   : > { %v2961_v33 = vmax.f32 %v2959_v9, %v2960_v18  ;;  %v3071_v14 = vrot.slane %v3070_v21, 2 }
 0x46b   : > { %v2962_v62 = vrot.slane %v2961_v33, 1  ;;  %v3072_v2 = vmax.f32 %v3070_v21, %v3071_v14 }
 0x46d   : > { %v2963_v54 = vmax.f32 %v2961_v33, %v2962_v62  ;;  %v3073_v20 = vrot.slane %v3072_v2, 1 }
 0x46f   : > { %v3086_v17 = vrot.slane %v2963_v54, 4  ;;  %v3074_v28 = vmax.f32 %v3072_v2, %v3073_v20 }
 0x471   : > { %v3097_v30 = vsel %vm3096_vm4, %v3086_v17, %v3087_v1  ;;  %v3089_v22 = vrot.slane %v3074_v28, 1 }
 0x473   : > { %v3099_v60 = vsel %vm3098_vm5, %v3088_v27, %v3089_v22 }
 0x474   : > { %v3101_v3 = vsel %vm3100_vm6, %v3097_v30, %v3099_v60  ;;  %3110 = sbr.rel (%p6136_p11) target bundleno = 1831 (0x727), region = 84 }
 0x475   : > { %v3103_v55 = vsel %vm3102_vm7, %v9536_v16, %v3101_v3 }
 0x476   : > { %v3105_v49 = vmax.f32 %v2778_v8, %v3103_v55 }
 0x478   : > { %3106 = vst [vmem:[#allocation2] sm:$0xff] %v3105_v49 }
 0x479   : > { %v6251_v31 = vld [vmem:[#allocation3 + $0xe0] sm:$0xf]  ;;  %v7581_v42 = vld [vmem:[#allocation3 + $0xec] sm:$0xf0]  ;;  %vm5758_vm8 = vcmask 65536  }
 0x47a   : > { %v6379_v25 = vld [vmem:[#allocation3 + $0x1e0] sm:$0xf]  ;;  %v6252_v45 = vor.u32 %v7581_v42, %v6251_v31  ;;  %v7613_v13 = vld [vmem:[#allocation3 + $0x1ec] sm:$0xf0] }
 0x47b   : > { %v6507_v34 = vld [vmem:[#allocation3 + $0x2e0] sm:$0xf]  ;;  %v7645_v38 = vld [vmem:[#allocation3 + $0x2ec] sm:$0xf0]  ;;  %v6380_v53 = vor.u32 %v7613_v13, %v6379_v25 }
 0x47c   : > { %v6508_v15 = vor.u32 %v7645_v38, %v6507_v34  ;;  %v6635_v24 = vld [vmem:[#allocation3 + $0x3e0] sm:$0xf]  ;;  %v7677_v59 = vld [vmem:[#allocation3 + $0x3ec] sm:$0xf0]  ;;  %4683 = vmatpush.bf16.msra.mxu0 %v6252_v45 }
 0x47d   : > { %v6235_v26 = vld [vmem:[#allocation3 + $0xc0] sm:$0xf]  ;;  %v6636_v32 = vor.u32 %v7677_v59, %v6635_v24  ;;  %v7577_v16 = vld [vmem:[#allocation3 + $0xcc] sm:$0xf0]  ;;  %4696 = vmatpush.bf16.msra.mxu1 %v6380_v53 }
 0x47e   : > { %v6363_v51 = vld [vmem:[#allocation3 + $0x1c0] sm:$0xf]  ;;  %v7609_v4 = vld [vmem:[#allocation3 + $0x1cc] sm:$0xf0]  ;;  %4709 = vmatpush.bf16.msra.mxu2 %v6508_v15  ;;  %v6236_v12 = vor.u32 %v7577_v16, %v6235_v26 }
 0x47f   : > { %v6364_v35 = vor.u32 %v7609_v4, %v6363_v51  ;;  %v6491_v0 = vld [vmem:[#allocation3 + $0x2c0] sm:$0xf]  ;;  %v7641_v48 = vld [vmem:[#allocation3 + $0x2cc] sm:$0xf0]  ;;  %4722 = vmatpush.bf16.msra.mxu3 %v6636_v32 }
 0x480   : > { %v6619_v5 = vld [vmem:[#allocation3 + $0x3c0] sm:$0xf]  ;;  %v6492_v58 = vor.u32 %v7641_v48, %v6491_v0  ;;  %v7673_v43 = vld [vmem:[#allocation3 + $0x3cc] sm:$0xf0]  ;;  %4684 = vmatpush.bf16.msra.mxu0 %v6236_v12 }
 0x481   : > { %v6219_v63 = vld [vmem:[#allocation3 + $0xa0] sm:$0xf]  ;;  %v7573_v46 = vld [vmem:[#allocation3 + $0xac] sm:$0xf0]  ;;  %v6620_v19 = vor.u32 %v7673_v43, %v6619_v5  ;;  %4697 = vmatpush.bf16.msra.mxu1 %v6364_v35 }
 0x482   : > { %v6347_v10 = vld [vmem:[#allocation3 + $0x1a0] sm:$0xf]  ;;  %v7605_v39 = vld [vmem:[#allocation3 + $0x1ac] sm:$0xf0]  ;;  %v6220_v29 = vor.u32 %v7573_v46, %v6219_v63  ;;  %4710 = vmatpush.bf16.msra.mxu2 %v6492_v58 }
 0x483   : > { %v6475_v57 = vld [vmem:[#allocation3 + $0x2a0] sm:$0xf]  ;;  %v7637_v56 = vld [vmem:[#allocation3 + $0x2ac] sm:$0xf0]  ;;  %v6348_v11 = vor.u32 %v7605_v39, %v6347_v10  ;;  %4723 = vmatpush.bf16.msra.mxu3 %v6620_v19 }
 0x484   : > { %v6603_v6 = vld [vmem:[#allocation3 + $0x3a0] sm:$0xf]  ;;  %v7669_v23 = vld [vmem:[#allocation3 + $0x3ac] sm:$0xf0]  ;;  %v6476_v41 = vor.u32 %v7637_v56, %v6475_v57  ;;  %4685 = vmatpush.bf16.msra.mxu0 %v6220_v29 }
 0x485   : > { %v6203_v52 = vld [vmem:[#allocation3 + $0x80] sm:$0xf]  ;;  %v7569_v50 = vld [vmem:[#allocation3 + $0x8c] sm:$0xf0]  ;;  %v6604_v36 = vor.u32 %v7669_v23, %v6603_v6  ;;  %4698 = vmatpush.bf16.msra.mxu1 %v6348_v11 }
 0x486   : > { %v6331_v61 = vld [vmem:[#allocation3 + $0x180] sm:$0xf]  ;;  %v7601_v9 = vld [vmem:[#allocation3 + $0x18c] sm:$0xf0]  ;;  %v6204_v47 = vor.u32 %v7569_v50, %v6203_v52  ;;  %4711 = vmatpush.bf16.msra.mxu2 %v6476_v41 }
 0x487   : > { %v6459_v44 = vld [vmem:[#allocation3 + $0x280] sm:$0xf]  ;;  %v7633_v37 = vld [vmem:[#allocation3 + $0x28c] sm:$0xf0]  ;;  %v6332_v33 = vor.u32 %v7601_v9, %v6331_v61  ;;  %4724 = vmatpush.bf16.msra.mxu3 %v6604_v36 }
 0x488   : > { %v6587_v18 = vld [vmem:[#allocation3 + $0x380] sm:$0xf]  ;;  %v7665_v21 = vld [vmem:[#allocation3 + $0x38c] sm:$0xf0]  ;;  %v6460_v14 = vor.u32 %v7633_v37, %v6459_v44  ;;  %4686 = vmatpush.bf16.msra.mxu0 %v6204_v47 }
 0x489   : > { %v6187_v40 = vld [vmem:[#allocation3 + $0x60] sm:$0xf]  ;;  %v7565_v62 = vld [vmem:[#allocation3 + $0x6c] sm:$0xf0]  ;;  %v6588_v7 = vor.u32 %v7665_v21, %v6587_v18  ;;  %4699 = vmatpush.bf16.msra.mxu1 %v6332_v33 }
 0x48a   : > { %v6315_v2 = vld [vmem:[#allocation3 + $0x160] sm:$0xf]  ;;  %v7597_v54 = vld [vmem:[#allocation3 + $0x16c] sm:$0xf0]  ;;  %v6188_v27 = vor.u32 %v7565_v62, %v6187_v40  ;;  %4712 = vmatpush.bf16.msra.mxu2 %v6460_v14 }
 0x48b   : > { %v6443_v20 = vld [vmem:[#allocation3 + $0x260] sm:$0xf]  ;;  %v7629_v1 = vld [vmem:[#allocation3 + $0x26c] sm:$0xf0]  ;;  %v6316_v30 = vor.u32 %v7597_v54, %v6315_v2  ;;  %4725 = vmatpush.bf16.msra.mxu3 %v6588_v7 }
 0x48c   : > { %v6571_v17 = vld [vmem:[#allocation3 + $0x360] sm:$0xf]  ;;  %v7661_v28 = vld [vmem:[#allocation3 + $0x36c] sm:$0xf0]  ;;  %v6444_v22 = vor.u32 %v7629_v1, %v6443_v20  ;;  %4687 = vmatpush.bf16.msra.mxu0 %v6188_v27 }
 0x48d   : > { %v6171_v8 = vld [vmem:[#allocation3 + $0x40] sm:$0xf]  ;;  %v7561_v60 = vld [vmem:[#allocation3 + $0x4c] sm:$0xf0]  ;;  %v6572_v55 = vor.u32 %v7661_v28, %v6571_v17  ;;  %4700 = vmatpush.bf16.msra.mxu1 %v6316_v30 }
 0x48e   : > { %v6299_v3 = vld [vmem:[#allocation3 + $0x140] sm:$0xf]  ;;  %v7593_v49 = vld [vmem:[#allocation3 + $0x14c] sm:$0xf0]  ;;  %v6172_v13 = vor.u32 %v7561_v60, %v6171_v8  ;;  %4713 = vmatpush.bf16.msra.mxu2 %v6444_v22 }
 0x48f   : > { %v6427_v31 = vld [vmem:[#allocation3 + $0x240] sm:$0xf]  ;;  %v7625_v42 = vld [vmem:[#allocation3 + $0x24c] sm:$0xf0]  ;;  %v6300_v34 = vor.u32 %v7593_v49, %v6299_v3  ;;  %4726 = vmatpush.bf16.msra.mxu3 %v6572_v55 }
 0x490   : > { %v6555_v25 = vld [vmem:[#allocation3 + $0x340] sm:$0xf]  ;;  %v7657_v45 = vld [vmem:[#allocation3 + $0x34c] sm:$0xf0]  ;;  %v6428_v38 = vor.u32 %v7625_v42, %v6427_v31  ;;  %4688 = vmatpush.bf16.msra.mxu0 %v6172_v13  ;;  %v9725_v13 = vld [vmem:[#allocation2] sm:$0xff] }
 0x491   : > { %v6155_v53 = vld [vmem:[#allocation3 + $0x20] sm:$0xf]  ;;  %v7557_v15 = vld [vmem:[#allocation3 + $0x2c] sm:$0xf0]  ;;  %v6556_v59 = vor.u32 %v7657_v45, %v6555_v25  ;;  %4701 = vmatpush.bf16.msra.mxu1 %v6300_v34 }
 0x492   : > { %v6283_v24 = vld [vmem:[#allocation3 + $0x120] sm:$0xf]  ;;  %v7589_v26 = vld [vmem:[#allocation3 + $0x12c] sm:$0xf0]  ;;  %v6156_v12 = vor.u32 %v7557_v15, %v6155_v53  ;;  %4714 = vmatpush.bf16.msra.mxu2 %v6428_v38  ;;  %v3115_v53 = vperm.slane %v9725_v13, 2  ;;  %v3113_v15 = vperm.slane %v9725_v13, 0 }
 0x493   : > { %v6411_v32 = vld [vmem:[#allocation3 + $0x220] sm:$0xf]  ;;  %v7621_v16 = vld [vmem:[#allocation3 + $0x22c] sm:$0xf0]  ;;  %v6284_v48 = vor.u32 %v7589_v26, %v6283_v24  ;;  %4727 = vmatpush.bf16.msra.mxu3 %v6556_v59  ;;  %v3116_v24 = vperm.slane %v9725_v13, 3 }
 0x494   : > { %v6539_v51 = vld [vmem:[#allocation3 + $0x320] sm:$0xf]  ;;  %v7653_v4 = vld [vmem:[#allocation3 + $0x32c] sm:$0xf0]  ;;  %v6412_v5 = vor.u32 %v7621_v16, %v6411_v32  ;;  %4689 = vmatpush.bf16.msra.mxu0 %v6156_v12  ;;  %v9730_v12 = vpack.c.bf16 %v3115_v53, %v3115_v53  ;;  %v7579_v53 = vld [vmem:[#allocation3 + $0xe4] sm:$0xf] }
 0x495   : > { %v6139_v35 = vld [vmem:[#allocation3] sm:$0xf]  ;;  %v7553_v0 = vld [vmem:[#allocation3 + $0xc] sm:$0xf0]  ;;  %v6540_v46 = vor.u32 %v7653_v4, %v6539_v51  ;;  %4702 = vmatpush.bf16.msra.mxu1 %v6284_v48 }
 0x496   : > { %v6267_v58 = vld [vmem:[#allocation3 + $0x100] sm:$0xf]  ;;  %v7585_v43 = vld [vmem:[#allocation3 + $0x10c] sm:$0xf0]  ;;  %v6140_v6 = vor.u32 %v7553_v0, %v6139_v35  ;;  %4715 = vmatpush.bf16.msra.mxu2 %v6412_v5  ;;  %v9732_v35 = vpack.c.bf16 %v3113_v15, %v3113_v15  ;;  %v9734_v0 = vpack.c.bf16 %v3116_v24, %v3116_v24  ;;  %v3114_v5 = vperm.slane %v9725_v13, 1 }
 0x497   : > { %v6395_v63 = vld [vmem:[#allocation3 + $0x200] sm:$0xf]  ;;  %v7617_v19 = vld [vmem:[#allocation3 + $0x20c] sm:$0xf0]  ;;  %v6268_v52 = vor.u32 %v7585_v43, %v6267_v58  ;;  %4728 = vmatpush.bf16.msra.mxu3 %v6540_v46  ;;  %v6253_v15 = vld [vmem:[#allocation3 + $0xf0] sm:$0xf0] }
 0x498   : > { %v6523_v10 = vld [vmem:[#allocation3 + $0x300] sm:$0xf]  ;;  %v7649_v39 = vld [vmem:[#allocation3 + $0x30c] sm:$0xf0]  ;;  %v6396_v50 = vor.u32 %v7617_v19, %v6395_v63  ;;  %4690 = vmatpush.bf16.msra.mxu0 %v6140_v6  ;;  %v7611_v24 = vld [vmem:[#allocation3 + $0x1e4] sm:$0xf] }
 0x499   : > { %v6763_v57 = vld [vmem:[#allocation3 + $0x4e0] sm:$0xf]  ;;  %v7709_v29 = vld [vmem:[#allocation3 + $0x4ec] sm:$0xf0]  ;;  %v6524_v9 = vor.u32 %v7649_v39, %v6523_v10  ;;  %4703 = vmatpush.bf16.msra.mxu1 %v6268_v52 }
 0x49a   : > { %v6891_v56 = vld [vmem:[#allocation3 + $0x5e0] sm:$0xf]  ;;  %v7741_v23 = vld [vmem:[#allocation3 + $0x5ec] sm:$0xf0]  ;;  %v6764_v44 = vor.u32 %v7709_v29, %v6763_v57  ;;  %4716 = vmatpush.bf16.msra.mxu2 %v6396_v50 }
 0x49b   : > { %v7019_v11 = vld [vmem:[#allocation3 + $0x6e0] sm:$0xf]  ;;  %v7773_v41 = vld [vmem:[#allocation3 + $0x6ec] sm:$0xf0]  ;;  %v6892_v37 = vor.u32 %v7741_v23, %v6891_v56  ;;  %4729 = vmatpush.bf16.msra.mxu3 %v6524_v9  ;;  %v9738_v56 = vpack.c.bf16 %v3114_v5, %v3114_v5  ;;  %4691 = vmatmul.bf16.vlgmr.msra.gmra.mxu0 %v9732_v35  ;;  %v6637_v5 = vld [vmem:[#allocation3 + $0x3f0] sm:$0xf0] }
 0x49c   : > { %v7147_v61 = vld [vmem:[#allocation3 + $0x7e0] sm:$0xf]  ;;  %v7805_v36 = vld [vmem:[#allocation3 + $0x7ec] sm:$0xf0]  ;;  %v7020_v18 = vor.u32 %v7773_v41, %v7019_v11  ;;  %4735 = vmatpush.bf16.msrb.mxu0 %v6764_v44 }
 0x49d   : > { %v6747_v21 = vld [vmem:[#allocation3 + $0x4c0] sm:$0xf]  ;;  %v7705_v47 = vld [vmem:[#allocation3 + $0x4cc] sm:$0xf0]  ;;  %v7148_v14 = vor.u32 %v7805_v36, %v7147_v61  ;;  %4748 = vmatpush.bf16.msrb.mxu1 %v6892_v37  ;;  %4717 = vmatmul.bf16.vlgmr.msra.gmra.mxu2 %v9730_v12 }
 0x49e   : > { %v6875_v33 = vld [vmem:[#allocation3 + $0x5c0] sm:$0xf]  ;;  %v7737_v40 = vld [vmem:[#allocation3 + $0x5cc] sm:$0xf0]  ;;  %v6748_v20 = vor.u32 %v7705_v47, %v6747_v21  ;;  %4761 = vmatpush.bf16.msrb.mxu2 %v7020_v18  ;;  %4730 = vmatmul.bf16.vlgmr.msra.gmra.mxu3 %v9734_v0 }
 0x49f   : > { %v7003_v62 = vld [vmem:[#allocation3 + $0x6c0] sm:$0xf]  ;;  %v7769_v2 = vld [vmem:[#allocation3 + $0x6cc] sm:$0xf0]  ;;  %v6876_v17 = vor.u32 %v7737_v40, %v6875_v33  ;;  %4774 = vmatpush.bf16.msrb.mxu3 %v7148_v14  ;;  %4704 = vmatmul.bf16.vlgmr.msra.gmra.mxu1 %v9738_v56 }
 0x4a0   : > { %v7131_v7 = vld [vmem:[#allocation3 + $0x7c0] sm:$0xf]  ;;  %v7801_v54 = vld [vmem:[#allocation3 + $0x7cc] sm:$0xf0]  ;;  %v7004_v28 = vor.u32 %v7769_v2, %v7003_v62  ;;  %4736 = vmatpush.bf16.msrb.mxu0 %v6748_v20 }
 0x4a1   : > { %v6731_v1 = vld [vmem:[#allocation3 + $0x4a0] sm:$0xf]  ;;  %v7701_v27 = vld [vmem:[#allocation3 + $0x4ac] sm:$0xf0]  ;;  %v7132_v8 = vor.u32 %v7801_v54, %v7131_v7  ;;  %4749 = vmatpush.bf16.msrb.mxu1 %v6876_v17 }
 0x4a2   : > { %v6859_v30 = vld [vmem:[#allocation3 + $0x5a0] sm:$0xf]  ;;  %v7733_v22 = vld [vmem:[#allocation3 + $0x5ac] sm:$0xf0]  ;;  %v6732_v31 = vor.u32 %v7701_v27, %v6731_v1  ;;  %4762 = vmatpush.bf16.msrb.mxu2 %v7004_v28 }
 0x4a3   : > { %v6987_v60 = vld [vmem:[#allocation3 + $0x6a0] sm:$0xf]  ;;  %v7765_v3 = vld [vmem:[#allocation3 + $0x6ac] sm:$0xf0]  ;;  %v6860_v42 = vor.u32 %v7733_v22, %v6859_v30  ;;  %4775 = vmatpush.bf16.msrb.mxu3 %v7132_v8 }
 0x4a4   : > { %v7115_v55 = vld [vmem:[#allocation3 + $0x7a0] sm:$0xf]  ;;  %v7797_v49 = vld [vmem:[#allocation3 + $0x7ac] sm:$0xf0]  ;;  %v6988_v34 = vor.u32 %v7765_v3, %v6987_v60  ;;  %4737 = vmatpush.bf16.msrb.mxu0 %v6732_v31  ;;  %v3119_v60 = vperm.slane %v9725_v13, 6 }
 0x4a5   : > { %v6715_v25 = vld [vmem:[#allocation3 + $0x480] sm:$0xf]  ;;  %v7697_v45 = vld [vmem:[#allocation3 + $0x48c] sm:$0xf0]  ;;  %v7116_v59 = vor.u32 %v7797_v49, %v7115_v55  ;;  %4750 = vmatpush.bf16.msrb.mxu1 %v6860_v42 }
 0x4a6   : > { %v6843_v38 = vld [vmem:[#allocation3 + $0x580] sm:$0xf]  ;;  %v7729_v26 = vld [vmem:[#allocation3 + $0x58c] sm:$0xf0]  ;;  %v6716_v48 = vor.u32 %v7697_v45, %v6715_v25  ;;  %4763 = vmatpush.bf16.msrb.mxu2 %v6988_v34 }
 0x4a7   : > { %v6971_v32 = vld [vmem:[#allocation3 + $0x680] sm:$0xf]  ;;  %v7761_v16 = vld [vmem:[#allocation3 + $0x68c] sm:$0xf0]  ;;  %v6844_v58 = vor.u32 %v7729_v26, %v6843_v38  ;;  %4776 = vmatpush.bf16.msrb.mxu3 %v7116_v59  ;;  %v6381_v26 = vld [vmem:[#allocation3 + $0x1f0] sm:$0xf0] }
 0x4a8   : > { %v7099_v51 = vld [vmem:[#allocation3 + $0x780] sm:$0xf]  ;;  %v7793_v4 = vld [vmem:[#allocation3 + $0x78c] sm:$0xf0]  ;;  %v6972_v43 = vor.u32 %v7761_v16, %v6971_v32  ;;  %4738 = vmatpush.bf16.msrb.mxu0 %v6716_v48  ;;  %v7643_v32 = vld [vmem:[#allocation3 + $0x2e4] sm:$0xf] }
 0x4a9   : > { %v6699_v63 = vld [vmem:[#allocation3 + $0x460] sm:$0xf]  ;;  %v7693_v46 = vld [vmem:[#allocation3 + $0x46c] sm:$0xf0]  ;;  %v7100_v10 = vor.u32 %v7793_v4, %v7099_v51  ;;  %4751 = vmatpush.bf16.msrb.mxu1 %v6844_v58  ;;  %v6509_v16 = vld [vmem:[#allocation3 + $0x2f0] sm:$0xf0] }
 0x4aa   : > { %v6827_v19 = vld [vmem:[#allocation3 + $0x560] sm:$0xf]  ;;  %v7725_v39 = vld [vmem:[#allocation3 + $0x56c] sm:$0xf0]  ;;  %v6700_v11 = vor.u32 %v7693_v46, %v6699_v63  ;;  %4764 = vmatpush.bf16.msrb.mxu2 %v6972_v43  ;;  %v7675_v48 = vld [vmem:[#allocation3 + $0x3e4] sm:$0xf]  ;;  %v6256_v46 = vor.u32 %v7579_v53, %v6253_v15 }
 0x4ab   : > { %v6955_v57 = vld [vmem:[#allocation3 + $0x660] sm:$0xf]  ;;  %v7757_v29 = vld [vmem:[#allocation3 + $0x66c] sm:$0xf0]  ;;  %v6828_v41 = vor.u32 %v7725_v39, %v6827_v19  ;;  %4777 = vmatpush.bf16.msrb.mxu3 %v7100_v10  ;;  %v3117_v58 = vperm.slane %v9725_v13, 4  ;;  %v3120_v43 = vperm.slane %v9725_v13, 7  ;;  %v6384_v10 = vor.u32 %v7611_v24, %v6381_v26 }
 0x4ac   : > { %v7083_v6 = vld [vmem:[#allocation3 + $0x760] sm:$0xf]  ;;  %v7789_v23 = vld [vmem:[#allocation3 + $0x76c] sm:$0xf0]  ;;  %v6956_v52 = vor.u32 %v7757_v29, %v6955_v57  ;;  %4739 = vmatpush.bf16.msrb.mxu0 %v6700_v11  ;;  %v3118_v19 = vperm.slane %v9725_v13, 5  ;;  %v6512_v39 = vor.u32 %v7643_v32, %v6509_v16 }
 0x4ad   : > { %v6683_v50 = vld [vmem:[#allocation3 + $0x440] sm:$0xf]  ;;  %v7689_v61 = vld [vmem:[#allocation3 + $0x44c] sm:$0xf0]  ;;  %v7084_v9 = vor.u32 %v7789_v23, %v7083_v6  ;;  %4752 = vmatpush.bf16.msrb.mxu1 %v6828_v41  ;;  %v7575_v57 = vld [vmem:[#allocation3 + $0xc4] sm:$0xf]  ;;  %v6640_v23 = vor.u32 %v7675_v48, %v6637_v5 }
 0x4ae   : > { %v6811_v36 = vld [vmem:[#allocation3 + $0x540] sm:$0xf]  ;;  %v7721_v44 = vld [vmem:[#allocation3 + $0x54c] sm:$0xf0]  ;;  %v6684_v33 = vor.u32 %v7689_v61, %v6683_v50  ;;  %4765 = vmatpush.bf16.msrb.mxu2 %v6956_v52  ;;  %v6237_v29 = vld [vmem:[#allocation3 + $0xd0] sm:$0xf0]  ;;  %v9747_v50 = vpack.c.bf16 %v3119_v60, %v3119_v60 }
 0x4af   : > { %v6939_v37 = vld [vmem:[#allocation3 + $0x640] sm:$0xf]  ;;  %v7753_v18 = vld [vmem:[#allocation3 + $0x64c] sm:$0xf0]  ;;  %v6812_v14 = vor.u32 %v7721_v44, %v6811_v36  ;;  %4778 = vmatpush.bf16.msrb.mxu3 %v7084_v9  ;;  %v7607_v6 = vld [vmem:[#allocation3 + $0x1c4] sm:$0xf]  ;;  %v9749_v9 = vpack.c.bf16 %v3117_v58, %v3117_v58  ;;  %v9751_v44 = vpack.c.bf16 %v3120_v43, %v3120_v43  ;;  %v6240_v13 = vor.u32 %v7575_v57, %v6237_v29 }
 0x4b0   : > { %v7067_v21 = vld [vmem:[#allocation3 + $0x740] sm:$0xf]  ;;  %v7785_v47 = vld [vmem:[#allocation3 + $0x74c] sm:$0xf0]  ;;  %v6940_v40 = vor.u32 %v7753_v18, %v6939_v37  ;;  %4740 = vmatpush.bf16.msrb.mxu0 %v6684_v33  ;;  %v6365_v11 = vld [vmem:[#allocation3 + $0x1d0] sm:$0xf0]  ;;  %v9753_v37 = vpack.c.bf16 %v3118_v19, %v3118_v19 }
 0x4b1   : > { %v6667_v62 = vld [vmem:[#allocation3 + $0x420] sm:$0xf]  ;;  %v7685_v2 = vld [vmem:[#allocation3 + $0x42c] sm:$0xf0]  ;;  %v7068_v54 = vor.u32 %v7785_v47, %v7067_v21  ;;  %4753 = vmatpush.bf16.msrb.mxu1 %v6812_v14  ;;  %v7639_v41 = vld [vmem:[#allocation3 + $0x2c4] sm:$0xf]  ;;  %v6368_v18 = vor.u32 %v7607_v6, %v6365_v11 }
 0x4b2   : > { %v6795_v7 = vld [vmem:[#allocation3 + $0x520] sm:$0xf]  ;;  %v7717_v20 = vld [vmem:[#allocation3 + $0x52c] sm:$0xf0]  ;;  %v6668_v30 = vor.u32 %v7685_v2, %v6667_v62  ;;  %4766 = vmatpush.bf16.msrb.mxu2 %v6940_v40  ;;  %v6493_v52 = vld [vmem:[#allocation3 + $0x2d0] sm:$0xf0] }
 0x4b3   : > { %v6923_v1 = vld [vmem:[#allocation3 + $0x620] sm:$0xf]  ;;  %v7749_v17 = vld [vmem:[#allocation3 + $0x62c] sm:$0xf0]  ;;  %v6796_v3 = vor.u32 %v7717_v20, %v6795_v7  ;;  %4779 = vmatpush.bf16.msrb.mxu3 %v7068_v54  ;;  %v7671_v61 = vld [vmem:[#allocation3 + $0x3c4] sm:$0xf]  ;;  %v6496_v21 = vor.u32 %v7639_v41, %v6493_v52 }
 0x4b4   : > { %v7051_v28 = vld [vmem:[#allocation3 + $0x720] sm:$0xf]  ;;  %v7781_v27 = vld [vmem:[#allocation3 + $0x72c] sm:$0xf0]  ;;  %v6924_v55 = vor.u32 %v7749_v17, %v6923_v1  ;;  %4741 = vmatpush.bf16.msrb.mxu0 %v6668_v30  ;;  %v6621_v36 = vld [vmem:[#allocation3 + $0x3d0] sm:$0xf0] }
 0x4b5   : > { %v6651_v22 = vld [vmem:[#allocation3 + $0x400] sm:$0xf]  ;;  %v7681_v8 = vld [vmem:[#allocation3 + $0x40c] sm:$0xf0]  ;;  %v7052_v25 = vor.u32 %v7781_v27, %v7051_v28  ;;  %4754 = vmatpush.bf16.msrb.mxu1 %v6796_v3  ;;  %v7571_v47 = vld [vmem:[#allocation3 + $0xa4] sm:$0xf]  ;;  %v6624_v40 = vor.u32 %v7671_v61, %v6621_v36 }
 0x4b6   : > { %v6779_v49 = vld [vmem:[#allocation3 + $0x500] sm:$0xf]  ;;  %v7713_v31 = vld [vmem:[#allocation3 + $0x50c] sm:$0xf0]  ;;  %v6652_v59 = vor.u32 %v7681_v8, %v6651_v22  ;;  %4767 = vmatpush.bf16.msrb.mxu2 %v6924_v55  ;;  %v6221_v33 = vld [vmem:[#allocation3 + $0xb0] sm:$0xf0] }
 0x4b7   : > { %v6907_v42 = vld [vmem:[#allocation3 + $0x600] sm:$0xf]  ;;  %v7745_v45 = vld [vmem:[#allocation3 + $0x60c] sm:$0xf0]  ;;  %v6780_v51 = vor.u32 %v7713_v31, %v6779_v49  ;;  %4780 = vmatpush.bf16.msrb.mxu3 %v7052_v25  ;;  %v7603_v14 = vld [vmem:[#allocation3 + $0x1a4] sm:$0xf]  ;;  %v6224_v1 = vor.u32 %v7571_v47, %v6221_v33 }
 0x4b8   : > { %v7035_v34 = vld [vmem:[#allocation3 + $0x700] sm:$0xf]  ;;  %v7777_v38 = vld [vmem:[#allocation3 + $0x70c] sm:$0xf0]  ;;  %v6908_v4 = vor.u32 %v7745_v45, %v6907_v42  ;;  %4742 = vmatpush.bf16.msrb.mxu0 %v6652_v59  ;;  %v6349_v62 = vld [vmem:[#allocation3 + $0x1b0] sm:$0xf0] }
 0x4b9   : > { %v7036_v63 = vor.u32 %v7777_v38, %v7035_v34  ;;  %4755 = vmatpush.bf16.msrb.mxu1 %v6780_v51  ;;  %v7635_v2 = vld [vmem:[#allocation3 + $0x2a4] sm:$0xf]  ;;  %v6477_v7 = vld [vmem:[#allocation3 + $0x2b0] sm:$0xf0]  ;;  %v6352_v17 = vor.u32 %v7603_v14, %v6349_v62 }
 0x4ba   : > { %4768 = vmatpush.bf16.msrb.mxu2 %v6908_v4  ;;  %v7667_v54 = vld [vmem:[#allocation3 + $0x3a4] sm:$0xf]  ;;  %v6605_v20 = vld [vmem:[#allocation3 + $0x3b0] sm:$0xf0]  ;;  %v6480_v28 = vor.u32 %v7635_v2, %v6477_v7 }
 0x4bb   : > { %4781 = vmatpush.bf16.msrb.mxu3 %v7036_v63  ;;  %4743 = vmatmul.bf16.vlgmr.msrb.gmra.mxu0 %v9749_v9  ;;  %v7567_v27 = vld [vmem:[#allocation3 + $0x84] sm:$0xf]  ;;  %v6205_v30 = vld [vmem:[#allocation3 + $0x90] sm:$0xf0]  ;;  %v6608_v8 = vor.u32 %v7667_v54, %v6605_v20 }
 0x4bc   : > { %4787 = vmatpush.bf16.msra.mxu0 %v6256_v46  ;;  %4756 = vmatmul.bf16.vlgmr.msrb.gmra.mxu1 %v9753_v37  ;;  %v7599_v22 = vld [vmem:[#allocation3 + $0x184] sm:$0xf]  ;;  %v6333_v60 = vld [vmem:[#allocation3 + $0x190] sm:$0xf0]  ;;  %v6208_v42 = vor.u32 %v7567_v27, %v6205_v30 }
 0x4bd   : > { %4800 = vmatpush.bf16.msra.mxu1 %v6384_v10  ;;  %4769 = vmatmul.bf16.vlgmr.msrb.gmra.mxu2 %v9747_v50  ;;  %v7631_v3 = vld [vmem:[#allocation3 + $0x284] sm:$0xf]  ;;  %v6461_v55 = vld [vmem:[#allocation3 + $0x290] sm:$0xf0]  ;;  %v6336_v25 = vor.u32 %v7599_v22, %v6333_v60 }
 0x4be   : > { %4813 = vmatpush.bf16.msra.mxu2 %v6512_v39  ;;  %4782 = vmatmul.bf16.vlgmr.msrb.gmra.mxu3 %v9751_v44  ;;  %v7663_v49 = vld [vmem:[#allocation3 + $0x384] sm:$0xf]  ;;  %v6589_v31 = vld [vmem:[#allocation3 + $0x390] sm:$0xf0]  ;;  %v6464_v45 = vor.u32 %v7631_v3, %v6461_v55 }
 0x4bf   : > { %4826 = vmatpush.bf16.msra.mxu3 %v6640_v23  ;;  %v7563_v34 = vld [vmem:[#allocation3 + $0x64] sm:$0xf]  ;;  %v6189_v38 = vld [vmem:[#allocation3 + $0x70] sm:$0xf0]  ;;  %v6592_v15 = vor.u32 %v7663_v49, %v6589_v31 }
 0x4c0   : > { %4788 = vmatpush.bf16.msra.mxu0 %v6240_v13  ;;  %v7595_v53 = vld [vmem:[#allocation3 + $0x164] sm:$0xf]  ;;  %v6317_v24 = vld [vmem:[#allocation3 + $0x170] sm:$0xf0]  ;;  %v6192_v51 = vor.u32 %v7563_v34, %v6189_v38 }
 0x4c1   : > { %4801 = vmatpush.bf16.msra.mxu1 %v6368_v18  ;;  %v7627_v59 = vld [vmem:[#allocation3 + $0x264] sm:$0xf]  ;;  %v6445_v26 = vld [vmem:[#allocation3 + $0x270] sm:$0xf0]  ;;  %v6320_v4 = vor.u32 %v7595_v53, %v6317_v24 }
 0x4c2   : > { %4814 = vmatpush.bf16.msra.mxu2 %v6496_v21  ;;  %v7659_v32 = vld [vmem:[#allocation3 + $0x364] sm:$0xf]  ;;  %v6573_v16 = vld [vmem:[#allocation3 + $0x370] sm:$0xf0]  ;;  %v6448_v48 = vor.u32 %v7627_v59, %v6445_v26 }
 0x4c3   : > { %4827 = vmatpush.bf16.msra.mxu3 %v6624_v40  ;;  %v7559_v5 = vld [vmem:[#allocation3 + $0x44] sm:$0xf]  ;;  %v6173_v58 = vld [vmem:[#allocation3 + $0x50] sm:$0xf0]  ;;  %v6576_v63 = vor.u32 %v7659_v32, %v6573_v16 }
 0x4c4   : > { %4789 = vmatpush.bf16.msra.mxu0 %v6224_v1  ;;  %v7591_v43 = vld [vmem:[#allocation3 + $0x144] sm:$0xf]  ;;  %v6301_v46 = vld [vmem:[#allocation3 + $0x150] sm:$0xf0]  ;;  %v6176_v29 = vor.u32 %v7559_v5, %v6173_v58 }
 0x4c5   : > { %4802 = vmatpush.bf16.msra.mxu1 %v6352_v17  ;;  %v7623_v19 = vld [vmem:[#allocation3 + $0x244] sm:$0xf]  ;;  %v6429_v10 = vld [vmem:[#allocation3 + $0x250] sm:$0xf0]  ;;  %v6304_v6 = vor.u32 %v7591_v43, %v6301_v46 }
 0x4c6   : > { %4815 = vmatpush.bf16.msra.mxu2 %v6480_v28  ;;  %v7655_v39 = vld [vmem:[#allocation3 + $0x344] sm:$0xf]  ;;  %v6557_v57 = vld [vmem:[#allocation3 + $0x350] sm:$0xf0]  ;;  %v6432_v23 = vor.u32 %v7623_v19, %v6429_v10 }
 0x4c7   : > { %4828 = vmatpush.bf16.msra.mxu3 %v6608_v8  ;;  %v7555_v11 = vld [vmem:[#allocation3 + $0x24] sm:$0xf]  ;;  %v6157_v41 = vld [vmem:[#allocation3 + $0x30] sm:$0xf0]  ;;  %v6560_v61 = vor.u32 %v7655_v39, %v6557_v57 }
 0x4c8   : > { %4790 = vmatpush.bf16.msra.mxu0 %v6208_v42  ;;  %v7587_v52 = vld [vmem:[#allocation3 + $0x124] sm:$0xf]  ;;  %v6285_v36 = vld [vmem:[#allocation3 + $0x130] sm:$0xf0]  ;;  %v6160_v33 = vor.u32 %v7555_v11, %v6157_v41 }
 0x4c9   : > { %4803 = vmatpush.bf16.msra.mxu1 %v6336_v25  ;;  %v7619_v13 = vld [vmem:[#allocation3 + $0x224] sm:$0xf]  ;;  %v6413_v18 = vld [vmem:[#allocation3 + $0x230] sm:$0xf0]  ;;  %v6288_v62 = vor.u32 %v7587_v52, %v6285_v36 }
 0x4ca   : > { %4816 = vmatpush.bf16.msra.mxu2 %v6464_v45  ;;  %v7651_v21 = vld [vmem:[#allocation3 + $0x324] sm:$0xf]  ;;  %v6541_v47 = vld [vmem:[#allocation3 + $0x330] sm:$0xf0]  ;;  %v6416_v2 = vor.u32 %v7619_v13, %v6413_v18 }
 0x4cb   : > { %4829 = vmatpush.bf16.msra.mxu3 %v6592_v15  ;;  %v7551_v14 = vld [vmem:[#allocation3 + $0x4] sm:$0xf]  ;;  %v6141_v40 = vld [vmem:[#allocation3 + $0x10] sm:$0xf0]  ;;  %v6544_v1 = vor.u32 %v7651_v21, %v6541_v47 }
 0x4cc   : > { %4791 = vmatpush.bf16.msra.mxu0 %v6192_v51  ;;  %v7583_v7 = vld [vmem:[#allocation3 + $0x104] sm:$0xf]  ;;  %v6269_v54 = vld [vmem:[#allocation3 + $0x110] sm:$0xf0]  ;;  %v6144_v60 = vor.u32 %v7551_v14, %v6141_v40 }
 0x4cd   : > { %4804 = vmatpush.bf16.msra.mxu1 %v6320_v4  ;;  %v7615_v20 = vld [vmem:[#allocation3 + $0x204] sm:$0xf]  ;;  %v6397_v17 = vld [vmem:[#allocation3 + $0x210] sm:$0xf0]  ;;  %v6272_v31 = vor.u32 %v7583_v7, %v6269_v54 }
 0x4ce   : > { %4817 = vmatpush.bf16.msra.mxu2 %v6448_v48  ;;  %v7647_v28 = vld [vmem:[#allocation3 + $0x304] sm:$0xf]  ;;  %v6525_v27 = vld [vmem:[#allocation3 + $0x310] sm:$0xf0]  ;;  %v6400_v42 = vor.u32 %v7615_v20, %v6397_v17 }
 0x4cf   : > { %4830 = vmatpush.bf16.msra.mxu3 %v6576_v63  ;;  %v7707_v30 = vld [vmem:[#allocation3 + $0x4e4] sm:$0xf]  ;;  %v6765_v22 = vld [vmem:[#allocation3 + $0x4f0] sm:$0xf0]  ;;  %v6528_v34 = vor.u32 %v7647_v28, %v6525_v27 }
 0x4d0   : > { %4792 = vmatpush.bf16.msra.mxu0 %v6176_v29  ;;  %v7739_v8 = vld [vmem:[#allocation3 + $0x5e4] sm:$0xf]  ;;  %v6893_v3 = vld [vmem:[#allocation3 + $0x5f0] sm:$0xf0]  ;;  %v6768_v38 = vor.u32 %v7707_v30, %v6765_v22 }
 0x4d1   : > { %4805 = vmatpush.bf16.msra.mxu1 %v6304_v6  ;;  %v7771_v55 = vld [vmem:[#allocation3 + $0x6e4] sm:$0xf]  ;;  %v7021_v49 = vld [vmem:[#allocation3 + $0x6f0] sm:$0xf0]  ;;  %v6896_v53 = vor.u32 %v7739_v8, %v6893_v3 }
 0x4d2   : > { %4818 = vmatpush.bf16.msra.mxu2 %v6432_v23  ;;  %v7803_v25 = vld [vmem:[#allocation3 + $0x7e4] sm:$0xf]  ;;  %v7149_v45 = vld [vmem:[#allocation3 + $0x7f0] sm:$0xf0]  ;;  %v7024_v15 = vor.u32 %v7771_v55, %v7021_v49 }
 0x4d3   : > { %4831 = vmatpush.bf16.msra.mxu3 %v6560_v61  ;;  %v7703_v24 = vld [vmem:[#allocation3 + $0x4c4] sm:$0xf]  ;;  %v6749_v59 = vld [vmem:[#allocation3 + $0x4d0] sm:$0xf0]  ;;  %v7152_v32 = vor.u32 %v7803_v25, %v7149_v45 }
 0x4d4   : > { %4793 = vmatpush.bf16.msra.mxu0 %v6160_v33  ;;  %v7735_v26 = vld [vmem:[#allocation3 + $0x5c4] sm:$0xf]  ;;  %v6877_v16 = vld [vmem:[#allocation3 + $0x5d0] sm:$0xf0]  ;;  %v6752_v58 = vor.u32 %v7703_v24, %v6749_v59 }
 0x4d5   : > { %4806 = vmatpush.bf16.msra.mxu1 %v6288_v62  ;;  %v7767_v51 = vld [vmem:[#allocation3 + $0x6c4] sm:$0xf]  ;;  %v7005_v4 = vld [vmem:[#allocation3 + $0x6d0] sm:$0xf0]  ;;  %v6880_v43 = vor.u32 %v7735_v26, %v6877_v16 }
 0x4d6   : > { %4819 = vmatpush.bf16.msra.mxu2 %v6416_v2  ;;  %v7799_v48 = vld [vmem:[#allocation3 + $0x7c4] sm:$0xf]  ;;  %v7133_v5 = vld [vmem:[#allocation3 + $0x7d0] sm:$0xf0]  ;;  %v7008_v63 = vor.u32 %v7767_v51, %v7005_v4 }
 0x4d7   : > { %4832 = vmatpush.bf16.msra.mxu3 %v6544_v1  ;;  %v7699_v46 = vld [vmem:[#allocation3 + $0x4a4] sm:$0xf]  ;;  %v6733_v19 = vld [vmem:[#allocation3 + $0x4b0] sm:$0xf0]  ;;  %v7136_v39 = vor.u32 %v7799_v48, %v7133_v5 }
 0x4d8   : > { %4794 = vmatpush.bf16.msra.mxu0 %v6144_v60  ;;  %v7731_v10 = vld [vmem:[#allocation3 + $0x5a4] sm:$0xf]  ;;  %v6861_v57 = vld [vmem:[#allocation3 + $0x5b0] sm:$0xf0]  ;;  %v6736_v41 = vor.u32 %v7699_v46, %v6733_v19 }
 0x4d9   : > { %4807 = vmatpush.bf16.msra.mxu1 %v6272_v31  ;;  %v7763_v29 = vld [vmem:[#allocation3 + $0x6a4] sm:$0xf]  ;;  %v6989_v6 = vld [vmem:[#allocation3 + $0x6b0] sm:$0xf0]  ;;  %v6864_v52 = vor.u32 %v7731_v10, %v6861_v57 }
 0x4da   : > { %4820 = vmatpush.bf16.msra.mxu2 %v6400_v42  ;;  %v7795_v23 = vld [vmem:[#allocation3 + $0x7a4] sm:$0xf]  ;;  %v7117_v11 = vld [vmem:[#allocation3 + $0x7b0] sm:$0xf0]  ;;  %v6992_v61 = vor.u32 %v7763_v29, %v6989_v6 }
 0x4db   : > { %4833 = vmatpush.bf16.msra.mxu3 %v6528_v34  ;;  %4795 = vmatmul.bf16.vlgmr.msra.gmra.mxu0 %v9732_v35  ;;  %v7695_v36 = vld [vmem:[#allocation3 + $0x484] sm:$0xf]  ;;  %v6717_v13 = vld [vmem:[#allocation3 + $0x490] sm:$0xf0]  ;;  %v7120_v21 = vor.u32 %v7795_v23, %v7117_v11 }
 0x4dc   : > { %4839 = vmatpush.bf16.msrb.mxu0 %v6768_v38  ;;  %4808 = vmatmul.bf16.vlgmr.msra.gmra.mxu1 %v9738_v56  ;;  %v7727_v18 = vld [vmem:[#allocation3 + $0x584] sm:$0xf]  ;;  %v6845_v47 = vld [vmem:[#allocation3 + $0x590] sm:$0xf0]  ;;  %v6720_v2 = vor.u32 %v7695_v36, %v6717_v13  ;;  %v6259_v13 = vld [vmem:[#allocation3 + $0xe8] sm:$0xf] }
 0x4dd   : > { %4852 = vmatpush.bf16.msrb.mxu1 %v6896_v53  ;;  %4821 = vmatmul.bf16.vlgmr.msra.gmra.mxu2 %v9730_v12  ;;  %v7759_v33 = vld [vmem:[#allocation3 + $0x684] sm:$0xf]  ;;  %v6973_v14 = vld [vmem:[#allocation3 + $0x690] sm:$0xf0]  ;;  %v6848_v7 = vor.u32 %v7727_v18, %v6845_v47  ;;  %v7582_v18 = vld [vmem:[#allocation3 + $0xf4] sm:$0xf0] }
 0x4de   : > { %4865 = vmatpush.bf16.msrb.mxu2 %v7024_v15  ;;  %4834 = vmatmul.bf16.vlgmr.msra.gmra.mxu3 %v9734_v0  ;;  %v7791_v40 = vld [vmem:[#allocation3 + $0x784] sm:$0xf]  ;;  %v7101_v62 = vld [vmem:[#allocation3 + $0x790] sm:$0xf0]  ;;  %v6976_v54 = vor.u32 %v7759_v33, %v6973_v14  ;;  %v7614_v33 = vld [vmem:[#allocation3 + $0x1f4] sm:$0xf0] }
 0x4df   : > { %4878 = vmatpush.bf16.msrb.mxu3 %v7152_v32  ;;  %v7691_v20 = vld [vmem:[#allocation3 + $0x464] sm:$0xf]  ;;  %v6701_v1 = vld [vmem:[#allocation3 + $0x470] sm:$0xf0]  ;;  %v7104_v28 = vor.u32 %v7791_v40, %v7101_v62  ;;  %v6515_v14 = vld [vmem:[#allocation3 + $0x2e8] sm:$0xf] }
 0x4e0   : > { %4840 = vmatpush.bf16.msrb.mxu0 %v6752_v58  ;;  %v7723_v17 = vld [vmem:[#allocation3 + $0x564] sm:$0xf]  ;;  %v6829_v27 = vld [vmem:[#allocation3 + $0x570] sm:$0xf0]  ;;  %v6704_v3 = vor.u32 %v7691_v20, %v6701_v1  ;;  %v7646_v40 = vld [vmem:[#allocation3 + $0x2f4] sm:$0xf0]  ;;  %v6260_v1 = vor.u32 %v7582_v18, %v6259_v13 }
 0x4e1   : > { %4853 = vmatpush.bf16.msrb.mxu1 %v6880_v43  ;;  %v7755_v30 = vld [vmem:[#allocation3 + $0x664] sm:$0xf]  ;;  %v6957_v22 = vld [vmem:[#allocation3 + $0x670] sm:$0xf0]  ;;  %v6832_v55 = vor.u32 %v7723_v17, %v6829_v27  ;;  %v6243_v27 = vld [vmem:[#allocation3 + $0xc8] sm:$0xf] }
 0x4e2   : > { %4866 = vmatpush.bf16.msrb.mxu2 %v7008_v63  ;;  %v7787_v8 = vld [vmem:[#allocation3 + $0x764] sm:$0xf]  ;;  %v7085_v60 = vld [vmem:[#allocation3 + $0x770] sm:$0xf0]  ;;  %v6960_v49 = vor.u32 %v7755_v30, %v6957_v22  ;;  %v7578_v30 = vld [vmem:[#allocation3 + $0xd4] sm:$0xf0] }
 0x4e3   : > { %4879 = vmatpush.bf16.msrb.mxu3 %v7136_v39  ;;  %v7687_v31 = vld [vmem:[#allocation3 + $0x444] sm:$0xf]  ;;  %v6685_v42 = vld [vmem:[#allocation3 + $0x450] sm:$0xf0]  ;;  %v7088_v45 = vor.u32 %v7787_v8, %v7085_v60  ;;  %v6371_v22 = vld [vmem:[#allocation3 + $0x1c8] sm:$0xf] }
 0x4e4   : > { %4841 = vmatpush.bf16.msrb.mxu0 %v6736_v41  ;;  %v7719_v25 = vld [vmem:[#allocation3 + $0x544] sm:$0xf]  ;;  %v6813_v34 = vld [vmem:[#allocation3 + $0x550] sm:$0xf0]  ;;  %v6688_v59 = vor.u32 %v7687_v31, %v6685_v42  ;;  %v7610_v60 = vld [vmem:[#allocation3 + $0x1d4] sm:$0xf0]  ;;  %v6244_v42 = vor.u32 %v7578_v30, %v6243_v27 }
 0x4e5   : > { %4854 = vmatpush.bf16.msrb.mxu1 %v6864_v52  ;;  %v7751_v38 = vld [vmem:[#allocation3 + $0x644] sm:$0xf]  ;;  %v6941_v53 = vld [vmem:[#allocation3 + $0x650] sm:$0xf0]  ;;  %v6816_v26 = vor.u32 %v7719_v25, %v6813_v34  ;;  %v7674_v31 = vld [vmem:[#allocation3 + $0x3d4] sm:$0xf0]  ;;  %v6372_v25 = vor.u32 %v7610_v60, %v6371_v22 }
 0x4e6   : > { %4867 = vmatpush.bf16.msrb.mxu2 %v6992_v61  ;;  %v7783_v15 = vld [vmem:[#allocation3 + $0x744] sm:$0xf]  ;;  %v7069_v24 = vld [vmem:[#allocation3 + $0x750] sm:$0xf0]  ;;  %v6944_v32 = vor.u32 %v7751_v38, %v6941_v53  ;;  %v6227_v34 = vld [vmem:[#allocation3 + $0xa8] sm:$0xf] }
 0x4e7   : > { %4880 = vmatpush.bf16.msrb.mxu3 %v7120_v21  ;;  %v7683_v16 = vld [vmem:[#allocation3 + $0x424] sm:$0xf]  ;;  %v6669_v51 = vld [vmem:[#allocation3 + $0x430] sm:$0xf0]  ;;  %v7072_v48 = vor.u32 %v7783_v15, %v7069_v24  ;;  %v6387_v21 = vld [vmem:[#allocation3 + $0x1e8] sm:$0xf] }
 0x4e8   : > { %4842 = vmatpush.bf16.msrb.mxu0 %v6720_v2  ;;  %v7715_v4 = vld [vmem:[#allocation3 + $0x524] sm:$0xf]  ;;  %v6797_v5 = vld [vmem:[#allocation3 + $0x530] sm:$0xf0]  ;;  %v6672_v19 = vor.u32 %v7683_v16, %v6669_v51  ;;  %v6388_v17 = vor.u32 %v7614_v33, %v6387_v21  ;;  %v7574_v38 = vld [vmem:[#allocation3 + $0xb4] sm:$0xf0] }
 0x4e9   : > { %4855 = vmatpush.bf16.msrb.mxu1 %v6848_v7  ;;  %v7747_v58 = vld [vmem:[#allocation3 + $0x624] sm:$0xf]  ;;  %v6925_v43 = vld [vmem:[#allocation3 + $0x630] sm:$0xf0]  ;;  %v6800_v57 = vor.u32 %v7715_v4, %v6797_v5  ;;  %v6643_v7 = vld [vmem:[#allocation3 + $0x3e8] sm:$0xf]  ;;  %v6228_v51 = vor.u32 %v7574_v38, %v6227_v34 }
 0x4ea   : > { %4868 = vmatpush.bf16.msrb.mxu2 %v6976_v54  ;;  %v7779_v63 = vld [vmem:[#allocation3 + $0x724] sm:$0xf]  ;;  %v7053_v46 = vld [vmem:[#allocation3 + $0x730] sm:$0xf0]  ;;  %v6928_v29 = vor.u32 %v7747_v58, %v6925_v43  ;;  %v7678_v54 = vld [vmem:[#allocation3 + $0x3f4] sm:$0xf0] }
 0x4eb   : > { %4881 = vmatpush.bf16.msrb.mxu3 %v7104_v28  ;;  %v7679_v10 = vld [vmem:[#allocation3 + $0x404] sm:$0xf]  ;;  %v6653_v39 = vld [vmem:[#allocation3 + $0x410] sm:$0xf0]  ;;  %v7056_v41 = vor.u32 %v7779_v63, %v7053_v46  ;;  %v6516_v28 = vor.u32 %v7646_v40, %v6515_v14  ;;  %v6644_v8 = vor.u32 %v7678_v54, %v6643_v7  ;;  %v6355_v53 = vld [vmem:[#allocation3 + $0x1a8] sm:$0xf] }
 0x4ec   : > { %4843 = vmatpush.bf16.msrb.mxu0 %v6704_v3  ;;  %v7711_v6 = vld [vmem:[#allocation3 + $0x504] sm:$0xf]  ;;  %v6781_v23 = vld [vmem:[#allocation3 + $0x510] sm:$0xf0]  ;;  %v6656_v47 = vor.u32 %v7679_v10, %v6653_v39  ;;  %v6499_v3 = vld [vmem:[#allocation3 + $0x2c8] sm:$0xf] }
 0x4ed   : > { %4856 = vmatpush.bf16.msrb.mxu1 %v6832_v55  ;;  %v7743_v11 = vld [vmem:[#allocation3 + $0x604] sm:$0xf]  ;;  %v6909_v52 = vld [vmem:[#allocation3 + $0x610] sm:$0xf0]  ;;  %v6784_v62 = vor.u32 %v7711_v6, %v6781_v23  ;;  %v7642_v55 = vld [vmem:[#allocation3 + $0x2d4] sm:$0xf0] }
 0x4ee   : > { %4869 = vmatpush.bf16.msrb.mxu2 %v6960_v49  ;;  %v7775_v61 = vld [vmem:[#allocation3 + $0x704] sm:$0xf]  ;;  %v7037_v36 = vld [vmem:[#allocation3 + $0x710] sm:$0xf0]  ;;  %v6912_v2 = vor.u32 %v7743_v11, %v6909_v52  ;;  %v6627_v49 = vld [vmem:[#allocation3 + $0x3c8] sm:$0xf] }
 0x4ef   : > { %4882 = vmatpush.bf16.msrb.mxu3 %v7088_v45  ;;  %v7040_v20 = vor.u32 %v7775_v61, %v7037_v36  ;;  %v6500_v45 = vor.u32 %v7642_v55, %v6499_v3  ;;  %v6628_v15 = vor.u32 %v7674_v31, %v6627_v49  ;;  %v7606_v24 = vld [vmem:[#allocation3 + $0x1b4] sm:$0xf0]  ;;  %v6211_v5 = vld [vmem:[#allocation3 + $0x88] sm:$0xf] }
 0x4f0   : > { %4844 = vmatpush.bf16.msrb.mxu0 %v6688_v59  ;;  %v6483_v59 = vld [vmem:[#allocation3 + $0x2a8] sm:$0xf]  ;;  %v7670_v16 = vld [vmem:[#allocation3 + $0x3b4] sm:$0xf0]  ;;  %v6356_v4 = vor.u32 %v7606_v24, %v6355_v53 }
 0x4f1   : > { %4857 = vmatpush.bf16.msrb.mxu1 %v6816_v26  ;;  %v7638_v26 = vld [vmem:[#allocation3 + $0x2b4] sm:$0xf0]  ;;  %v6339_v43 = vld [vmem:[#allocation3 + $0x188] sm:$0xf] }
 0x4f2   : > { %4870 = vmatpush.bf16.msrb.mxu2 %v6944_v32  ;;  %v6611_v32 = vld [vmem:[#allocation3 + $0x3a8] sm:$0xf]  ;;  %v7570_v58 = vld [vmem:[#allocation3 + $0x94] sm:$0xf0] }
 0x4f3   : > { %4883 = vmatpush.bf16.msrb.mxu3 %v7072_v48  ;;  %v6484_v48 = vor.u32 %v7638_v26, %v6483_v59  ;;  %v6612_v63 = vor.u32 %v7670_v16, %v6611_v32  ;;  %v7602_v46 = vld [vmem:[#allocation3 + $0x194] sm:$0xf0]  ;;  %v6595_v39 = vld [vmem:[#allocation3 + $0x388] sm:$0xf] }
 0x4f4   : > { %4845 = vmatpush.bf16.msrb.mxu0 %v6672_v19  ;;  %v6467_v19 = vld [vmem:[#allocation3 + $0x288] sm:$0xf]  ;;  %v7634_v10 = vld [vmem:[#allocation3 + $0x294] sm:$0xf0]  ;;  %v6340_v6 = vor.u32 %v7602_v46, %v6339_v43 }
 0x4f5   : > { %4858 = vmatpush.bf16.msrb.mxu1 %v6800_v57  ;;  %v7666_v57 = vld [vmem:[#allocation3 + $0x394] sm:$0xf0]  ;;  %v6468_v23 = vor.u32 %v7634_v10, %v6467_v19  ;;  %v6195_v11 = vld [vmem:[#allocation3 + $0x68] sm:$0xf] }
 0x4f6   : > { %4871 = vmatpush.bf16.msrb.mxu2 %v6928_v29  ;;  %v6212_v29 = vor.u32 %v7570_v58, %v6211_v5  ;;  %v6323_v52 = vld [vmem:[#allocation3 + $0x168] sm:$0xf]  ;;  %v6596_v61 = vor.u32 %v7666_v57, %v6595_v39  ;;  %v7598_v36 = vld [vmem:[#allocation3 + $0x174] sm:$0xf0] }
 0x4f7   : > { %4884 = vmatpush.bf16.msrb.mxu3 %v7056_v41  ;;  %v7566_v41 = vld [vmem:[#allocation3 + $0x74] sm:$0xf0]  ;;  %v6451_v13 = vld [vmem:[#allocation3 + $0x268] sm:$0xf]  ;;  %v6324_v14 = vor.u32 %v7598_v36, %v6323_v52 }
 0x4f8   : > { %4846 = vmatpush.bf16.msrb.mxu0 %v6656_v47  ;;  %v7630_v18 = vld [vmem:[#allocation3 + $0x274] sm:$0xf0]  ;;  %v6579_v21 = vld [vmem:[#allocation3 + $0x368] sm:$0xf]  ;;  %v6196_v33 = vor.u32 %v7566_v41, %v6195_v11 }
 0x4f9   : > { %4859 = vmatpush.bf16.msrb.mxu1 %v6784_v62  ;;  %v7662_v47 = vld [vmem:[#allocation3 + $0x374] sm:$0xf0]  ;;  %v6452_v40 = vor.u32 %v7630_v18, %v6451_v13  ;;  %v6179_v62 = vld [vmem:[#allocation3 + $0x48] sm:$0xf] }
 0x4fa   : > { %4872 = vmatpush.bf16.msrb.mxu2 %v6912_v2  ;;  %v7562_v2 = vld [vmem:[#allocation3 + $0x54] sm:$0xf0]  ;;  %v6307_v7 = vld [vmem:[#allocation3 + $0x148] sm:$0xf]  ;;  %v6580_v54 = vor.u32 %v7662_v47, %v6579_v21 }
 0x4fb   : > { %4885 = vmatpush.bf16.msrb.mxu3 %v7040_v20  ;;  %4847 = vmatmul.bf16.vlgmr.msrb.gmra.mxu0 %v9749_v9  ;;  %v7594_v20 = vld [vmem:[#allocation3 + $0x154] sm:$0xf0]  ;;  %v6180_v30 = vor.u32 %v7562_v2, %v6179_v62  ;;  %v6163_v60 = vld [vmem:[#allocation3 + $0x28] sm:$0xf] }
 0x4fc   : > { %4891 = vmatpush.bf16.msra.mxu0 %v6260_v1  ;;  %4860 = vmatmul.bf16.vlgmr.msrb.gmra.mxu1 %v9753_v37  ;;  %v6435_v1 = vld [vmem:[#allocation3 + $0x248] sm:$0xf]  ;;  %v7658_v27 = vld [vmem:[#allocation3 + $0x354] sm:$0xf0]  ;;  %v6308_v22 = vor.u32 %v7594_v20, %v6307_v7 }
 0x4fd   : > { %4904 = vmatpush.bf16.msra.mxu1 %v6388_v17  ;;  %4873 = vmatmul.bf16.vlgmr.msrb.gmra.mxu2 %v9747_v50  ;;  %v7626_v17 = vld [vmem:[#allocation3 + $0x254] sm:$0xf0]  ;;  %v6291_v55 = vld [vmem:[#allocation3 + $0x128] sm:$0xf] }
 0x4fe   : > { %4917 = vmatpush.bf16.msra.mxu2 %v6516_v28  ;;  %4886 = vmatmul.bf16.vlgmr.msrb.gmra.mxu3 %v9751_v44  ;;  %v6563_v28 = vld [vmem:[#allocation3 + $0x348] sm:$0xf]  ;;  %v7558_v3 = vld [vmem:[#allocation3 + $0x34] sm:$0xf0] }
 0x4ff   : > { %4930 = vmatpush.bf16.msra.mxu3 %v6644_v8  ;;  %v6436_v8 = vor.u32 %v7626_v17, %v6435_v1  ;;  %v6564_v49 = vor.u32 %v7658_v27, %v6563_v28  ;;  %v7590_v31 = vld [vmem:[#allocation3 + $0x134] sm:$0xf0]  ;;  %v6164_v38 = vor.u32 %v7558_v3, %v6163_v60  ;;  %v6147_v53 = vld [vmem:[#allocation3 + $0x8] sm:$0xf] }
 0x500   : > { %4892 = vmatpush.bf16.msra.mxu0 %v6244_v42  ;;  %v6419_v42 = vld [vmem:[#allocation3 + $0x228] sm:$0xf]  ;;  %v7654_v34 = vld [vmem:[#allocation3 + $0x334] sm:$0xf0]  ;;  %v6292_v24 = vor.u32 %v7590_v31, %v6291_v55 }
 0x501   : > { %4905 = vmatpush.bf16.msra.mxu1 %v6372_v25  ;;  %v7622_v25 = vld [vmem:[#allocation3 + $0x234] sm:$0xf0]  ;;  %v6275_v26 = vld [vmem:[#allocation3 + $0x108] sm:$0xf] }
 0x502   : > { %4918 = vmatpush.bf16.msra.mxu2 %v6500_v45  ;;  %v6547_v45 = vld [vmem:[#allocation3 + $0x328] sm:$0xf]  ;;  %v6420_v59 = vor.u32 %v7622_v25, %v6419_v42  ;;  %v7586_v32 = vld [vmem:[#allocation3 + $0x114] sm:$0xf0] }
 0x503   : > { %4931 = vmatpush.bf16.msra.mxu3 %v6628_v15  ;;  %v7554_v15 = vld [vmem:[#allocation3 + $0x14] sm:$0xf0]  ;;  %v6403_v16 = vld [vmem:[#allocation3 + $0x208] sm:$0xf]  ;;  %v6276_v57 = vor.u32 %v7586_v32, %v6275_v26 }
 0x504   : > { %4893 = vmatpush.bf16.msra.mxu0 %v6228_v51  ;;  %v6548_v51 = vor.u32 %v7654_v34, %v6547_v45  ;;  %v7650_v5 = vld [vmem:[#allocation3 + $0x314] sm:$0xf0]  ;;  %v6771_v58 = vld [vmem:[#allocation3 + $0x4e8] sm:$0xf]  ;;  %v6148_v46 = vor.u32 %v7554_v15, %v6147_v53 }
 0x505   : > { %4906 = vmatpush.bf16.msra.mxu1 %v6356_v4  ;;  %v7618_v4 = vld [vmem:[#allocation3 + $0x214] sm:$0xf0]  ;;  %v7027_v10 = vld [vmem:[#allocation3 + $0x6e8] sm:$0xf] }
 0x506   : > { %4919 = vmatpush.bf16.msra.mxu2 %v6484_v48  ;;  %v6531_v48 = vld [vmem:[#allocation3 + $0x308] sm:$0xf]  ;;  %v7710_v43 = vld [vmem:[#allocation3 + $0x4f4] sm:$0xf0] }
 0x507   : > { %4932 = vmatpush.bf16.msra.mxu3 %v6612_v63  ;;  %v6899_v63 = vld [vmem:[#allocation3 + $0x5e8] sm:$0xf]  ;;  %v7742_v19 = vld [vmem:[#allocation3 + $0x5f4] sm:$0xf0]  ;;  %v6532_v11 = vor.u32 %v7650_v5, %v6531_v48  ;;  %v6772_v41 = vor.u32 %v7710_v43, %v6771_v58 }
 0x508   : > { %4894 = vmatpush.bf16.msra.mxu0 %v6212_v29  ;;  %v7774_v39 = vld [vmem:[#allocation3 + $0x6f4] sm:$0xf0]  ;;  %v6404_v29 = vor.u32 %v7618_v4, %v6403_v16  ;;  %v6900_v52 = vor.u32 %v7742_v19, %v6899_v63  ;;  %v6755_v36 = vld [vmem:[#allocation3 + $0x4c8] sm:$0xf] }
 0x509   : > { %4907 = vmatpush.bf16.msra.mxu1 %v6340_v6  ;;  %v7155_v6 = vld [vmem:[#allocation3 + $0x7e8] sm:$0xf]  ;;  %v7706_v13 = vld [vmem:[#allocation3 + $0x4d4] sm:$0xf0] }
 0x50a   : > { %4920 = vmatpush.bf16.msra.mxu2 %v6468_v23  ;;  %v7806_v23 = vld [vmem:[#allocation3 + $0x7f4] sm:$0xf0]  ;;  %v6883_v18 = vld [vmem:[#allocation3 + $0x5c8] sm:$0xf]  ;;  %v6756_v2 = vor.u32 %v7706_v13, %v6755_v36 }
 0x50b   : > { %4933 = vmatpush.bf16.msra.mxu3 %v6596_v61  ;;  %v7028_v61 = vor.u32 %v7774_v39, %v7027_v10  ;;  %v7156_v21 = vor.u32 %v7806_v23, %v7155_v6  ;;  %v7738_v47 = vld [vmem:[#allocation3 + $0x5d4] sm:$0xf0]  ;;  %v6739_v20 = vld [vmem:[#allocation3 + $0x4a8] sm:$0xf] }
 0x50c   : > { %4895 = vmatpush.bf16.msra.mxu0 %v6196_v33  ;;  %v7011_v33 = vld [vmem:[#allocation3 + $0x6c8] sm:$0xf]  ;;  %v7802_v62 = vld [vmem:[#allocation3 + $0x7d4] sm:$0xf0]  ;;  %v6884_v7 = vor.u32 %v7738_v47, %v6883_v18 }
 0x50d   : > { %4908 = vmatpush.bf16.msra.mxu1 %v6324_v14  ;;  %v7770_v14 = vld [vmem:[#allocation3 + $0x6d4] sm:$0xf0]  ;;  %v6867_v17 = vld [vmem:[#allocation3 + $0x5a8] sm:$0xf] }
 0x50e   : > { %4921 = vmatpush.bf16.msra.mxu2 %v6452_v40  ;;  %v7139_v40 = vld [vmem:[#allocation3 + $0x7c8] sm:$0xf]  ;;  %v7702_v1 = vld [vmem:[#allocation3 + $0x4b4] sm:$0xf0] }
 0x50f   : > { %4934 = vmatpush.bf16.msra.mxu3 %v6580_v54  ;;  %v7012_v54 = vor.u32 %v7770_v14, %v7011_v33  ;;  %v7140_v28 = vor.u32 %v7802_v62, %v7139_v40  ;;  %v7734_v27 = vld [vmem:[#allocation3 + $0x5b4] sm:$0xf0]  ;;  %v6740_v3 = vor.u32 %v7702_v1, %v6739_v20  ;;  %v6723_v31 = vld [vmem:[#allocation3 + $0x488] sm:$0xf] }
 0x510   : > { %4896 = vmatpush.bf16.msra.mxu0 %v6180_v30  ;;  %v6995_v30 = vld [vmem:[#allocation3 + $0x6a8] sm:$0xf]  ;;  %v7798_v60 = vld [vmem:[#allocation3 + $0x7b4] sm:$0xf0]  ;;  %v6868_v55 = vor.u32 %v7734_v27, %v6867_v17 }
 0x511   : > { %4909 = vmatpush.bf16.msra.mxu1 %v6308_v22  ;;  %v7766_v22 = vld [vmem:[#allocation3 + $0x6b4] sm:$0xf0]  ;;  %v6851_v25 = vld [vmem:[#allocation3 + $0x588] sm:$0xf] }
 0x512   : > { %4922 = vmatpush.bf16.msra.mxu2 %v6436_v8  ;;  %v7123_v8 = vld [vmem:[#allocation3 + $0x7a8] sm:$0xf]  ;;  %v7698_v42 = vld [vmem:[#allocation3 + $0x494] sm:$0xf0] }
 0x513   : > { %4935 = vmatpush.bf16.msra.mxu3 %v6564_v49  ;;  %v6996_v49 = vor.u32 %v7766_v22, %v6995_v30  ;;  %v7124_v45 = vor.u32 %v7798_v60, %v7123_v8  ;;  %v7730_v34 = vld [vmem:[#allocation3 + $0x594] sm:$0xf0]  ;;  %v7107_v15 = vld [vmem:[#allocation3 + $0x788] sm:$0xf] }
 0x514   : > { %4897 = vmatpush.bf16.msra.mxu0 %v6164_v38  ;;  %v6979_v38 = vld [vmem:[#allocation3 + $0x688] sm:$0xf]  ;;  %v7762_v53 = vld [vmem:[#allocation3 + $0x694] sm:$0xf0]  ;;  %v6852_v32 = vor.u32 %v7730_v34, %v6851_v25 }
 0x515   : > { %4910 = vmatpush.bf16.msra.mxu1 %v6292_v24  ;;  %v7794_v24 = vld [vmem:[#allocation3 + $0x794] sm:$0xf0]  ;;  %v6707_v26 = vld [vmem:[#allocation3 + $0x468] sm:$0xf]  ;;  %v6980_v16 = vor.u32 %v7762_v53, %v6979_v38 }
 0x516   : > { %4923 = vmatpush.bf16.msra.mxu2 %v6420_v59  ;;  %v6724_v59 = vor.u32 %v7698_v42, %v6723_v31  ;;  %v6835_v4 = vld [vmem:[#allocation3 + $0x568] sm:$0xf]  ;;  %v7726_v48 = vld [vmem:[#allocation3 + $0x574] sm:$0xf0]  ;;  %v7108_v5 = vor.u32 %v7794_v24, %v7107_v15 }
 0x517   : > { %4936 = vmatpush.bf16.msra.mxu3 %v6548_v51  ;;  %v7694_v51 = vld [vmem:[#allocation3 + $0x474] sm:$0xf0]  ;;  %v6963_v58 = vld [vmem:[#allocation3 + $0x668] sm:$0xf] }
 0x518   : > { %4898 = vmatpush.bf16.msra.mxu0 %v6148_v46  ;;  %v7758_v43 = vld [vmem:[#allocation3 + $0x674] sm:$0xf0]  ;;  %v7091_v46 = vld [vmem:[#allocation3 + $0x768] sm:$0xf]  ;;  %v6708_v10 = vor.u32 %v7694_v51, %v6707_v26  ;;  %v4692_v47 = vpop.f32.mrf.mxu0  ;;  %v7580_v26 = vld [vmem:[#allocation3 + $0xec] sm:$0xf] }
 0x519   : > { %4911 = vmatpush.bf16.msra.mxu1 %v6276_v57  ;;  %v9774_v63 = vld [vmem:[%s10292_s8] sm:$0xf]  ;;  %v6691_v39 = vld [vmem:[#allocation3 + $0x448] sm:$0xf]  ;;  %v6836_v57 = vor.u32 %v7726_v48, %v6835_v4  ;;  %v6389_v4 = vld [vmem:[#allocation3 + $0x1f8] sm:$0xf0] }
 0x51a   : > { %4924 = vmatpush.bf16.msra.mxu2 %v6404_v29  ;;  %v7790_v19 = vld [vmem:[#allocation3 + $0x774] sm:$0xf0]  ;;  %v6964_v29 = vor.u32 %v7758_v43, %v6963_v58  ;;  %v6819_v23 = vld [vmem:[#allocation3 + $0x548] sm:$0xf]  ;;  %v7644_v48 = vld [vmem:[#allocation3 + $0x2ec] sm:$0xf] }
 0x51b   : > { %4937 = vmatpush.bf16.msra.mxu3 %v6532_v11  ;;  %4899 = vmatmul.bf16.vlgmr.msra.gmra.mxu0 %v9732_v35  ;;  %v7690_v6 = vld [vmem:[#allocation3 + $0x454] sm:$0xf0]  ;;  %v4675_v11 = vperm.slane %v9774_v63, 0  ;;  %v7075_v13 = vld [vmem:[#allocation3 + $0x748] sm:$0xf] }
 0x51c   : > { %4943 = vmatpush.bf16.msrb.mxu0 %v6772_v41  ;;  %4912 = vmatmul.bf16.vlgmr.msra.gmra.mxu1 %v9738_v56  ;;  %v7092_v41 = vor.u32 %v7790_v19, %v7091_v46  ;;  %v7754_v36 = vld [vmem:[#allocation3 + $0x654] sm:$0xf0]  ;;  %v6675_v40 = vld [vmem:[#allocation3 + $0x428] sm:$0xf] }
 0x51d   : > { %4956 = vmatpush.bf16.msrb.mxu1 %v6900_v52  ;;  %4925 = vmatmul.bf16.vlgmr.msra.gmra.mxu2 %v9730_v12  ;;  %v7722_v52 = vld [vmem:[#allocation3 + $0x554] sm:$0xf0]  ;;  %v6931_v17 = vld [vmem:[#allocation3 + $0x628] sm:$0xf] }
 0x51e   : > { %4969 = vmatpush.bf16.msrb.mxu2 %v7028_v61  ;;  %4938 = vmatmul.bf16.vlgmr.msra.gmra.mxu3 %v9734_v0  ;;  %v6947_v61 = vld [vmem:[#allocation3 + $0x648] sm:$0xf]  ;;  %v7786_v18 = vld [vmem:[#allocation3 + $0x754] sm:$0xf0]  ;;  %v6820_v33 = vor.u32 %v7722_v52, %v6819_v23  ;;  %v6245_v52 = vld [vmem:[#allocation3 + $0xd8] sm:$0xf0] }
 0x51f   : > { %4982 = vmatpush.bf16.msrb.mxu3 %v7156_v21  ;;  %v6692_v21 = vor.u32 %v7690_v6, %v6691_v39  ;;  %v6948_v14 = vor.u32 %v7754_v36, %v6947_v61  ;;  %v7686_v62 = vld [vmem:[#allocation3 + $0x434] sm:$0xf0]  ;;  %v7076_v20 = vor.u32 %v7786_v18, %v7075_v13  ;;  %v7059_v27 = vld [vmem:[#allocation3 + $0x728] sm:$0xf]  ;;  %v6645_v39 = vld [vmem:[#allocation3 + $0x3f8] sm:$0xf0] }
 0x520   : > { %4944 = vmatpush.bf16.msrb.mxu0 %v6756_v2  ;;  %v6803_v2 = vld [vmem:[#allocation3 + $0x528] sm:$0xf]  ;;  %v7718_v1 = vld [vmem:[#allocation3 + $0x534] sm:$0xf0]  ;;  %v6676_v8 = vor.u32 %v7686_v62, %v6675_v40  ;;  %v4694_v43 = vpop.f32.mrf.mxu0  ;;  %v7608_v61 = vld [vmem:[#allocation3 + $0x1cc] sm:$0xf] }
 0x521   : > { %4957 = vmatpush.bf16.msrb.mxu1 %v6884_v7  ;;  %v4693_v7 = vadd.f32 %v4692_v47, %v4675_v11  ;;  %v7782_v30 = vld [vmem:[#allocation3 + $0x734] sm:$0xf0]  ;;  %v6659_v60 = vld [vmem:[#allocation3 + $0x408] sm:$0xf]  ;;  %v6373_v13 = vld [vmem:[#allocation3 + $0x1d8] sm:$0xf0] }
 0x522   : > { %4970 = vmatpush.bf16.msrb.mxu2 %v7012_v54  ;;  %v4705_v54 = vpop.f32.mrf.mxu1  ;;  %v6787_v31 = vld [vmem:[#allocation3 + $0x508] sm:$0xf]  ;;  %v7714_v42 = vld [vmem:[#allocation3 + $0x514] sm:$0xf0]  ;;  %v7060_v34 = vor.u32 %v7782_v30, %v7059_v27  ;;  %v7640_v18 = vld [vmem:[#allocation3 + $0x2cc] sm:$0xf] }
 0x523   : > { %4983 = vmatpush.bf16.msrb.mxu3 %v7140_v28  ;;  %v7750_v28 = vld [vmem:[#allocation3 + $0x634] sm:$0xf0]  ;;  %v4706_v22 = vadd.f32 %v4705_v54, %v4693_v7  ;;  %v6915_v25 = vld [vmem:[#allocation3 + $0x608] sm:$0xf]  ;;  %v6788_v46 = vor.u32 %v7714_v42, %v6787_v31  ;;  %v7672_v47 = vld [vmem:[#allocation3 + $0x3cc] sm:$0xf] }
 0x524   : > { %4945 = vmatpush.bf16.msrb.mxu0 %v6740_v3  ;;  %v7682_v3 = vld [vmem:[#allocation3 + $0x414] sm:$0xf0]  ;;  %v7043_v53 = vld [vmem:[#allocation3 + $0x708] sm:$0xf]  ;;  %v7572_v54 = vld [vmem:[#allocation3 + $0xac] sm:$0xf] }
 0x525   : > { %4958 = vmatpush.bf16.msrb.mxu1 %v6868_v55  ;;  %v6804_v55 = vor.u32 %v7718_v1, %v6803_v2  ;;  %v7746_v38 = vld [vmem:[#allocation3 + $0x614] sm:$0xf0]  ;;  %v6660_v51 = vor.u32 %v7682_v3, %v6659_v60  ;;  %v6376_v2 = vor.u32 %v7608_v61, %v6373_v13  ;;  %v7604_v1 = vld [vmem:[#allocation3 + $0x1ac] sm:$0xf]  ;;  %v6485_v30 = vld [vmem:[#allocation3 + $0x2b8] sm:$0xf0] }
 0x526   : > { %4971 = vmatpush.bf16.msrb.mxu2 %v6996_v49  ;;  %v6932_v49 = vor.u32 %v7750_v28, %v6931_v17  ;;  %v7778_v15 = vld [vmem:[#allocation3 + $0x714] sm:$0xf0]  ;;  %v6916_v19 = vor.u32 %v7746_v38, %v6915_v25  ;;  %v6357_v28 = vld [vmem:[#allocation3 + $0x1b8] sm:$0xf0]  ;;  %v7636_v27 = vld [vmem:[#allocation3 + $0x2ac] sm:$0xf] }
 0x527   : > { %4984 = vmatpush.bf16.msrb.mxu3 %v7124_v45  ;;  %v4718_v45 = vpop.f32.mrf.mxu2  ;;  %v6360_v3 = vor.u32 %v7604_v1, %v6357_v28  ;;  %v6213_v31 = vld [vmem:[#allocation3 + $0x98] sm:$0xf0]  ;;  %v7600_v42 = vld [vmem:[#allocation3 + $0x18c] sm:$0xf] }
 0x528   : > { %4946 = vmatpush.bf16.msrb.mxu0 %v6724_v59  ;;  %v4719_v24 = vadd.f32 %v4718_v45, %v4706_v22  ;;  %v4731_v59 = vpop.f32.mrf.mxu3  ;;  %v7668_v22 = vld [vmem:[#allocation3 + $0x3ac] sm:$0xf]  ;;  %v6341_v45 = vld [vmem:[#allocation3 + $0x198] sm:$0xf0] }
 0x529   : > { %4959 = vmatpush.bf16.msrb.mxu1 %v6852_v32  ;;  %v6261_v32 = vld [vmem:[#allocation3 + $0xf8] sm:$0xf0]  ;;  %v7592_v61 = vld [vmem:[#allocation3 + $0x14c] sm:$0xf] }
 0x52a   : > { %4972 = vmatpush.bf16.msrb.mxu2 %v6980_v16  ;;  %v7612_v16 = vld [vmem:[#allocation3 + $0x1ec] sm:$0xf]  ;;  %v9777_v58 = vadd.f32 %v4731_v59, %v4719_v24  ;;  %v6264_v6 = vor.u32 %v7580_v26, %v6261_v32  ;;  %v6469_v38 = vld [vmem:[#allocation3 + $0x298] sm:$0xf0]  ;;  %v6344_v26 = vor.u32 %v7600_v42, %v6341_v45 }
 0x52b   : > { %4985 = vmatpush.bf16.msrb.mxu3 %v7108_v5  ;;  %v6517_v5 = vld [vmem:[#allocation3 + $0x2f8] sm:$0xf0]  ;;  %v6392_v23 = vor.u32 %v7612_v16, %v6389_v4  ;;  %v7564_v16 = vld [vmem:[#allocation3 + $0x6c] sm:$0xf] }
 0x52c   : > { %4947 = vmatpush.bf16.msrb.mxu0 %v6708_v10  ;;  %v7676_v10 = vld [vmem:[#allocation3 + $0x3ec] sm:$0xf]  ;;  %v6520_v11 = vor.u32 %v7644_v48, %v6517_v5  ;;  %v6309_v13 = vld [vmem:[#allocation3 + $0x158] sm:$0xf0] }
 0x52d   : > { %4960 = vmatpush.bf16.msrb.mxu1 %v6836_v57  ;;  %v4707_v57 = vpop.f32.mrf.mxu1  ;;  %v6648_v36 = vor.u32 %v7676_v10, %v6645_v39  ;;  %v7596_v4 = vld [vmem:[#allocation3 + $0x16c] sm:$0xf]  ;;  %v6453_v10 = vld [vmem:[#allocation3 + $0x278] sm:$0xf0] }
 0x52e   : > { %4973 = vmatpush.bf16.msrb.mxu2 %v6964_v29  ;;  %v7044_v29 = vor.u32 %v7778_v15, %v7043_v53  ;;  %v7664_v53 = vld [vmem:[#allocation3 + $0x38c] sm:$0xf]  ;;  %v6597_v15 = vld [vmem:[#allocation3 + $0x398] sm:$0xf0] }
 0x52f   : > { %4986 = vmatpush.bf16.msrb.mxu3 %v7092_v41  ;;  %v7576_v41 = vld [vmem:[#allocation3 + $0xcc] sm:$0xf]  ;;  %v6600_v43 = vor.u32 %v7664_v53, %v6597_v15  ;;  %v6581_v57 = vld [vmem:[#allocation3 + $0x378] sm:$0xf0] }
 0x530   : > { %4948 = vmatpush.bf16.msrb.mxu0 %v6692_v21  ;;  %v6501_v21 = vld [vmem:[#allocation3 + $0x2d8] sm:$0xf0]  ;;  %v6248_v40 = vor.u32 %v7576_v41, %v6245_v52  ;;  %v4733_v62 = vpop.f32.mrf.mxu3  ;;  %v7660_v39 = vld [vmem:[#allocation3 + $0x36c] sm:$0xf] }
 0x531   : > { %4961 = vmatpush.bf16.msrb.mxu1 %v6820_v33  ;;  %v6629_v33 = vld [vmem:[#allocation3 + $0x3d8] sm:$0xf0]  ;;  %v6504_v7 = vor.u32 %v7640_v18, %v6501_v21  ;;  %v7560_v41 = vld [vmem:[#allocation3 + $0x4c] sm:$0xf] }
 0x532   : > { %4974 = vmatpush.bf16.msrb.mxu2 %v6948_v14  ;;  %v4720_v14 = vpop.f32.mrf.mxu2  ;;  %v6632_v17 = vor.u32 %v7672_v47, %v6629_v33  ;;  %v6181_v52 = vld [vmem:[#allocation3 + $0x58] sm:$0xf0]  ;;  %v7624_v18 = vld [vmem:[#allocation3 + $0x24c] sm:$0xf] }
 0x533   : > { %4987 = vmatpush.bf16.msrb.mxu3 %v7076_v20  ;;  %v6229_v20 = vld [vmem:[#allocation3 + $0xb8] sm:$0xf0]  ;;  %v7656_v14 = vld [vmem:[#allocation3 + $0x34c] sm:$0xf]  ;;  %v6184_v62 = vor.u32 %v7560_v41, %v6181_v52 }
 0x534   : > { %4949 = vmatpush.bf16.msrb.mxu0 %v6676_v8  ;;  %v6613_v8 = vld [vmem:[#allocation3 + $0x3b8] sm:$0xf0]  ;;  %v6232_v60 = vor.u32 %v7572_v54, %v6229_v20  ;;  %v6312_v54 = vor.u32 %v7592_v61, %v6309_v13  ;;  %v7556_v1 = vld [vmem:[#allocation3 + $0x2c] sm:$0xf] }
 0x535   : > { %4962 = vmatpush.bf16.msrb.mxu1 %v6804_v55  ;;  %v6488_v55 = vor.u32 %v7636_v27, %v6485_v30  ;;  %v6616_v25 = vor.u32 %v7668_v22, %v6613_v8  ;;  %v6437_v21 = vld [vmem:[#allocation3 + $0x258] sm:$0xf0]  ;;  %v7588_v28 = vld [vmem:[#allocation3 + $0x12c] sm:$0xf] }
 0x536   : > { %4975 = vmatpush.bf16.msrb.mxu2 %v6932_v49  ;;  %v7568_v49 = vld [vmem:[#allocation3 + $0x8c] sm:$0xf]  ;;  %v6440_v20 = vor.u32 %v7624_v18, %v6437_v21  ;;  %v6293_v22 = vld [vmem:[#allocation3 + $0x138] sm:$0xf0] }
 0x537   : > { %4988 = vmatpush.bf16.msrb.mxu3 %v7060_v34  ;;  %v7632_v34 = vld [vmem:[#allocation3 + $0x28c] sm:$0xf]  ;;  %v6216_v24 = vor.u32 %v7568_v49, %v6213_v31  ;;  %v6149_v42 = vld [vmem:[#allocation3 + $0x18] sm:$0xf0] }
 0x538   : > { %4950 = vmatpush.bf16.msrb.mxu0 %v6660_v51  ;;  %v4744_v59 = vpop.f32.mrf.mxu0  ;;  %v6472_v32 = vor.u32 %v7632_v34, %v6469_v38  ;;  %v6197_v51 = vld [vmem:[#allocation3 + $0x78] sm:$0xf0]  ;;  %v7620_v8 = vld [vmem:[#allocation3 + $0x22c] sm:$0xf] }
 0x539   : > { %4963 = vmatpush.bf16.msrb.mxu1 %v6788_v46  ;;  %v4745_v48 = vadd.f32 %v4744_v59, %v9777_v58  ;;  %v4757_v5 = vpop.f32.mrf.mxu1  ;;  %v6325_v46 = vld [vmem:[#allocation3 + $0x178] sm:$0xf0]  ;;  %v6584_v58 = vor.u32 %v7660_v39, %v6581_v57  ;;  %v7552_v31 = vld [vmem:[#allocation3 + $0xc] sm:$0xf] }
 0x53a   : > { %4976 = vmatpush.bf16.msrb.mxu2 %v6916_v19  ;;  %v7628_v19 = vld [vmem:[#allocation3 + $0x26c] sm:$0xf]  ;;  %v6277_v38 = vld [vmem:[#allocation3 + $0x118] sm:$0xf0] }
 0x53b   : > { %4989 = vmatpush.bf16.msrb.mxu3 %v7044_v29  ;;  %4951 = vmatmul.bf16.vlgmr.msrb.gmra.mxu0 %v9749_v9  ;;  %v4758_v29 = vadd.f32 %v4757_v5, %v4745_v48  ;;  %v7584_v34 = vld [vmem:[#allocation3 + $0x10c] sm:$0xf]  ;;  %v6405_v59 = vld [vmem:[#allocation3 + $0x218] sm:$0xf0]  ;;  %v6152_v5 = vor.u32 %v7552_v31, %v6149_v42 }
 0x53c   : > { %4995 = vmatpush.bf16.msra.mxu0 %v6264_v6  ;;  %4964 = vmatmul.bf16.vlgmr.msrb.gmra.mxu1 %v9753_v37  ;;  %v6200_v6 = vor.u32 %v7564_v16, %v6197_v51  ;;  %v7616_v53 = vld [vmem:[#allocation3 + $0x20c] sm:$0xf]  ;;  %v6757_v61 = vld [vmem:[#allocation3 + $0x4d8] sm:$0xf0] }
 0x53d   : > { %5008 = vmatpush.bf16.msra.mxu1 %v6392_v23  ;;  %4977 = vmatmul.bf16.vlgmr.msrb.gmra.mxu2 %v9747_v50  ;;  %v6328_v23 = vor.u32 %v7596_v4, %v6325_v46  ;;  %v7708_v51 = vld [vmem:[#allocation3 + $0x4ec] sm:$0xf]  ;;  %v6773_v4 = vld [vmem:[#allocation3 + $0x4f8] sm:$0xf0]  ;;  %v6408_v39 = vor.u32 %v7616_v53, %v6405_v59 }
 0x53e   : > { %5021 = vmatpush.bf16.msra.mxu2 %v6520_v11  ;;  %4990 = vmatmul.bf16.vlgmr.msrb.gmra.mxu3 %v9751_v44  ;;  %v6456_v11 = vor.u32 %v7628_v19, %v6453_v10  ;;  %v7740_v48 = vld [vmem:[#allocation3 + $0x5ec] sm:$0xf]  ;;  %v7029_v19 = vld [vmem:[#allocation3 + $0x6f8] sm:$0xf0]  ;;  %v6280_v10 = vor.u32 %v7584_v34, %v6277_v38 }
 0x53f   : > { %5034 = vmatpush.bf16.msra.mxu3 %v6648_v36  ;;  %v7772_v46 = vld [vmem:[#allocation3 + $0x6ec] sm:$0xf]  ;;  %v6885_v13 = vld [vmem:[#allocation3 + $0x5d8] sm:$0xf0] }
 0x540   : > { %4996 = vmatpush.bf16.msra.mxu0 %v6248_v40  ;;  %v4770_v36 = vpop.f32.mrf.mxu2  ;;  %v6565_v40 = vld [vmem:[#allocation3 + $0x358] sm:$0xf0]  ;;  %v7804_v57 = vld [vmem:[#allocation3 + $0x7ec] sm:$0xf]  ;;  %v7032_v41 = vor.u32 %v7772_v46, %v7029_v19 }
 0x541   : > { %5009 = vmatpush.bf16.msra.mxu1 %v6376_v2  ;;  %v4771_v47 = vadd.f32 %v4770_v36, %v4758_v29  ;;  %v4783_v33 = vpop.f32.mrf.mxu3  ;;  %v4759_v27 = vpop.f32.mrf.mxu1  ;;  %v6568_v30 = vor.u32 %v7656_v14, %v6565_v40  ;;  %v7157_v29 = vld [vmem:[#allocation3 + $0x7f8] sm:$0xf0]  ;;  %v7704_v52 = vld [vmem:[#allocation3 + $0x4cc] sm:$0xf] }
 0x542   : > { %5022 = vmatpush.bf16.msra.mxu2 %v6504_v7  ;;  %v4746_v7 = vpop.f32.mrf.mxu0  ;;  %v7736_v36 = vld [vmem:[#allocation3 + $0x5cc] sm:$0xf]  ;;  %v7013_v21 = vld [vmem:[#allocation3 + $0x6d8] sm:$0xf0]  ;;  %v6760_v14 = vor.u32 %v7704_v52, %v6757_v61 }
 0x543   : > { %5035 = vmatpush.bf16.msra.mxu3 %v6632_v17  ;;  %v9784_v2 = vadd.f32 %v4783_v33, %v4771_v47  ;;  %v6165_v17 = vld [vmem:[#allocation3 + $0x38] sm:$0xf0]  ;;  %v7768_v18 = vld [vmem:[#allocation3 + $0x6cc] sm:$0xf]  ;;  %v6888_v40 = vor.u32 %v7736_v36, %v6885_v13 }
 0x544   : > { %4997 = vmatpush.bf16.msra.mxu0 %v6232_v60  ;;  %v6421_v60 = vld [vmem:[#allocation3 + $0x238] sm:$0xf0]  ;;  %v6168_v49 = vor.u32 %v7556_v1, %v6165_v17  ;;  %v7800_v47 = vld [vmem:[#allocation3 + $0x7cc] sm:$0xf] }
 0x545   : > { %5010 = vmatpush.bf16.msra.mxu1 %v6360_v3  ;;  %v7652_v3 = vld [vmem:[#allocation3 + $0x32c] sm:$0xf]  ;;  %v6424_v45 = vor.u32 %v7620_v8, %v6421_v60  ;;  %v7141_v33 = vld [vmem:[#allocation3 + $0x7d8] sm:$0xf0] }
 0x546   : > { %5023 = vmatpush.bf16.msra.mxu2 %v6488_v55  ;;  %v6549_v55 = vld [vmem:[#allocation3 + $0x338] sm:$0xf0]  ;;  %v7700_v7 = vld [vmem:[#allocation3 + $0x4ac] sm:$0xf]  ;;  %v7144_v1 = vor.u32 %v7800_v47, %v7141_v33 }
 0x547   : > { %5036 = vmatpush.bf16.msra.mxu3 %v6616_v25  ;;  %v6296_v25 = vor.u32 %v7588_v28, %v6293_v22  ;;  %v6869_v17 = vld [vmem:[#allocation3 + $0x5b8] sm:$0xf0]  ;;  %v7764_v28 = vld [vmem:[#allocation3 + $0x6ac] sm:$0xf] }
 0x548   : > { %4998 = vmatpush.bf16.msra.mxu0 %v6216_v24  ;;  %v4772_v15 = vpop.f32.mrf.mxu2  ;;  %v6552_v24 = vor.u32 %v7652_v3, %v6549_v55  ;;  %v6997_v27 = vld [vmem:[#allocation3 + $0x6b8] sm:$0xf0]  ;;  %v7696_v55 = vld [vmem:[#allocation3 + $0x48c] sm:$0xf] }
 0x549   : > { %5011 = vmatpush.bf16.msra.mxu1 %v6344_v26  ;;  %v7648_v26 = vld [vmem:[#allocation3 + $0x30c] sm:$0xf]  ;;  %v4785_v16 = vpop.f32.mrf.mxu3  ;;  %v7125_v22 = vld [vmem:[#allocation3 + $0x7b8] sm:$0xf0]  ;;  %v7000_v3 = vor.u32 %v7764_v28, %v6997_v27  ;;  %v4676_v28 = vperm.slane %v9774_v63, 1 }
 0x54a   : > { %5024 = vmatpush.bf16.msra.mxu2 %v6472_v32  ;;  %v6533_v32 = vld [vmem:[#allocation3 + $0x318] sm:$0xf0]  ;;  %v7792_v34 = vld [vmem:[#allocation3 + $0x78c] sm:$0xf]  ;;  %v7219_v63 = vld [vmem:[%s10293_s9 + $0x70] sm:$0xf] }
 0x54b   : > { %5037 = vmatpush.bf16.msra.mxu3 %v6600_v43  ;;  %v6901_v43 = vld [vmem:[#allocation3 + $0x5f8] sm:$0xf0]  ;;  %v7692_v15 = vld [vmem:[#allocation3 + $0x46c] sm:$0xf] }
 0x54c   : > { %4999 = vmatpush.bf16.msra.mxu0 %v6200_v6  ;;  %v6536_v6 = vor.u32 %v7648_v26, %v6533_v32  ;;  %v6853_v42 = vld [vmem:[#allocation3 + $0x598] sm:$0xf0]  ;;  %v7724_v59 = vld [vmem:[#allocation3 + $0x56c] sm:$0xf] }
 0x54d   : > { %5012 = vmatpush.bf16.msra.mxu1 %v6328_v23  ;;  %v6776_v23 = vor.u32 %v7708_v51, %v6773_v4  ;;  %v6837_v16 = vld [vmem:[#allocation3 + $0x578] sm:$0xf0]  ;;  %v7756_v51 = vld [vmem:[#allocation3 + $0x66c] sm:$0xf] }
 0x54e   : > { %5025 = vmatpush.bf16.msra.mxu2 %v6456_v11  ;;  %v6904_v11 = vor.u32 %v7740_v48, %v6901_v43  ;;  %v6965_v4 = vld [vmem:[#allocation3 + $0x678] sm:$0xf0]  ;;  %v7788_v48 = vld [vmem:[#allocation3 + $0x76c] sm:$0xf]  ;;  %v6840_v46 = vor.u32 %v7724_v59, %v6837_v16 }
 0x54f   : > { %5038 = vmatpush.bf16.msra.mxu3 %v6584_v58  ;;  %v7160_v58 = vor.u32 %v7804_v57, %v7157_v29  ;;  %v6968_v19 = vor.u32 %v7756_v51, %v6965_v4  ;;  %v7720_v57 = vld [vmem:[#allocation3 + $0x54c] sm:$0xf]  ;;  %v7077_v36 = vld [vmem:[#allocation3 + $0x758] sm:$0xf0]  ;;  %v7211_v4 = vld [vmem:[%s10293_s9 + $0x60] sm:$0xf] }
 0x550   : > { %5000 = vmatpush.bf16.msra.mxu0 %v6184_v62  ;;  %v7016_v62 = vor.u32 %v7768_v18, %v7013_v21  ;;  %v7784_v61 = vld [vmem:[#allocation3 + $0x74c] sm:$0xf]  ;;  %v6677_v33 = vld [vmem:[#allocation3 + $0x438] sm:$0xf0] }
 0x551   : > { %5013 = vmatpush.bf16.msra.mxu1 %v6312_v54  ;;  %v6741_v54 = vld [vmem:[#allocation3 + $0x4b8] sm:$0xf0]  ;;  %v7684_v47 = vld [vmem:[#allocation3 + $0x42c] sm:$0xf] }
 0x552   : > { %5026 = vmatpush.bf16.msra.mxu2 %v6440_v20  ;;  %v7732_v20 = vld [vmem:[#allocation3 + $0x5ac] sm:$0xf]  ;;  %v6744_v8 = vor.u32 %v7700_v7, %v6741_v54  ;;  %v6805_v7 = vld [vmem:[#allocation3 + $0x538] sm:$0xf0]  ;;  %v6680_v27 = vor.u32 %v7684_v47, %v6677_v33  ;;  %v7251_v47 = vld [vmem:[%s10293_s9 + $0xb0] sm:$0xf] }
 0x553   : > { %5039 = vmatpush.bf16.msra.mxu3 %v6568_v30  ;;  %v7796_v30 = vld [vmem:[#allocation3 + $0x7ac] sm:$0xf]  ;;  %v6872_v60 = vor.u32 %v7732_v20, %v6869_v17  ;;  %v6933_v20 = vld [vmem:[#allocation3 + $0x638] sm:$0xf0] }
 0x554   : > { %5001 = vmatpush.bf16.msra.mxu0 %v6168_v49  ;;  %v6725_v49 = vld [vmem:[#allocation3 + $0x498] sm:$0xf0]  ;;  %v7128_v31 = vor.u32 %v7796_v30, %v7125_v22  ;;  %v7748_v54 = vld [vmem:[#allocation3 + $0x62c] sm:$0xf] }
 0x555   : > { %5014 = vmatpush.bf16.msra.mxu1 %v6296_v25  ;;  %v7760_v25 = vld [vmem:[#allocation3 + $0x68c] sm:$0xf]  ;;  %v7061_v17 = vld [vmem:[#allocation3 + $0x738] sm:$0xf0] }
 0x556   : > { %5027 = vmatpush.bf16.msra.mxu2 %v6424_v45  ;;  %v6981_v45 = vld [vmem:[#allocation3 + $0x698] sm:$0xf0]  ;;  %v7680_v30 = vld [vmem:[#allocation3 + $0x40c] sm:$0xf] }
 0x557   : > { %5040 = vmatpush.bf16.msra.mxu3 %v6552_v24  ;;  %v6984_v53 = vor.u32 %v7760_v25, %v6981_v45  ;;  %v6709_v24 = vld [vmem:[#allocation3 + $0x478] sm:$0xf0]  ;;  %v7776_v25 = vld [vmem:[#allocation3 + $0x70c] sm:$0xf] }
 0x558   : > { %5002 = vmatpush.bf16.msra.mxu0 %v6152_v5  ;;  %v9790_v38 = vpop.f32.mrf.mxu0  ;;  %v7093_v5 = vld [vmem:[#allocation3 + $0x778] sm:$0xf0]  ;;  %v6712_v43 = vor.u32 %v7692_v15, %v6709_v24  ;;  %v7838_v15 = vld [vmem:[%s10293_s9 + $0xf4] sm:$0xf0] }
 0x559   : > { %5015 = vmatpush.bf16.msra.mxu1 %v6280_v10  ;;  %v9792_v26 = vpop.f32.mrf.mxu1  ;;  %v7688_v10 = vld [vmem:[#allocation3 + $0x44c] sm:$0xf] }
 0x55a   : > { %5028 = vmatpush.bf16.msra.mxu2 %v6408_v39  ;;  %v6693_v39 = vld [vmem:[#allocation3 + $0x458] sm:$0xf0] }
 0x55b   : > { %5041 = vmatpush.bf16.msra.mxu3 %v6536_v6  ;;  %5003 = vmatmul.bf16.vlgmr.msra.gmra.mxu0 %v9732_v35  ;;  %v7109_v35 = vld [vmem:[#allocation3 + $0x798] sm:$0xf0]  ;;  %v7096_v6 = vor.u32 %v7788_v48, %v7093_v5  ;;  %v7820_v48 = vld [vmem:[%s10293_s9 + $0x64] sm:$0xf0]  ;;  %v7275_v5 = vld [vmem:[%s10293_s9 + $0xe0] sm:$0xf] }
 0x55c   : > { %5047 = vmatpush.bf16.msrb.mxu0 %v6776_v23  ;;  %5016 = vmatmul.bf16.vlgmr.msra.gmra.mxu1 %v9738_v56  ;;  %v7112_v32 = vor.u32 %v7792_v34, %v7109_v35  ;;  %v6821_v23 = vld [vmem:[#allocation3 + $0x558] sm:$0xf0]  ;;  %v7822_v35 = vld [vmem:[%s10293_s9 + $0x74] sm:$0xf0] }
 0x55d   : > { %5060 = vmatpush.bf16.msrb.mxu1 %v6904_v11  ;;  %5029 = vmatmul.bf16.vlgmr.msra.gmra.mxu2 %v9730_v12  ;;  %v7728_v12 = vld [vmem:[#allocation3 + $0x58c] sm:$0xf]  ;;  %v6824_v18 = vor.u32 %v7720_v57, %v6821_v23  ;;  %v7045_v34 = vld [vmem:[#allocation3 + $0x718] sm:$0xf0]  ;;  %v7220_v16 = vor.u32 %v7822_v35, %v7219_v63  ;;  %v7267_v57 = vld [vmem:[%s10293_s9 + $0xd0] sm:$0xf] }
 0x55e   : > { %5073 = vmatpush.bf16.msrb.mxu2 %v7032_v41  ;;  %5042 = vmatmul.bf16.vlgmr.msra.gmra.mxu3 %v9734_v0  ;;  %v6728_v0 = vor.u32 %v7696_v55, %v6725_v49  ;;  %v6856_v56 = vor.u32 %v7728_v12, %v6853_v42  ;;  %v7752_v11 = vld [vmem:[#allocation3 + $0x64c] sm:$0xf]  ;;  %v6949_v41 = vld [vmem:[#allocation3 + $0x658] sm:$0xf0]  ;;  %v7235_v63 = vld [vmem:[%s10293_s9 + $0x90] sm:$0xf] }
 0x55f   : > { %5086 = vmatpush.bf16.msrb.mxu3 %v7160_v58  ;;  %v6696_v58 = vor.u32 %v7688_v10, %v6693_v39  ;;  %v6952_v21 = vor.u32 %v7752_v11, %v6949_v41  ;;  %v6789_v55 = vld [vmem:[#allocation3 + $0x518] sm:$0xf0]  ;;  %v7203_v10 = vld [vmem:[%s10293_s9 + $0x50] sm:$0xf]  ;;  %v7818_v39 = vld [vmem:[%s10293_s9 + $0x54] sm:$0xf0] }
 0x560   : > { %5048 = vmatpush.bf16.msrb.mxu0 %v6760_v14  ;;  %v9794_v29 = vpop.f32.mrf.mxu2  ;;  %v4798_v13 = vpop.f32.mrf.mxu0  ;;  %v7716_v14 = vld [vmem:[#allocation3 + $0x52c] sm:$0xf]  ;;  %v6917_v42 = vld [vmem:[#allocation3 + $0x618] sm:$0xf0]  ;;  %v7259_v11 = vld [vmem:[%s10293_s9 + $0xc0] sm:$0xf] }
 0x561   : > { %5061 = vmatpush.bf16.msrb.mxu1 %v6888_v40  ;;  %v9796_v52 = vpop.f32.mrf.mxu3  ;;  %v4811_v40 = vpop.f32.mrf.mxu1  ;;  %v6808_v22 = vor.u32 %v7716_v14, %v6805_v7  ;;  %v7347_v41 = vld [vmem:[%s10293_s9 + $0x170] sm:$0xf]  ;;  %v7852_v7 = vld [vmem:[%s10293_s9 + $0x164] sm:$0xf0] }
 0x562   : > { %5074 = vmatpush.bf16.msrb.mxu2 %v7016_v62  ;;  %v7080_v62 = vor.u32 %v7784_v61, %v7077_v36  ;;  %v7830_v40 = vld [vmem:[%s10293_s9 + $0xb4] sm:$0xf0] }
 0x563   : > { %5087 = vmatpush.bf16.msrb.mxu3 %v7144_v1  ;;  %v7780_v1 = vld [vmem:[#allocation3 + $0x72c] sm:$0xf] }
 0x564   : > { %5049 = vmatpush.bf16.msrb.mxu0 %v6744_v8  ;;  %v6936_v8 = vor.u32 %v7748_v54, %v6933_v20  ;;  %v7064_v12 = vor.u32 %v7780_v1, %v7061_v17  ;;  %v7252_v17 = vor.u32 %v7830_v40, %v7251_v47  ;;  %v7842_v47 = vld [vmem:[%s10293_s9 + $0x114] sm:$0xf0]  ;;  %v7205_v40 = vld [vmem:[%s10293_s9 + $0x58] sm:$0xf0] }
 0x565   : > { %5062 = vmatpush.bf16.msrb.mxu1 %v6872_v60  ;;  %v6661_v60 = vld [vmem:[#allocation3 + $0x418] sm:$0xf0] }
 0x566   : > { %5075 = vmatpush.bf16.msrb.mxu2 %v7000_v3  ;;  %v7712_v3 = vld [vmem:[#allocation3 + $0x50c] sm:$0xf] }
 0x567   : > { %5088 = vmatpush.bf16.msrb.mxu3 %v7128_v31  ;;  %v7744_v31 = vld [vmem:[#allocation3 + $0x60c] sm:$0xf]  ;;  %v6792_v24 = vor.u32 %v7712_v3, %v6789_v55  ;;  %v7331_v3 = vld [vmem:[%s10293_s9 + $0x150] sm:$0xf]  ;;  %v7850_v55 = vld [vmem:[%s10293_s9 + $0x154] sm:$0xf0] }
 0x568   : > { %5050 = vmatpush.bf16.msrb.mxu0 %v6728_v0  ;;  %v4824_v49 = vpop.f32.mrf.mxu2  ;;  %v4797_v0 = vadd.f32 %v9790_v38, %v4676_v28  ;;  %v6920_v59 = vor.u32 %v7744_v31, %v6917_v42  ;;  %v7179_v28 = vld [vmem:[%s10293_s9 + $0x20] sm:$0xf] }
 0x569   : > { %5063 = vmatpush.bf16.msrb.mxu1 %v6856_v56  ;;  %v4837_v45 = vpop.f32.mrf.mxu3  ;;  %v6664_v56 = vor.u32 %v7680_v30, %v6661_v60  ;;  %v7243_v30 = vld [vmem:[%s10293_s9 + $0xa0] sm:$0xf]  ;;  %v7332_v49 = vor.u32 %v7850_v55, %v7331_v3  ;;  %v7831_v3 = vld [vmem:[%s10293_s9 + $0xc4] sm:$0xf]  ;;  %v7261_v55 = vld [vmem:[%s10293_s9 + $0xc8] sm:$0xf0] }
 0x56a   : > { %5076 = vmatpush.bf16.msrb.mxu2 %v6984_v53  ;;  %v7283_v53 = vld [vmem:[%s10293_s9 + $0xf0] sm:$0xf]  ;;  %v4810_v38 = vadd.f32 %v9792_v26, %v4797_v0  ;;  %v7212_v26 = vor.u32 %v7820_v48, %v7211_v4  ;;  %v7826_v0 = vld [vmem:[%s10293_s9 + $0x94] sm:$0xf0]  ;;  %v7824_v4 = vld [vmem:[%s10293_s9 + $0x84] sm:$0xf0] }
 0x56b   : > { %5089 = vmatpush.bf16.msrb.mxu3 %v7112_v32  ;;  %v7048_v32 = vor.u32 %v7776_v25, %v7045_v34  ;;  %v7284_v51 = vor.u32 %v7838_v15, %v7283_v53  ;;  %v7171_v45 = vld [vmem:[%s10293_s9 + $0x10] sm:$0xf]  ;;  %v7810_v34 = vld [vmem:[%s10293_s9 + $0x14] sm:$0xf0]  ;;  %v7848_v53 = vld [vmem:[%s10293_s9 + $0x144] sm:$0xf0] }
 0x56c   : > { %5051 = vmatpush.bf16.msrb.mxu0 %v6712_v43  ;;  %v7836_v43 = vld [vmem:[%s10293_s9 + $0xe4] sm:$0xf0]  ;;  %v7821_v48 = vld [vmem:[%s10293_s9 + $0x74] sm:$0xf] }
 0x56d   : > { %5064 = vmatpush.bf16.msrb.mxu1 %v6840_v46  ;;  %v7276_v46 = vor.u32 %v7836_v43, %v7275_v5  ;;  %v7221_v43 = vld [vmem:[%s10293_s9 + $0x78] sm:$0xf0] }
 0x56e   : > { %5077 = vmatpush.bf16.msrb.mxu2 %v6968_v19  ;;  %v4823_v19 = vadd.f32 %v9794_v29, %v4810_v38  ;;  %v7204_v29 = vor.u32 %v7818_v39, %v7203_v10  ;;  %v7227_v38 = vld [vmem:[%s10293_s9 + $0x80] sm:$0xf]  ;;  %v7837_v10 = vld [vmem:[%s10293_s9 + $0xf4] sm:$0xf]  ;;  %v7285_v39 = vld [vmem:[%s10293_s9 + $0xf8] sm:$0xf0] }
 0x56f   : > { %5090 = vmatpush.bf16.msrb.mxu3 %v7096_v6 }
 0x570   : > { %5052 = vmatpush.bf16.msrb.mxu0 %v6696_v58  ;;  %v4836_v6 = vadd.f32 %v9796_v52, %v4823_v19  ;;  %v7854_v52 = vld [vmem:[%s10293_s9 + $0x174] sm:$0xf0] }
 0x571   : > { %5065 = vmatpush.bf16.msrb.mxu1 %v6824_v18  ;;  %v7348_v61 = vor.u32 %v7854_v52, %v7347_v41  ;;  %v7187_v18 = vld [vmem:[%s10293_s9 + $0x30] sm:$0xf]  ;;  %v7846_v19 = vld [vmem:[%s10293_s9 + $0x134] sm:$0xf0]  ;;  %v7307_v41 = vld [vmem:[%s10293_s9 + $0x120] sm:$0xf] }
 0x572   : > { %5078 = vmatpush.bf16.msrb.mxu2 %v6952_v21  ;;  %v7814_v21 = vld [vmem:[%s10293_s9 + $0x34] sm:$0xf0]  ;;  %v7835_v52 = vld [vmem:[%s10293_s9 + $0xe4] sm:$0xf] }
 0x573   : > { %5091 = vmatpush.bf16.msrb.mxu3 %v7080_v62  ;;  %v7339_v62 = vld [vmem:[%s10293_s9 + $0x160] sm:$0xf]  ;;  %v7188_v20 = vor.u32 %v7814_v21, %v7187_v18  ;;  %v7299_v21 = vld [vmem:[%s10293_s9 + $0x110] sm:$0xf] }
 0x574   : > { %5053 = vmatpush.bf16.msrb.mxu0 %v6680_v27  ;;  %v7340_v54 = vor.u32 %v7852_v7, %v7339_v62  ;;  %v7812_v27 = vld [vmem:[%s10293_s9 + $0x24] sm:$0xf0]  ;;  %v7833_v62 = vld [vmem:[%s10293_s9 + $0xd4] sm:$0xf]  ;;  %v7300_v7 = vor.u32 %v7842_v47, %v7299_v21  ;;  %v7229_v21 = vld [vmem:[%s10293_s9 + $0x88] sm:$0xf0] }
 0x575   : > { %5066 = vmatpush.bf16.msrb.mxu1 %v6808_v22 }
 0x576   : > { %5079 = vmatpush.bf16.msrb.mxu2 %v6936_v8  ;;  %v7828_v8 = vld [vmem:[%s10293_s9 + $0xa4] sm:$0xf0] }
 0x577   : > { %5092 = vmatpush.bf16.msrb.mxu3 %v7064_v12  ;;  %v7180_v12 = vor.u32 %v7812_v27, %v7179_v28  ;;  %v7244_v25 = vor.u32 %v7828_v8, %v7243_v30  ;;  %v7349_v28 = vld [vmem:[%s10293_s9 + $0x178] sm:$0xf0]  ;;  %v7197_v8 = vld [vmem:[%s10293_s9 + $0x48] sm:$0xf0] }
 0x578   : > { %5054 = vmatpush.bf16.msrb.mxu0 %v6664_v56  ;;  %v4848_v58 = vpop.f32.mrf.mxu0  ;;  %v7323_v56 = vld [vmem:[%s10293_s9 + $0x140] sm:$0xf] }
 0x579   : > { %5067 = vmatpush.bf16.msrb.mxu1 %v6792_v24  ;;  %v4849_v33 = vadd.f32 %v4848_v58, %v4836_v6  ;;  %v4861_v14 = vpop.f32.mrf.mxu1  ;;  %v7324_v15 = vor.u32 %v7848_v53, %v7323_v56  ;;  %v5099_v6 = vmax.f32 %v9784_v2, 0.0  ;;  %v7844_v2 = vld [vmem:[%s10293_s9 + $0x124] sm:$0xf0]  ;;  %v7341_v56 = vld [vmem:[%s10293_s9 + $0x168] sm:$0xf0] }
 0x57a   : > { %5080 = vmatpush.bf16.msrb.mxu2 %v6920_v59  ;;  %v7172_v59 = vor.u32 %v7810_v34, %v7171_v45  ;;  %v7829_v45 = vld [vmem:[%s10293_s9 + $0xb4] sm:$0xf] }
 0x57b   : > { %5093 = vmatpush.bf16.msrb.mxu3 %v7048_v32  ;;  %5055 = vmatmul.bf16.vlgmr.msrb.gmra.mxu0 %v9749_v9  ;;  %v7834_v9 = vld [vmem:[%s10293_s9 + $0xd4] sm:$0xf0]  ;;  %v4862_v1 = vadd.f32 %v4861_v14, %v4849_v33  ;;  %v7163_v32 = vld [vmem:[%s10293_s9] sm:$0xf]  ;;  %v7817_v14 = vld [vmem:[%s10293_s9 + $0x54] sm:$0xf] }
 0x57c   : > { %5497 = vmatpush.bf16.msra.mxu0 %v7220_v16  ;;  %5068 = vmatmul.bf16.vlgmr.msrb.gmra.mxu1 %v9753_v37  ;;  %v7268_v23 = vor.u32 %v7834_v9, %v7267_v57  ;;  %v7816_v37 = vld [vmem:[%s10293_s9 + $0x44] sm:$0xf0]  ;;  %v7208_v27 = vor.u32 %v7817_v14, %v7205_v40  ;;  %v7843_v40 = vld [vmem:[%s10293_s9 + $0x124] sm:$0xf] }
 0x57d   : > { %5510 = vmatpush.bf16.msra.mxu1 %v7284_v51  ;;  %5081 = vmatmul.bf16.vlgmr.msrb.gmra.mxu2 %v9747_v50  ;;  %v7195_v50 = vld [vmem:[%s10293_s9 + $0x40] sm:$0xf]  ;;  %v7808_v16 = vld [vmem:[%s10293_s9 + $0x4] sm:$0xf0]  ;;  %v7236_v51 = vor.u32 %v7826_v0, %v7235_v63  ;;  %v7253_v63 = vld [vmem:[%s10293_s9 + $0xb8] sm:$0xf0] }
 0x57e   : > { %5094 = vmatmul.bf16.vlgmr.msrb.gmra.mxu3 %v9751_v44  ;;  %v7832_v44 = vld [vmem:[%s10293_s9 + $0xc4] sm:$0xf0]  ;;  %v7196_v36 = vor.u32 %v7816_v37, %v7195_v50  ;;  %5523 = vmatpush.bf16.msra.mxu2 %v7348_v61  ;;  %v7224_v50 = vor.u32 %v7821_v48, %v7221_v43  ;;  %v7819_v37 = vld [vmem:[%s10293_s9 + $0x64] sm:$0xf]  ;;  %v7277_v61 = vld [vmem:[%s10293_s9 + $0xe8] sm:$0xf0] }
 0x57f   : > { %v7260_v13 = vor.u32 %v7832_v44, %v7259_v11  ;;  %v7288_v11 = vor.u32 %v7837_v10, %v7285_v39  ;;  %v7213_v44 = vld [vmem:[%s10293_s9 + $0x68] sm:$0xf0]  ;;  %v7280_v33 = vor.u32 %v7835_v52, %v7277_v61  ;;  %v7851_v0 = vld [vmem:[%s10293_s9 + $0x164] sm:$0xf]  ;;  %v7333_v48 = vld [vmem:[%s10293_s9 + $0x158] sm:$0xf0] }
 0x580   : > { %5498 = vmatpush.bf16.msra.mxu0 %v7212_v26  ;;  %v4874_v22 = vpop.f32.mrf.mxu2  ;;  %v4850_v42 = vpop.f32.mrf.mxu0  ;;  %v7216_v18 = vor.u32 %v7819_v37, %v7213_v44  ;;  %v7344_v53 = vor.u32 %v7851_v0, %v7341_v56  ;;  %v7173_v10 = vld [vmem:[%s10293_s9 + $0x18] sm:$0xf0]  ;;  %v7825_v39 = vld [vmem:[%s10293_s9 + $0x94] sm:$0xf]  ;;  %v7165_v52 = vld [vmem:[%s10293_s9 + $0x8] sm:$0xf0] }
 0x581   : > { %5511 = vmatpush.bf16.msra.mxu1 %v7276_v46  ;;  %v4887_v60 = vpop.f32.mrf.mxu3  ;;  %v4875_v31 = vadd.f32 %v4874_v22, %v4862_v1  ;;  %v4863_v35 = vpop.f32.mrf.mxu1  ;;  %v7315_v46 = vld [vmem:[%s10293_s9 + $0x130] sm:$0xf]  ;;  %v7840_v1 = vld [vmem:[%s10293_s9 + $0x104] sm:$0xf0]  ;;  %v7815_v22 = vld [vmem:[%s10293_s9 + $0x44] sm:$0xf] }
 0x582   : > { %5524 = vmatpush.bf16.msra.mxu2 %v7340_v54  ;;  %v7316_v57 = vor.u32 %v7846_v19, %v7315_v46  ;;  %v7269_v54 = vld [vmem:[%s10293_s9 + $0xd8] sm:$0xf0]  ;;  %v7813_v42 = vld [vmem:[%s10293_s9 + $0x34] sm:$0xf] }
 0x583   : > { %v4888_v24 = vadd.f32 %v4887_v60, %v4875_v31  ;;  %v7272_v30 = vor.u32 %v7833_v62, %v7269_v54  ;;  %v7264_v31 = vor.u32 %v7831_v3, %v7261_v55  ;;  %v7809_v19 = vld [vmem:[%s10293_s9 + $0x14] sm:$0xf]  ;;  %v7309_v62 = vld [vmem:[%s10293_s9 + $0x128] sm:$0xf0]  ;;  %v7839_v3 = vld [vmem:[%s10293_s9 + $0x104] sm:$0xf] }
 0x584   : > { %5499 = vmatpush.bf16.msra.mxu0 %v7204_v29  ;;  %v7164_v29 = vor.u32 %v7808_v16, %v7163_v32  ;;  %v7181_v32 = vld [vmem:[%s10293_s9 + $0x28] sm:$0xf0]  ;;  %v7827_v16 = vld [vmem:[%s10293_s9 + $0xa4] sm:$0xf]  ;;  %v7176_v37 = vor.u32 %v7809_v19, %v7173_v10  ;;  %v7845_v61 = vld [vmem:[%s10293_s9 + $0x134] sm:$0xf] }
 0x585   : > { %5512 = vmatpush.bf16.msra.mxu1 %v7268_v23  ;;  %v5100_v9 = vmax.f32 %v4888_v24, 0.0  ;;  %v7228_v23 = vor.u32 %v7824_v4, %v7227_v38  ;;  %v7256_v24 = vor.u32 %v7829_v45, %v7253_v63  ;;  %v7849_v4 = vld [vmem:[%s10293_s9 + $0x154] sm:$0xf]  ;;  %v7293_v55 = vld [vmem:[%s10293_s9 + $0x108] sm:$0xf0] }
 0x586   : > { %5525 = vmatpush.bf16.msra.mxu2 %v7332_v49  ;;  %v7336_v43 = vor.u32 %v7849_v4, %v7333_v48  ;;  %v7395_v45 = vld [vmem:[%s10293_s9 + $0x1d0] sm:$0xf]  ;;  %v7860_v19 = vld [vmem:[%s10293_s9 + $0x1a4] sm:$0xf0] }
 0x587   : > { %v9964_v58 = vpack.c.bf16 %v5100_v9, %v5100_v9  ;;  %v7237_v9 = vld [vmem:[%s10293_s9 + $0x98] sm:$0xf0] }
 0x588   : > { %5500 = vmatpush.bf16.msra.mxu0 %v7196_v36  ;;  %v4876_v5 = vpop.f32.mrf.mxu2  ;;  %v7308_v36 = vor.u32 %v7844_v2, %v7307_v41  ;;  %v7807_v41 = vld [vmem:[%s10293_s9 + $0x4] sm:$0xf]  ;;  %v7240_v2 = vor.u32 %v7825_v39, %v7237_v9 }
 0x589   : > { %5513 = vmatpush.bf16.msra.mxu1 %v7260_v13  ;;  %v4889_v26 = vpop.f32.mrf.mxu3  ;;  %v9966_v13 = vpack.c.bf16 %v5099_v6, %v5099_v6  ;;  %v7847_v6 = vld [vmem:[%s10293_s9 + $0x144] sm:$0xf] }
 0x58a   : > { %5526 = vmatpush.bf16.msra.mxu2 %v7324_v15 }
 0x58c   : > { %5501 = vmatpush.bf16.msra.mxu0 %v7188_v20  ;;  %v7291_v20 = vld [vmem:[%s10293_s9 + $0x100] sm:$0xf] }
 0x58d   : > { %5514 = vmatpush.bf16.msra.mxu1 %v7252_v17  ;;  %v7853_v17 = vld [vmem:[%s10293_s9 + $0x174] sm:$0xf]  ;;  %v7292_v60 = vor.u32 %v7840_v1, %v7291_v20  ;;  %v7168_v20 = vor.u32 %v7807_v41, %v7165_v52  ;;  %v7870_v1 = vld [vmem:[%s10293_s9 + $0x1f4] sm:$0xf0] }
 0x58e   : > { %5527 = vmatpush.bf16.msra.mxu2 %v7316_v57  ;;  %v7352_v49 = vor.u32 %v7853_v17, %v7349_v28  ;;  %v7869_v41 = vld [vmem:[%s10293_s9 + $0x1f4] sm:$0xf] }
 0x590   : > { %5502 = vmatpush.bf16.msra.mxu0 %v7180_v12  ;;  %v7200_v12 = vor.u32 %v7815_v22, %v7197_v8  ;;  %v7301_v22 = vld [vmem:[%s10293_s9 + $0x118] sm:$0xf0] }
 0x591   : > { %5515 = vmatpush.bf16.msra.mxu1 %v7244_v25  ;;  %v7189_v25 = vld [vmem:[%s10293_s9 + $0x38] sm:$0xf0] }
 0x592   : > { %5528 = vmatpush.bf16.msra.mxu2 %v7308_v36  ;;  %v7192_v15 = vor.u32 %v7813_v42, %v7189_v25  ;;  %v7317_v36 = vld [vmem:[%s10293_s9 + $0x138] sm:$0xf0]  ;;  %v7403_v42 = vld [vmem:[%s10293_s9 + $0x1e0] sm:$0xf] }
 0x594   : > { %5503 = vmatpush.bf16.msra.mxu0 %v7172_v59  ;;  %v7811_v59 = vld [vmem:[%s10293_s9 + $0x24] sm:$0xf] }
 0x595   : > { %5516 = vmatpush.bf16.msra.mxu1 %v7236_v51  ;;  %v7245_v51 = vld [vmem:[%s10293_s9 + $0xa8] sm:$0xf0]  ;;  %v7184_v26 = vor.u32 %v7811_v59, %v7181_v32 }
 0x596   : > { %5529 = vmatpush.bf16.msra.mxu2 %v7300_v7  ;;  %v7248_v46 = vor.u32 %v7827_v16, %v7245_v51  ;;  %v7411_v7 = vld [vmem:[%s10293_s9 + $0x1f0] sm:$0xf] }
 0x597   : > { %v7412_v28 = vor.u32 %v7870_v1, %v7411_v7  ;;  %v7379_v51 = vld [vmem:[%s10293_s9 + $0x1b0] sm:$0xf] }
 0x598   : > { %5504 = vmatpush.bf16.msra.mxu0 %v7164_v29  ;;  %v4900_v34 = vpop.f32.mrf.mxu0 }
 0x599   : > { %5517 = vmatpush.bf16.msra.mxu1 %v7228_v23  ;;  %v10024_v35 = vpop.f32.mrf.mxu1  ;;  %v7325_v23 = vld [vmem:[%s10293_s9 + $0x148] sm:$0xf0]  ;;  %5536 = vmatpush.bf16.msra.mxu3 %v7412_v28 }
 0x59a   : > { %5530 = vmatpush.bf16.msra.mxu2 %v7292_v60 }
 0x59b   : > { %5505 = vmatmul.bf16.vlgmr.msra.gmra.mxu0 %v9966_v13 }
 0x59c   : > { %5549 = vmatpush.bf16.msrb.mxu0 %v7224_v50  ;;  %5518 = vmatmul.bf16.vlgmr.msra.gmra.mxu1 %v9964_v58  ;;  %v7328_v50 = vor.u32 %v7847_v6, %v7325_v23  ;;  %v7858_v6 = vld [vmem:[%s10293_s9 + $0x194] sm:$0xf0] }
 0x59d   : > { %5562 = vmatpush.bf16.msrb.mxu1 %v7288_v11  ;;  %v10071_v11 = vld [vmem:[%s10292_s8] sm:$0xf] }
 0x59e   : > { %5575 = vmatpush.bf16.msrb.mxu2 %v7352_v49  ;;  %v4677_v44 = vperm.slane %v10071_v11, 2 }
 0x5a0   : > { %5550 = vmatpush.bf16.msrb.mxu0 %v7216_v18  ;;  %v4926_v38 = vpop.f32.mrf.mxu2  ;;  %v4902_v57 = vpop.f32.mrf.mxu0  ;;  %v7823_v18 = vld [vmem:[%s10293_s9 + $0x84] sm:$0xf]  ;;  %v4901_v54 = vadd.f32 %v4900_v34, %v4677_v44 }
 0x5a1   : > { %5563 = vmatpush.bf16.msrb.mxu1 %v7280_v33  ;;  %v4939_v5 = vpop.f32.mrf.mxu3  ;;  %v4915_v29 = vpop.f32.mrf.mxu1  ;;  %v7320_v33 = vor.u32 %v7845_v61, %v7317_v36  ;;  %v7232_v17 = vor.u32 %v7823_v18, %v7229_v21  ;;  %v7867_v61 = vld [vmem:[%s10293_s9 + $0x1e4] sm:$0xf]  ;;  %v7405_v36 = vld [vmem:[%s10293_s9 + $0x1e8] sm:$0xf0] }
 0x5a2   : > { %5576 = vmatpush.bf16.msrb.mxu2 %v7344_v53  ;;  %v4914_v8 = vadd.f32 %v10024_v35, %v4901_v54  ;;  %v7387_v53 = vld [vmem:[%s10293_s9 + $0x1c0] sm:$0xf]  ;;  %v7363_v29 = vld [vmem:[%s10293_s9 + $0x190] sm:$0xf]  ;;  %v7408_v21 = vor.u32 %v7867_v61, %v7405_v36  ;;  %v7863_v54 = vld [vmem:[%s10293_s9 + $0x1c4] sm:$0xf] }
 0x5a3   : > { %v7364_v23 = vor.u32 %v7858_v6, %v7363_v29  ;;  %v7886_v61 = vld [vmem:[%s10295_s11 + $0x78] sm:$0xff]  ;;  %v7877_v36 = vld [vmem:[%s10295_s11 + $0x30] sm:$0xff] }
 0x5a4   : > { %5551 = vmatpush.bf16.msrb.mxu0 %v7208_v27  ;;  %v7312_v27 = vor.u32 %v7843_v40, %v7309_v62  ;;  %v4927_v49 = vadd.f32 %v4926_v38, %v4914_v8  ;;  %v7862_v38 = vld [vmem:[%s10293_s9 + $0x1b4] sm:$0xf0] }
 0x5a5   : > { %5564 = vmatpush.bf16.msrb.mxu1 %v7272_v30  ;;  %v7841_v30 = vld [vmem:[%s10293_s9 + $0x114] sm:$0xf] }
 0x5a6   : > { %5577 = vmatpush.bf16.msrb.mxu2 %v7336_v43  ;;  %v7304_v60 = vor.u32 %v7841_v30, %v7301_v22  ;;  %v7380_v43 = vor.u32 %v7862_v38, %v7379_v51  ;;  %v7381_v30 = vld [vmem:[%s10293_s9 + $0x1b8] sm:$0xf0]  ;;  %v4678_v22 = vperm.slane %v10071_v11, 3 }
 0x5a7   : > { %v7365_v11 = vld [vmem:[%s10293_s9 + $0x198] sm:$0xf0] }
 0x5a8   : > { %5552 = vmatpush.bf16.msrb.mxu0 %v7200_v12  ;;  %v4928_v47 = vpop.f32.mrf.mxu2  ;;  %v7296_v12 = vor.u32 %v7839_v3, %v7293_v55  ;;  %v7373_v3 = vld [vmem:[%s10293_s9 + $0x1a8] sm:$0xf0] }
 0x5a9   : > { %5565 = vmatpush.bf16.msrb.mxu1 %v7264_v31  ;;  %v4941_v14 = vpop.f32.mrf.mxu3  ;;  %v4940_v31 = vadd.f32 %v4939_v5, %v4927_v49 }
 0x5aa   : > { %5578 = vmatpush.bf16.msrb.mxu2 %v7328_v50  ;;  %v7355_v50 = vld [vmem:[%s10293_s9 + $0x180] sm:$0xf]  ;;  %v7397_v14 = vld [vmem:[%s10293_s9 + $0x1d8] sm:$0xf0] }
 0x5ac   : > { %5553 = vmatpush.bf16.msrb.mxu0 %v7192_v15  ;;  %v7864_v15 = vld [vmem:[%s10293_s9 + $0x1c4] sm:$0xf0] }
 0x5ad   : > { %5566 = vmatpush.bf16.msrb.mxu1 %v7256_v24  ;;  %v7388_v59 = vor.u32 %v7864_v15, %v7387_v53 }
 0x5ae   : > { %5579 = vmatpush.bf16.msrb.mxu2 %v7320_v33  ;;  %v7865_v33 = vld [vmem:[%s10293_s9 + $0x1d4] sm:$0xf] }
 0x5af   : > { %v7400_v40 = vor.u32 %v7865_v33, %v7397_v14  ;;  %v7875_v14 = vld [vmem:[%s10295_s11 + $0x20] sm:$0xff] }
 0x5b0   : > { %5554 = vmatpush.bf16.msrb.mxu0 %v7184_v26 }
 0x5b1   : > { %5567 = vmatpush.bf16.msrb.mxu1 %v7248_v46  ;;  %v7371_v46 = vld [vmem:[%s10293_s9 + $0x1a0] sm:$0xf] }
 0x5b2   : > { %5580 = vmatpush.bf16.msrb.mxu2 %v7312_v27  ;;  %v7372_v57 = vor.u32 %v7860_v19, %v7371_v46  ;;  %v7861_v27 = vld [vmem:[%s10293_s9 + $0x1b4] sm:$0xf] }
 0x5b3   : > { %v7384_v8 = vor.u32 %v7861_v27, %v7381_v30  ;;  %v7882_v27 = vld [vmem:[%s10295_s11 + $0x58] sm:$0xff]  ;;  %v7881_v30 = vld [vmem:[%s10295_s11 + $0x50] sm:$0xff] }
 0x5b4   : > { %5555 = vmatpush.bf16.msrb.mxu0 %v7176_v37  ;;  %v7856_v37 = vld [vmem:[%s10293_s9 + $0x184] sm:$0xf0] }
 0x5b5   : > { %5568 = vmatpush.bf16.msrb.mxu1 %v7240_v2  ;;  %v7356_v44 = vor.u32 %v7856_v37, %v7355_v50  ;;  %v7413_v2 = vld [vmem:[%s10293_s9 + $0x1f8] sm:$0xf0] }
 0x5b6   : > { %5581 = vmatpush.bf16.msrb.mxu2 %v7304_v60  ;;  %v7416_v52 = vor.u32 %v7869_v41, %v7413_v2  ;;  %v7859_v60 = vld [vmem:[%s10293_s9 + $0x1a4] sm:$0xf] }
 0x5b8   : > { %5556 = vmatpush.bf16.msrb.mxu0 %v7168_v20  ;;  %v4952_v34 = vpop.f32.mrf.mxu0  ;;  %v7389_v20 = vld [vmem:[%s10293_s9 + $0x1c8] sm:$0xf0] }
 0x5b9   : > { %5569 = vmatpush.bf16.msrb.mxu1 %v7232_v17  ;;  %v4953_v63 = vadd.f32 %v4952_v34, %v4940_v31  ;;  %v4965_v35 = vpop.f32.mrf.mxu1  ;;  %v7392_v17 = vor.u32 %v7863_v54, %v7389_v20  ;;  %v7857_v31 = vld [vmem:[%s10293_s9 + $0x194] sm:$0xf]  ;;  %v7872_v54 = vld [vmem:[%s10295_s11 + $0x8] sm:$0xff] }
 0x5ba   : > { %5582 = vmatpush.bf16.msrb.mxu2 %v7296_v12  ;;  %v7376_v12 = vor.u32 %v7859_v60, %v7373_v3 }
 0x5bb   : > { %5557 = vmatmul.bf16.vlgmr.msrb.gmra.mxu0 %v9966_v13  ;;  %v7868_v13 = vld [vmem:[%s10293_s9 + $0x1e4] sm:$0xf0]  ;;  %v4966_v56 = vadd.f32 %v4965_v35, %v4953_v63 }
 0x5bc   : > { %5570 = vmatmul.bf16.vlgmr.msrb.gmra.mxu1 %v9964_v58  ;;  %v7404_v25 = vor.u32 %v7868_v13, %v7403_v42  ;;  %v7866_v58 = vld [vmem:[%s10293_s9 + $0x1d4] sm:$0xf0]  ;;  %v7368_v13 = vor.u32 %v7857_v31, %v7365_v11 }
 0x5bd   : > { %v7396_v0 = vor.u32 %v7866_v58, %v7395_v45  ;;  %v7357_v45 = vld [vmem:[%s10293_s9 + $0x188] sm:$0xf0]  ;;  %5745 = vmatpush.bf16.msra.mxu1 %v7886_v61 }
 0x5be   : > { %5537 = vmatpush.bf16.msra.mxu3 %v7404_v25  ;;  %v7855_v25 = vld [vmem:[%s10293_s9 + $0x184] sm:$0xf] }
 0x5bf   : > { %v7360_v34 = vor.u32 %v7855_v25, %v7357_v45 }
 0x5c0   : > { %v4978_v24 = vpop.f32.mrf.mxu2  ;;  %v4954_v48 = vpop.f32.mrf.mxu0 }
 0x5c1   : > { %v4979_v32 = vadd.f32 %v4978_v24, %v4966_v56  ;;  %v4991_v16 = vpop.f32.mrf.mxu3  ;;  %v4967_v5 = vpop.f32.mrf.mxu1 }
 0x5c2   : > { %5538 = vmatpush.bf16.msra.mxu3 %v7396_v0 }
 0x5c3   : > { %v4992_v4 = vadd.f32 %v4991_v16, %v4979_v32 }
 0x5c5   : > { %v5101_v26 = vmax.f32 %v4992_v4, 0.0 }
 0x5c6   : > { %5539 = vmatpush.bf16.msra.mxu3 %v7388_v59 }
 0x5c7   : > { %v5105_v10 = vpack.c.bf16 %v5101_v26, %v5101_v26  ;;  %v5171_v26 = vld [vmem:[%s10294_s10] sm:$0x3] }
 0x5c8   : > { %v4980_v39 = vpop.f32.mrf.mxu2  ;;  %v5493_v46 = vperm.slane %v5171_v26, 0  ;;  %v5494_v6 = vperm.slane %v5171_v26, 1 }
 0x5c9   : > { %5531 = vmatmul.bf16.vlgmr.msra.gmra.mxu2 %v5105_v10  ;;  %v4993_v9 = vpop.f32.mrf.mxu3 }
 0x5ca   : > { %5540 = vmatpush.bf16.msra.mxu3 %v7380_v43 }
 0x5ce   : > { %5541 = vmatpush.bf16.msra.mxu3 %v7372_v57 }
 0x5d2   : > { %5542 = vmatpush.bf16.msra.mxu3 %v7364_v23 }
 0x5d6   : > { %5543 = vmatpush.bf16.msra.mxu3 %v7356_v44 }
 0x5d8   : > { %v5004_v18 = vpop.f32.mrf.mxu0 }
 0x5d9   : > { %5583 = vmatmul.bf16.vlgmr.msrb.gmra.mxu2 %v5105_v10  ;;  %v5017_v47 = vpop.f32.mrf.mxu1  ;;  %v5005_v42 = vadd.f32 %v5004_v18, %v4678_v22  ;;  %v7885_v18 = vld [vmem:[%s10295_s11 + $0x70] sm:$0xff]  ;;  %v7880_v22 = vld [vmem:[%s10295_s11 + $0x48] sm:$0xff] }
 0x5da   : > { %5588 = vmatpush.bf16.msrb.mxu3 %v7416_v52  ;;  %v7878_v52 = vld [vmem:[%s10295_s11 + $0x38] sm:$0xff]  ;;  %5746 = vmatpush.bf16.msra.mxu1 %v7885_v18 }
 0x5db   : > { %v5018_v58 = vadd.f32 %v5017_v47, %v5005_v42  ;;  %5732 = vmatpush.bf16.msra.mxu0 %v7878_v52  ;;  %v7884_v47 = vld [vmem:[%s10295_s11 + $0x68] sm:$0xff] }
 0x5de   : > { %5589 = vmatpush.bf16.msrb.mxu3 %v7408_v21  ;;  %v7876_v21 = vld [vmem:[%s10295_s11 + $0x28] sm:$0xff]  ;;  %5747 = vmatpush.bf16.msra.mxu1 %v7884_v47 }
 0x5df   : > { %5733 = vmatpush.bf16.msra.mxu0 %v7877_v36 }
 0x5e0   : > { %v5030_v62 = vpop.f32.mrf.mxu2  ;;  %v5006_v1 = vpop.f32.mrf.mxu0 }
 0x5e1   : > { %v5043_v7 = vpop.f32.mrf.mxu3  ;;  %v5019_v28 = vpop.f32.mrf.mxu1  ;;  %v5031_v63 = vadd.f32 %v5030_v62, %v5018_v58 }
 0x5e2   : > { %5590 = vmatpush.bf16.msrb.mxu3 %v7400_v40  ;;  %v7874_v40 = vld [vmem:[%s10295_s11 + $0x18] sm:$0xff]  ;;  %v7883_v28 = vld [vmem:[%s10295_s11 + $0x60] sm:$0xff] }
 0x5e3   : > { %v5044_v35 = vadd.f32 %v5043_v7, %v5031_v63  ;;  %5734 = vmatpush.bf16.msra.mxu0 %v7876_v21  ;;  %v7873_v7 = vld [vmem:[%s10295_s11 + $0x10] sm:$0xff]  ;;  %5748 = vmatpush.bf16.msra.mxu1 %v7883_v28 }
 0x5e6   : > { %5591 = vmatpush.bf16.msrb.mxu3 %v7392_v17  ;;  %v7871_v17 = vld [vmem:[%s10295_s11] sm:$0xff] }
 0x5e7   : > { %5735 = vmatpush.bf16.msra.mxu0 %v7875_v14  ;;  %5749 = vmatpush.bf16.msra.mxu1 %v7882_v27 }
 0x5e8   : > { %v5032_v55 = vpop.f32.mrf.mxu2 }
 0x5e9   : > { %v5045_v49 = vpop.f32.mrf.mxu3 }
 0x5ea   : > { %5592 = vmatpush.bf16.msrb.mxu3 %v7384_v8  ;;  %v7879_v8 = vld [vmem:[%s10295_s11 + $0x40] sm:$0xff] }
 0x5eb   : > { %5736 = vmatpush.bf16.msra.mxu0 %v7874_v40  ;;  %5750 = vmatpush.bf16.msra.mxu1 %v7881_v30 }
 0x5ee   : > { %5593 = vmatpush.bf16.msrb.mxu3 %v7376_v12 }
 0x5ef   : > { %5737 = vmatpush.bf16.msra.mxu0 %v7873_v7  ;;  %5751 = vmatpush.bf16.msra.mxu1 %v7880_v22 }
 0x5f2   : > { %5594 = vmatpush.bf16.msrb.mxu3 %v7368_v13 }
 0x5f3   : > { %5738 = vmatpush.bf16.msra.mxu0 %v7872_v54  ;;  %5752 = vmatpush.bf16.msra.mxu1 %v7879_v8 }
 0x5f6   : > { %5595 = vmatpush.bf16.msrb.mxu3 %v7360_v34  ;;  %v5635_v34 = vld [vmem:[%s10296_s12] sm:$0x1] }
 0x5f7   : > { %5739 = vmatpush.bf16.msra.mxu0 %v7871_v17 }
 0x5f8   : > { %v5056_v0 = vpop.f32.mrf.mxu0 }
 0x5f9   : > { %v5069_v56 = vpop.f32.mrf.mxu1  ;;  %v5057_v53 = vadd.f32 %v5056_v0, %v5044_v35 }
 0x5fb   : > { %v5070_v15 = vadd.f32 %v5069_v56, %v5057_v53 }
 0x600   : > { %v5082_v24 = vpop.f32.mrf.mxu2  ;;  %v5058_v16 = vpop.f32.mrf.mxu0 }
 0x601   : > { %v5083_v59 = vadd.f32 %v5082_v24, %v5070_v15  ;;  %v5095_v32 = vpop.f32.mrf.mxu3  ;;  %v5071_v51 = vpop.f32.mrf.mxu1 }
 0x603   : > { %v5096_v38 = vadd.f32 %v5095_v32, %v5083_v59 }
 0x605   : > { %v5102_v4 = vmax.f32 %v5096_v38, 0.0 }
 0x607   : > { %v5106_v48 = vpack.c.bf16 %v5102_v4, %v5102_v4 }
 0x608   : > { %v5084_v5 = vpop.f32.mrf.mxu2 }
 0x609   : > { %v5097_v43 = vpop.f32.mrf.mxu3  ;;  %5544 = vmatmul.bf16.vlgmr.msra.gmra.mxu3 %v5106_v48 }
 0x618   : > { %v5506_v19 = vpop.f32.mrf.mxu0 }
 0x619   : > { %v5507_v10 = vadd.f32 %v5506_v19, %v5493_v46  ;;  %v5519_v39 = vpop.f32.mrf.mxu1  ;;  %5596 = vmatmul.bf16.vlgmr.msrb.gmra.mxu3 %v5106_v48 }
 0x61b   : > { %v5520_v57 = vadd.f32 %v5519_v39, %v5507_v10 }
 0x620   : > { %v5508_v9 = vpop.f32.mrf.mxu0 }
 0x621   : > { %v5521_v29 = vpop.f32.mrf.mxu1 }
 0x638   : > { %v5558_v23 = vpop.f32.mrf.mxu0 }
 0x639   : > { %v5559_v50 = vadd.f32 %v5558_v23, %v5494_v6  ;;  %v5571_v37 = vpop.f32.mrf.mxu1 }
 0x63b   : > { %v5572_v44 = vadd.f32 %v5571_v37, %v5559_v50 }
 0x640   : > { %v5560_v41 = vpop.f32.mrf.mxu0 }
 0x641   : > { %v5573_v2 = vpop.f32.mrf.mxu1 }
 0x64c   : > { %v5532_v33 = vpop.f32.mrf.mxu2 }
 0x64d   : > { %v5533_v60 = vadd.f32 %v5532_v33, %v5520_v57 }
 0x654   : > { %v5534_v62 = vpop.f32.mrf.mxu2 }
 0x65c   : > { %v5584_v20 = vpop.f32.mrf.mxu2 }
 0x65d   : > { %v5585_v31 = vadd.f32 %v5584_v20, %v5572_v44 }
 0x664   : > { %v5586_v1 = vpop.f32.mrf.mxu2 }
 0x68c   : > { %v5545_v3 = vpop.f32.mrf.mxu3 }
 0x68d   : > { %v5546_v55 = vadd.f32 %v5545_v3, %v5533_v60 }
 0x68f   : > { %v5601_v49 = vpack.c.bf16 %v5546_v55, %v5546_v55 }
 0x691   : > { %5740 = vmatmul.bf16.vlgmr.msra.gmra.mxu0 %v5601_v49 }
 0x694   : > { %v5547_v12 = vpop.f32.mrf.mxu3 }
 0x69c   : > { %v5597_v11 = vpop.f32.mrf.mxu3 }
 0x69d   : > { %v5598_v42 = vadd.f32 %v5597_v11, %v5585_v31 }
 0x69f   : > { %v5602_v13 = vpack.c.bf16 %v5598_v42, %v5598_v42 }
 0x6a1   : > { %5753 = vmatmul.bf16.vlgmr.msra.gmra.mxu1 %v5602_v13 }
 0x6a4   : > { %v5599_v25 = vpop.f32.mrf.mxu3 }
 0x70e   : > { %v5741_v45 = vpop.f32.mrf.mxu0 }
 0x70f   : > { %v5742_v63 = vadd.f32 %v5741_v45, %v5635_v34 }
 0x716   : > { %v5743_v58 = vpop.f32.mrf.mxu0 }
 0x71e   : > { %v5754_v35 = vpop.f32.mrf.mxu1 }
 0x71f   : > { %v5755_v0 = vadd.f32 %v5754_v35, %v5742_v63 }
 0x721   : > { %5759 = vst.msk [vmem:[%s10302_s25] sm:$0x1] %vm5758_vm8, %v5755_v0 }
 0x726   : > { %v5756_v56 = vpop.f32.mrf.mxu1 }
 0x727 PF: > { %s24_s29 = sadd.s32 1, %s8118_s29   ;;  %s10303_s25 = smov %s8110_s27 }
 0x728   : > { %p21_p12 = scmp.ge.s32.totalorder %s24_s29, 6   ;;  %s10304_s26 = smov %s8114_s28 }
 0x729   : > { %s10305_s27 = smov %s10308_s14  ;;  %s10306_s28 = smov %s10312_s15 }
 0x72a   :  { %23 = sbr.rel (!%p21_p12) target bundleno = 5 (0x5), region = 115 }
 0x72f   :  { %5777 = vsyncpa [#allocation4], 1 }
 0x730   :  { %5779 = vsyncpa [#allocation4 + $0x1], 1 }

</bundles_post_ra>
